<compile_context>
chip_gen: v6e
topology: v6e:2x2x1
jax: 0.10.0
libtpu: 0.0.40
codegen_flags: <defaults>
</compile_context>

<pallas_src>
import functools

import jax
import jax.numpy as jnp
from jax import lax
from jax.experimental import pallas as pl
from jax.experimental.pallas import tpu as pltpu

_LN_EPS = 1e-5  # PyTorch nn.LayerNorm default
_VMEM_BUDGET = 18 * 1024 * 1024  # target footprint for a grid step (fits v5e/v6e/v7x)


def _round_up(x, m):
    return (x + m - 1) // m * m


def _cdiv(a, b):
    return (a + b - 1) // b


def _gelu_exact(x):
    # PyTorch nn.GELU() default: exact erf formulation.
    return 0.5 * x * (1.0 + lax.erf(x * (1.0 / jnp.sqrt(2.0).astype(x.dtype))))


def _layernorm(x, gamma, beta):
    mu = jnp.mean(x, axis=-1, keepdims=True)
    xc = x - mu
    var = jnp.mean(xc * xc, axis=-1, keepdims=True)
    inv = lax.rsqrt(var + _LN_EPS)
    return xc * inv * gamma + beta


def _critic_kernel(s_ref, a_ref,
                   w1s_ref, w1a_ref, b1_ref, g1_ref, be1_ref,
                   w2_ref, b2_ref, g2_ref, be2_ref,
                   w3_ref, b3_ref,
                   o_ref,
                   *, batch, block_rows, mask_rows, bf16_matmul, approx_gelu):
    def act(x):
        if approx_gelu:
            return jax.nn.gelu(x, approximate=True)   # tanh GELU -> EUP slot (v5e relief)
        return _gelu_exact(x)

    mm = jnp.bfloat16 if bf16_matmul else jnp.float32

    s_blk = s_ref[...]
    a_blk = a_ref[...]
    if mask_rows:
        # Ragged last block: rows past the true batch hold unspecified VMEM data;
        # zero them so LN/GELU stay finite (garbage rows are sliced off in the wrapper).
        row = lax.broadcasted_iota(jnp.int32, (block_rows, 1), 0)
        valid = (pl.program_id(0) * block_rows + row) < batch
        s_blk = jnp.where(valid, s_blk, 0.0)
        a_blk = jnp.where(valid, a_blk, 0.0)

    # ---- Linear 1 with the concat fused away:
    #      cat([s, a], 1) @ W1 == s @ W1[:sdim] + a @ W1[sdim:]
    h = (jnp.dot(s_blk.astype(mm), w1s_ref[...].astype(mm),
                 preferred_element_type=jnp.float32)
         + jnp.dot(a_blk.astype(mm), w1a_ref[...].astype(mm),
                   preferred_element_type=jnp.float32)
         + b1_ref[...])
    h = act(_layernorm(h, g1_ref[...], be1_ref[...]))

    # ---- Linear 2 -> LayerNorm -> GELU
    h = jnp.dot(h.astype(mm), w2_ref[...].astype(mm),
                preferred_element_type=jnp.float32) + b2_ref[...]
    h = act(_layernorm(h, g2_ref[...], be2_ref[...]))

    # ---- Head (out_features == 1), emitted lane-dense as a (1, TB) row.
    #      Contract over the trailing dims of w3 (1, hid) and h (TB, hid):
    #      no explicit h.T, Mosaic folds the transpose into MXU operand handling.
    o = lax.dot_general(w3_ref[...].astype(mm), h.astype(mm),
                        dimension_numbers=(((1,), (1,)), ((), ())),
                        preferred_element_type=jnp.float32) + b3_ref[...]
    o_ref[...] = o.reshape(o_ref.shape).astype(o_ref.dtype)


def _block_footprint_bytes(tb, din, hid, weight_bytes):
    io_blocks = 2 * tb * (din + 1) * 4        # double-buffered s, a, out blocks (f32)
    intermediates = 4 * tb * hid * 4          # live (tb, hid) f32 temps (generous)
    return io_blocks + intermediates + weight_bytes


def _pick_block_rows(B, din, hid, weight_bytes):
    # Big tiles amortize the ~0.35us/step overhead; cap by hid, then shrink to budget.
    cap = 8192 if hid <= 256 else (4096 if hid <= 1024 else 2048)
    tb = min(cap, _round_up(max(B, 1), 128))
    while tb > 128 and _block_footprint_bytes(tb, din, hid, weight_bytes) > _VMEM_BUDGET:
        tb -= 128
    # Compute-heavy widths only: guarantee >= 2 batch blocks so the "parallel" grid
    # axis can occupy both TensorCores on v7x (splitting is pure overhead at small hid).
    if hid >= 512 and B >= 512:
        tb = min(tb, max(128, _round_up(_cdiv(B, 2), 128)))
    return tb


def critic_forward(s, a, params, *, block_b=None, bf16_matmul=False, approx_gelu=False):
    """s: (B, sdim), a: (B, adim). Returns (B, 1) float32."""
    B, sdim = s.shape
    _, adim = a.shape
    hid = params["w2"].shape[0]
    din = sdim + adim

    weights = (params["w1s"], params["w1a"], params["b1"], params["g1"], params["be1"],
               params["w2"], params["b2"], params["g2"], params["be2"],
               params["w3"], params["b3"])
    weight_bytes = 4 * sum(int(w.size) for w in weights)

    tb = block_b if block_b is not None else _pick_block_rows(B, din, hid, weight_bytes)
    nb = _cdiv(B, tb)

    footprint = _block_footprint_bytes(tb, din, hid, weight_bytes)
    vmem_limit = int(min(48 * 1024 * 1024, max(16 * 1024 * 1024, 2 * footprint)))

    kernel = functools.partial(
        _critic_kernel, batch=B, block_rows=tb, mask_rows=(B % tb != 0),
        bf16_matmul=bf16_matmul, approx_gelu=approx_gelu)

    flops = 2 * nb * tb * (din * hid + hid * hid + hid)
    transcendentals = 2 * nb * tb * hid + 2 * nb * tb        # 2 GELUs + 2 LN rsqrts
    bytes_accessed = 4 * (B * din + nb * tb) + weight_bytes

    def build_and_run(single_buffer_weights):
        def resident(arr):
            # Whole (2-D) weight, fetched once, VMEM-resident across all batch blocks.
            if single_buffer_weights:
                return pl.BlockSpec(arr.shape, lambda i: (0, 0),
                                    pipeline_mode=pl.Buffered(buffer_count=1))
            return pl.BlockSpec(arr.shape, lambda i: (0, 0))

        in_specs = ([pl.BlockSpec((tb, sdim), lambda i: (i, 0)),
                     pl.BlockSpec((tb, adim), lambda i: (i, 0))]
                    + [resident(w) for w in weights])
        out_spec = pl.BlockSpec((1, 1, tb), lambda i: (i, 0, 0))

        return pl.pallas_call(
            kernel,
            out_shape=jax.ShapeDtypeStruct((nb, 1, tb), jnp.float32),
            grid=(nb,),
            in_specs=in_specs,
            out_specs=out_spec,
            compiler_params=pltpu.CompilerParams(
                dimension_semantics=("parallel",),   # shard batch blocks across TCs (v7x)
                vmem_limit_bytes=vmem_limit),
            cost_estimate=pl.CostEstimate(
                flops=flops, transcendentals=transcendentals,
                bytes_accessed=bytes_accessed),
        )(s, a, *weights)

    try:
        out = build_and_run(True)        # single-buffered resident weights
    except Exception:
        # Compatibility fallback if this jax build rejects pipeline_mode=Buffered(1).
        out = build_and_run(False)

    # (nb, 1, tb) in row-major order == batch order; drop ragged tail, restore (B, 1).
    return out.reshape(nb * tb, 1)[:B]


def init_params(key, sdim, adim):
    """Deterministic init mirroring PyTorch defaults (uniform(-1/sqrt(fan_in), ...))."""
    din = sdim + adim
    hid = 2 ** (sdim + adim - 1).bit_length()

    def linear(key, fan_in, fan_out):
        kw, kb = jax.random.split(key)
        bound = 1.0 / jnp.sqrt(float(fan_in))
        w = jax.random.uniform(kw, (fan_in, fan_out), jnp.float32, -bound, bound)
        b = jax.random.uniform(kb, (1, fan_out), jnp.float32, -bound, bound)
        return w, b

    k1, k2, k3 = jax.random.split(key, 3)
    w1, b1 = linear(k1, din, hid)
    w2, b2 = linear(k2, hid, hid)
    w3, b3 = linear(k3, hid, 1)          # (hid, 1), (1, 1)
    return dict(
        w1s=w1[:sdim], w1a=w1[sdim:], b1=b1,      # W1 pre-split -> concat fused in kernel
        g1=jnp.ones((1, hid), jnp.float32), be1=jnp.zeros((1, hid), jnp.float32),
        w2=w2, b2=b2,
        g2=jnp.ones((1, hid), jnp.float32), be2=jnp.zeros((1, hid), jnp.float32),
        w3=w3.T,                                   # PyTorch layout (1, hid)
        b3=b3,                                     # (1, 1)
    ), hid


def _reference_forward(s, a, p):
    x = jnp.concatenate([s, a], axis=1)
    w1 = jnp.concatenate([p["w1s"], p["w1a"]], axis=0)
    h = x @ w1 + p["b1"]
    h = _gelu_exact(_layernorm(h, p["g1"], p["be1"]))
    h = h @ p["w2"] + p["b2"]
    h = _gelu_exact(_layernorm(h, p["g2"], p["be2"]))
    return h @ p["w3"].T + p["b3"]


if __name__ == "__main__":
    sdim, adim, batch = 20, 12, 8  # hid = 2 ** (31).bit_length() = 32

    key = jax.random.PRNGKey(0)
    kp, ks, ka = jax.random.split(key, 3)
    params, hid = init_params(kp, sdim, adim)

    s = jax.random.normal(ks, (batch, sdim), jnp.float32)
    a = jax.random.normal(ka, (batch, adim), jnp.float32)

    out = jax.block_until_ready(critic_forward(s, a, params))
    ref = _reference_forward(s, a, params)
    assert out.shape == (batch, 1), out.shape
    assert jnp.allclose(out, ref, atol=1e-5, rtol=1e-5), (out, ref)

    # Multi-block + ragged-last-block path (no padding, in-kernel row mask).
    batch2 = 300
    ks2, ka2 = jax.random.split(jax.random.PRNGKey(1))
    s2 = jax.random.normal(ks2, (batch2, sdim), jnp.float32)
    a2 = jax.random.normal(ka2, (batch2, adim), jnp.float32)
    out2 = jax.block_until_ready(critic_forward(s2, a2, params, block_b=128))
    ref2 = _reference_forward(s2, a2, params)
    assert out2.shape == (batch2, 1), out2.shape
    assert jnp.allclose(out2, ref2, atol=1e-5, rtol=1e-5)

    print("KERNEL_OK")
</pallas_src>

<mosaic_0001>
module attributes {stable_mosaic.version = 11 : i64} {
  func.func @_critic_kernel(%arg0: i32, %arg1: memref<128x20xf32, #tpu.memory_space<vmem>>, %arg2: memref<128x12xf32, #tpu.memory_space<vmem>>, %arg3: memref<20x32xf32, #tpu.memory_space<vmem>>, %arg4: memref<12x32xf32, #tpu.memory_space<vmem>>, %arg5: memref<1x32xf32, #tpu.memory_space<vmem>>, %arg6: memref<1x32xf32, #tpu.memory_space<vmem>>, %arg7: memref<1x32xf32, #tpu.memory_space<vmem>>, %arg8: memref<32x32xf32, #tpu.memory_space<vmem>>, %arg9: memref<1x32xf32, #tpu.memory_space<vmem>>, %arg10: memref<1x32xf32, #tpu.memory_space<vmem>>, %arg11: memref<1x32xf32, #tpu.memory_space<vmem>>, %arg12: memref<1x32xf32, #tpu.memory_space<vmem>>, %arg13: memref<1x1xf32, #tpu.memory_space<vmem>>, %arg14: memref<1x1x128xf32, #tpu.memory_space<vmem>>) attributes {dimension_semantics = [#tpu.dimension_semantics<parallel>], iteration_bounds = array<i64: 1>, scalar_prefetch = 0 : i64, scratch_operands = 0 : i64, tpu.core_type = #tpu.core_type<tc>, window_params = [{transform_indices = @transform_0, window_bounds = array<i64: 128, 20>}, {transform_indices = @transform_1, window_bounds = array<i64: 128, 12>}, {pipeline_mode = #tpu.pipeline_mode<synchronous>, transform_indices = @transform_2, window_bounds = array<i64: 20, 32>}, {pipeline_mode = #tpu.pipeline_mode<synchronous>, transform_indices = @transform_3, window_bounds = array<i64: 12, 32>}, {pipeline_mode = #tpu.pipeline_mode<synchronous>, transform_indices = @transform_4, window_bounds = array<i64: 1, 32>}, {pipeline_mode = #tpu.pipeline_mode<synchronous>, transform_indices = @transform_5, window_bounds = array<i64: 1, 32>}, {pipeline_mode = #tpu.pipeline_mode<synchronous>, transform_indices = @transform_6, window_bounds = array<i64: 1, 32>}, {pipeline_mode = #tpu.pipeline_mode<synchronous>, transform_indices = @transform_7, window_bounds = array<i64: 32, 32>}, {pipeline_mode = #tpu.pipeline_mode<synchronous>, transform_indices = @transform_8, window_bounds = array<i64: 1, 32>}, {pipeline_mode = #tpu.pipeline_mode<synchronous>, transform_indices = @transform_9, window_bounds = array<i64: 1, 32>}, {pipeline_mode = #tpu.pipeline_mode<synchronous>, transform_indices = @transform_10, window_bounds = array<i64: 1, 32>}, {pipeline_mode = #tpu.pipeline_mode<synchronous>, transform_indices = @transform_11, window_bounds = array<i64: 1, 32>}, {pipeline_mode = #tpu.pipeline_mode<synchronous>, transform_indices = @transform_12, window_bounds = array<i64: 1, 1>}, {transform_indices = @transform_13, window_bounds = array<i64: 1, 1, 128>}]} {
    %c0 = arith.constant 0 : index
    %c0_0 = arith.constant 0 : index
    %0 = vector.load %arg1[%c0, %c0_0] : memref<128x20xf32, #tpu.memory_space<vmem>>, vector<128x20xf32>
    %c0_1 = arith.constant 0 : index
    %c0_2 = arith.constant 0 : index
    %1 = vector.load %arg2[%c0_1, %c0_2] : memref<128x12xf32, #tpu.memory_space<vmem>>, vector<128x12xf32>
    %2 = tpu.iota {dimensions = array<i32: 0>} : vector<128x1xi32>
    %c128_i32 = arith.constant 128 : i32
    %3 = arith.muli %arg0, %c128_i32 : i32
    %4 = vector.broadcast %3 : i32 to vector<128x1xi32>
    %5 = arith.addi %4, %2 : vector<128x1xi32>
    %c8_i32 = arith.constant 8 : i32
    %6 = vector.broadcast %c8_i32 : i32 to vector<128x1xi32>
    %7 = arith.cmpi slt, %5, %6 : vector<128x1xi32>
    %cst = arith.constant 0.000000e+00 : f32
    %8 = vector.shape_cast %7 : vector<128x1xi1> to vector<128x1xi1>
    %9 = vector.broadcast %8 : vector<128x1xi1> to vector<128x20xi1>
    %10 = vector.broadcast %cst : f32 to vector<128x20xf32>
    %11 = arith.select %9, %0, %10 : vector<128x20xi1>, vector<128x20xf32>
    %cst_3 = arith.constant 0.000000e+00 : f32
    %12 = vector.shape_cast %7 : vector<128x1xi1> to vector<128x1xi1>
    %13 = vector.broadcast %12 : vector<128x1xi1> to vector<128x12xi1>
    %14 = vector.broadcast %cst_3 : f32 to vector<128x12xf32>
    %15 = arith.select %13, %1, %14 : vector<128x12xi1>, vector<128x12xf32>
    %c0_4 = arith.constant 0 : index
    %c0_5 = arith.constant 0 : index
    %16 = vector.load %arg3[%c0_4, %c0_5] : memref<20x32xf32, #tpu.memory_space<vmem>>, vector<20x32xf32>
    %cst_6 = arith.constant dense<0.000000e+00> : vector<128x32xf32>
    %17 = tpu.matmul %11, %16, %cst_6 {dimension_numbers = #tpu.dot_dimension_numbers<[1], [0], [0], [1], [0, 0, 1, 1], [], []>} : vector<128x20xf32>, vector<20x32xf32>, vector<128x32xf32> -> vector<128x32xf32>
    %c0_7 = arith.constant 0 : index
    %c0_8 = arith.constant 0 : index
    %18 = vector.load %arg4[%c0_7, %c0_8] : memref<12x32xf32, #tpu.memory_space<vmem>>, vector<12x32xf32>
    %cst_9 = arith.constant dense<0.000000e+00> : vector<128x32xf32>
    %19 = tpu.matmul %15, %18, %cst_9 {dimension_numbers = #tpu.dot_dimension_numbers<[1], [0], [0], [1], [0, 0, 1, 1], [], []>} : vector<128x12xf32>, vector<12x32xf32>, vector<128x32xf32> -> vector<128x32xf32>
    %20 = arith.addf %17, %19 : vector<128x32xf32>
    %c0_10 = arith.constant 0 : index
    %c0_11 = arith.constant 0 : index
    %21 = vector.load %arg5[%c0_10, %c0_11] : memref<1x32xf32, #tpu.memory_space<vmem>>, vector<1x32xf32>
    %22 = vector.broadcast %21 : vector<1x32xf32> to vector<128x32xf32>
    %23 = arith.addf %20, %22 : vector<128x32xf32>
    %c0_12 = arith.constant 0 : index
    %c0_13 = arith.constant 0 : index
    %24 = vector.load %arg6[%c0_12, %c0_13] : memref<1x32xf32, #tpu.memory_space<vmem>>, vector<1x32xf32>
    %c0_14 = arith.constant 0 : index
    %c0_15 = arith.constant 0 : index
    %25 = vector.load %arg7[%c0_14, %c0_15] : memref<1x32xf32, #tpu.memory_space<vmem>>, vector<1x32xf32>
    %cst_16 = arith.constant dense<0.000000e+00> : vector<128xf32>
    %26 = vector.multi_reduction <add>, %23, %cst_16 [1] : vector<128x32xf32> to vector<128xf32>
    %27 = vector.shape_cast %26 : vector<128xf32> to vector<128x1xf32>
    %cst_17 = arith.constant 3.200000e+01 : f32
    %28 = vector.broadcast %cst_17 : f32 to vector<128x1xf32>
    %29 = arith.divf %27, %28 : vector<128x1xf32>
    %30 = vector.broadcast %29 : vector<128x1xf32> to vector<128x32xf32>
    %31 = arith.subf %23, %30 : vector<128x32xf32>
    %32 = arith.mulf %31, %31 : vector<128x32xf32>
    %cst_18 = arith.constant dense<0.000000e+00> : vector<128xf32>
    %33 = vector.multi_reduction <add>, %32, %cst_18 [1] : vector<128x32xf32> to vector<128xf32>
    %34 = vector.shape_cast %33 : vector<128xf32> to vector<128x1xf32>
    %cst_19 = arith.constant 3.200000e+01 : f32
    %35 = vector.broadcast %cst_19 : f32 to vector<128x1xf32>
    %36 = arith.divf %34, %35 : vector<128x1xf32>
    %cst_20 = arith.constant 9.99999974E-6 : f32
    %37 = vector.broadcast %cst_20 : f32 to vector<128x1xf32>
    %38 = arith.addf %36, %37 : vector<128x1xf32>
    %39 = math.rsqrt %38 : vector<128x1xf32>
    %40 = vector.broadcast %39 : vector<128x1xf32> to vector<128x32xf32>
    %41 = arith.mulf %31, %40 : vector<128x32xf32>
    %42 = vector.broadcast %24 : vector<1x32xf32> to vector<128x32xf32>
    %43 = arith.mulf %41, %42 : vector<128x32xf32>
    %44 = vector.broadcast %25 : vector<1x32xf32> to vector<128x32xf32>
    %45 = arith.addf %43, %44 : vector<128x32xf32>
    %cst_21 = arith.constant 5.000000e-01 : f32
    %46 = vector.broadcast %cst_21 : f32 to vector<128x32xf32>
    %47 = arith.mulf %46, %45 : vector<128x32xf32>
    %cst_22 = arith.constant 2.000000e+00 : f32
    %48 = math.sqrt %cst_22 : f32
    %cst_23 = arith.constant 1.000000e+00 : f32
    %49 = arith.divf %cst_23, %48 : f32
    %50 = vector.broadcast %49 : f32 to vector<128x32xf32>
    %51 = arith.mulf %45, %50 : vector<128x32xf32>
    %52 = math.erf %51 : vector<128x32xf32>
    %cst_24 = arith.constant 1.000000e+00 : f32
    %53 = vector.broadcast %cst_24 : f32 to vector<128x32xf32>
    %54 = arith.addf %53, %52 : vector<128x32xf32>
    %55 = arith.mulf %47, %54 : vector<128x32xf32>
    %c0_25 = arith.constant 0 : index
    %c0_26 = arith.constant 0 : index
    %56 = vector.load %arg8[%c0_25, %c0_26] : memref<32x32xf32, #tpu.memory_space<vmem>>, vector<32x32xf32>
    %cst_27 = arith.constant dense<0.000000e+00> : vector<128x32xf32>
    %57 = tpu.matmul %55, %56, %cst_27 {dimension_numbers = #tpu.dot_dimension_numbers<[1], [0], [0], [1], [0, 0, 1, 1], [], []>} : vector<128x32xf32>, vector<32x32xf32>, vector<128x32xf32> -> vector<128x32xf32>
    %c0_28 = arith.constant 0 : index
    %c0_29 = arith.constant 0 : index
    %58 = vector.load %arg9[%c0_28, %c0_29] : memref<1x32xf32, #tpu.memory_space<vmem>>, vector<1x32xf32>
    %59 = vector.broadcast %58 : vector<1x32xf32> to vector<128x32xf32>
    %60 = arith.addf %57, %59 : vector<128x32xf32>
    %c0_30 = arith.constant 0 : index
    %c0_31 = arith.constant 0 : index
    %61 = vector.load %arg10[%c0_30, %c0_31] : memref<1x32xf32, #tpu.memory_space<vmem>>, vector<1x32xf32>
    %c0_32 = arith.constant 0 : index
    %c0_33 = arith.constant 0 : index
    %62 = vector.load %arg11[%c0_32, %c0_33] : memref<1x32xf32, #tpu.memory_space<vmem>>, vector<1x32xf32>
    %cst_34 = arith.constant dense<0.000000e+00> : vector<128xf32>
    %63 = vector.multi_reduction <add>, %60, %cst_34 [1] : vector<128x32xf32> to vector<128xf32>
    %64 = vector.shape_cast %63 : vector<128xf32> to vector<128x1xf32>
    %cst_35 = arith.constant 3.200000e+01 : f32
    %65 = vector.broadcast %cst_35 : f32 to vector<128x1xf32>
    %66 = arith.divf %64, %65 : vector<128x1xf32>
    %67 = vector.broadcast %66 : vector<128x1xf32> to vector<128x32xf32>
    %68 = arith.subf %60, %67 : vector<128x32xf32>
    %69 = arith.mulf %68, %68 : vector<128x32xf32>
    %cst_36 = arith.constant dense<0.000000e+00> : vector<128xf32>
    %70 = vector.multi_reduction <add>, %69, %cst_36 [1] : vector<128x32xf32> to vector<128xf32>
    %71 = vector.shape_cast %70 : vector<128xf32> to vector<128x1xf32>
    %cst_37 = arith.constant 3.200000e+01 : f32
    %72 = vector.broadcast %cst_37 : f32 to vector<128x1xf32>
    %73 = arith.divf %71, %72 : vector<128x1xf32>
    %cst_38 = arith.constant 9.99999974E-6 : f32
    %74 = vector.broadcast %cst_38 : f32 to vector<128x1xf32>
    %75 = arith.addf %73, %74 : vector<128x1xf32>
    %76 = math.rsqrt %75 : vector<128x1xf32>
    %77 = vector.broadcast %76 : vector<128x1xf32> to vector<128x32xf32>
    %78 = arith.mulf %68, %77 : vector<128x32xf32>
    %79 = vector.broadcast %61 : vector<1x32xf32> to vector<128x32xf32>
    %80 = arith.mulf %78, %79 : vector<128x32xf32>
    %81 = vector.broadcast %62 : vector<1x32xf32> to vector<128x32xf32>
    %82 = arith.addf %80, %81 : vector<128x32xf32>
    %cst_39 = arith.constant 5.000000e-01 : f32
    %83 = vector.broadcast %cst_39 : f32 to vector<128x32xf32>
    %84 = arith.mulf %83, %82 : vector<128x32xf32>
    %cst_40 = arith.constant 2.000000e+00 : f32
    %85 = math.sqrt %cst_40 : f32
    %cst_41 = arith.constant 1.000000e+00 : f32
    %86 = arith.divf %cst_41, %85 : f32
    %87 = vector.broadcast %86 : f32 to vector<128x32xf32>
    %88 = arith.mulf %82, %87 : vector<128x32xf32>
    %89 = math.erf %88 : vector<128x32xf32>
    %cst_42 = arith.constant 1.000000e+00 : f32
    %90 = vector.broadcast %cst_42 : f32 to vector<128x32xf32>
    %91 = arith.addf %90, %89 : vector<128x32xf32>
    %92 = arith.mulf %84, %91 : vector<128x32xf32>
    %c0_43 = arith.constant 0 : index
    %c0_44 = arith.constant 0 : index
    %93 = vector.load %arg12[%c0_43, %c0_44] : memref<1x32xf32, #tpu.memory_space<vmem>>, vector<1x32xf32>
    %cst_45 = arith.constant dense<0.000000e+00> : vector<1x128xf32>
    %94 = tpu.matmul %93, %92, %cst_45 {dimension_numbers = #tpu.dot_dimension_numbers<[1], [1], [0], [0], [0, 0, 1, 0], [], []>} : vector<1x32xf32>, vector<128x32xf32>, vector<1x128xf32> -> vector<1x128xf32>
    %c0_46 = arith.constant 0 : index
    %c0_47 = arith.constant 0 : index
    %95 = vector.load %arg13[%c0_46, %c0_47] : memref<1x1xf32, #tpu.memory_space<vmem>>, vector<1x1xf32>
    %96 = vector.broadcast %95 : vector<1x1xf32> to vector<1x128xf32>
    %97 = arith.addf %94, %96 : vector<1x128xf32>
    %98 = vector.shape_cast %97 : vector<1x128xf32> to vector<1x1x128xf32>
    %c0_48 = arith.constant 0 : index
    %c0_49 = arith.constant 0 : index
    %c0_50 = arith.constant 0 : index
    %99 = vector.load %arg14[%c0_48, %c0_49, %c0_50] : memref<1x1x128xf32, #tpu.memory_space<vmem>>, vector<1x1x128xf32>
    tpu.vector_store %arg14[%c0_48, %c0_49, %c0_50], %98 {strides = array<i32>} : memref<1x1x128xf32, #tpu.memory_space<vmem>>, vector<1x1x128xf32>,
    return
  }
  func.func @transform_0(%arg0: i32) -> (i32, i32) {
    %c0_i32 = arith.constant 0 : i32
    %c0_i32_0 = arith.constant 0 : i32
    return %arg0, %c0_i32 : i32, i32
  }
  func.func @transform_1(%arg0: i32) -> (i32, i32) {
    %c0_i32 = arith.constant 0 : i32
    %c0_i32_0 = arith.constant 0 : i32
    return %arg0, %c0_i32 : i32, i32
  }
  func.func @transform_2(%arg0: i32) -> (i32, i32) {
    %c0_i32 = arith.constant 0 : i32
    %c0_i32_0 = arith.constant 0 : i32
    %c0_i32_1 = arith.constant 0 : i32
    return %c0_i32, %c0_i32_0 : i32, i32
  }
  func.func @transform_3(%arg0: i32) -> (i32, i32) {
    %c0_i32 = arith.constant 0 : i32
    %c0_i32_0 = arith.constant 0 : i32
    %c0_i32_1 = arith.constant 0 : i32
    return %c0_i32, %c0_i32_0 : i32, i32
  }
  func.func @transform_4(%arg0: i32) -> (i32, i32) {
    %c0_i32 = arith.constant 0 : i32
    %c0_i32_0 = arith.constant 0 : i32
    %c0_i32_1 = arith.constant 0 : i32
    return %c0_i32, %c0_i32_0 : i32, i32
  }
  func.func @transform_5(%arg0: i32) -> (i32, i32) {
    %c0_i32 = arith.constant 0 : i32
    %c0_i32_0 = arith.constant 0 : i32
    %c0_i32_1 = arith.constant 0 : i32
    return %c0_i32, %c0_i32_0 : i32, i32
  }
  func.func @transform_6(%arg0: i32) -> (i32, i32) {
    %c0_i32 = arith.constant 0 : i32
    %c0_i32_0 = arith.constant 0 : i32
    %c0_i32_1 = arith.constant 0 : i32
    return %c0_i32, %c0_i32_0 : i32, i32
  }
  func.func @transform_7(%arg0: i32) -> (i32, i32) {
    %c0_i32 = arith.constant 0 : i32
    %c0_i32_0 = arith.constant 0 : i32
    %c0_i32_1 = arith.constant 0 : i32
    return %c0_i32, %c0_i32_0 : i32, i32
  }
  func.func @transform_8(%arg0: i32) -> (i32, i32) {
    %c0_i32 = arith.constant 0 : i32
    %c0_i32_0 = arith.constant 0 : i32
    %c0_i32_1 = arith.constant 0 : i32
    return %c0_i32, %c0_i32_0 : i32, i32
  }
  func.func @transform_9(%arg0: i32) -> (i32, i32) {
    %c0_i32 = arith.constant 0 : i32
    %c0_i32_0 = arith.constant 0 : i32
    %c0_i32_1 = arith.constant 0 : i32
    return %c0_i32, %c0_i32_0 : i32, i32
  }
  func.func @transform_10(%arg0: i32) -> (i32, i32) {
    %c0_i32 = arith.constant 0 : i32
    %c0_i32_0 = arith.constant 0 : i32
    %c0_i32_1 = arith.constant 0 : i32
    return %c0_i32, %c0_i32_0 : i32, i32
  }
  func.func @transform_11(%arg0: i32) -> (i32, i32) {
    %c0_i32 = arith.constant 0 : i32
    %c0_i32_0 = arith.constant 0 : i32
    %c0_i32_1 = arith.constant 0 : i32
    return %c0_i32, %c0_i32_0 : i32, i32
  }
  func.func @transform_12(%arg0: i32) -> (i32, i32) {
    %c0_i32 = arith.constant 0 : i32
    %c0_i32_0 = arith.constant 0 : i32
    %c0_i32_1 = arith.constant 0 : i32
    return %c0_i32, %c0_i32_0 : i32, i32
  }
  func.func @transform_13(%arg0: i32) -> (i32, i32, i32) {
    %c0_i32 = arith.constant 0 : i32
    %c0_i32_0 = arith.constant 0 : i32
    %c0_i32_1 = arith.constant 0 : i32
    return %arg0, %c0_i32, %c0_i32_0 : i32, i32, i32
  }
}

module attributes {stable_mosaic.version = 11 : i64} {
  func.func @_critic_kernel(%arg0: i32, %arg1: memref<128x20xf32, #tpu.memory_space<vmem>>, %arg2: memref<128x12xf32, #tpu.memory_space<vmem>>, %arg3: memref<20x32xf32, #tpu.memory_space<vmem>>, %arg4: memref<12x32xf32, #tpu.memory_space<vmem>>, %arg5: memref<1x32xf32, #tpu.memory_space<vmem>>, %arg6: memref<1x32xf32, #tpu.memory_space<vmem>>, %arg7: memref<1x32xf32, #tpu.memory_space<vmem>>, %arg8: memref<32x32xf32, #tpu.memory_space<vmem>>, %arg9: memref<1x32xf32, #tpu.memory_space<vmem>>, %arg10: memref<1x32xf32, #tpu.memory_space<vmem>>, %arg11: memref<1x32xf32, #tpu.memory_space<vmem>>, %arg12: memref<1x32xf32, #tpu.memory_space<vmem>>, %arg13: memref<1x1xf32, #tpu.memory_space<vmem>>, %arg14: memref<1x1x128xf32, #tpu.memory_space<vmem>>) attributes {dimension_semantics = [#tpu.dimension_semantics<parallel>], iteration_bounds = array<i64: 1>, scalar_prefetch = 0 : i64, scratch_operands = 0 : i64, tpu.core_type = #tpu.core_type<tc>, window_params = [{transform_indices = @transform_0, window_bounds = array<i64: 128, 20>}, {transform_indices = @transform_1, window_bounds = array<i64: 128, 12>}, {pipeline_mode = #tpu.pipeline_mode<synchronous>, transform_indices = @transform_2, window_bounds = array<i64: 20, 32>}, {pipeline_mode = #tpu.pipeline_mode<synchronous>, transform_indices = @transform_3, window_bounds = array<i64: 12, 32>}, {pipeline_mode = #tpu.pipeline_mode<synchronous>, transform_indices = @transform_4, window_bounds = array<i64: 1, 32>}, {pipeline_mode = #tpu.pipeline_mode<synchronous>, transform_indices = @transform_5, window_bounds = array<i64: 1, 32>}, {pipeline_mode = #tpu.pipeline_mode<synchronous>, transform_indices = @transform_6, window_bounds = array<i64: 1, 32>}, {pipeline_mode = #tpu.pipeline_mode<synchronous>, transform_indices = @transform_7, window_bounds = array<i64: 32, 32>}, {pipeline_mode = #tpu.pipeline_mode<synchronous>, transform_indices = @transform_8, window_bounds = array<i64: 1, 32>}, {pipeline_mode = #tpu.pipeline_mode<synchronous>, transform_indices = @transform_9, window_bounds = array<i64: 1, 32>}, {pipeline_mode = #tpu.pipeline_mode<synchronous>, transform_indices = @transform_10, window_bounds = array<i64: 1, 32>}, {pipeline_mode = #tpu.pipeline_mode<synchronous>, transform_indices = @transform_11, window_bounds = array<i64: 1, 32>}, {pipeline_mode = #tpu.pipeline_mode<synchronous>, transform_indices = @transform_12, window_bounds = array<i64: 1, 1>}, {transform_indices = @transform_13, window_bounds = array<i64: 1, 1, 128>}]} {
    %c0 = arith.constant 0 : index
    %c0_0 = arith.constant 0 : index
    %0 = vector.load %arg1[%c0, %c0_0] : memref<128x20xf32, #tpu.memory_space<vmem>>, vector<128x20xf32>
    %c0_1 = arith.constant 0 : index
    %c0_2 = arith.constant 0 : index
    %1 = vector.load %arg2[%c0_1, %c0_2] : memref<128x12xf32, #tpu.memory_space<vmem>>, vector<128x12xf32>
    %2 = tpu.iota {dimensions = array<i32: 0>} : vector<128x1xi32>
    %c128_i32 = arith.constant 128 : i32
    %3 = arith.muli %arg0, %c128_i32 : i32
    %4 = vector.broadcast %3 : i32 to vector<128x1xi32>
    %5 = arith.addi %4, %2 : vector<128x1xi32>
    %c8_i32 = arith.constant 8 : i32
    %6 = vector.broadcast %c8_i32 : i32 to vector<128x1xi32>
    %7 = arith.cmpi slt, %5, %6 : vector<128x1xi32>
    %cst = arith.constant 0.000000e+00 : f32
    %8 = vector.shape_cast %7 : vector<128x1xi1> to vector<128x1xi1>
    %9 = vector.broadcast %8 : vector<128x1xi1> to vector<128x20xi1>
    %10 = vector.broadcast %cst : f32 to vector<128x20xf32>
    %11 = arith.select %9, %0, %10 : vector<128x20xi1>, vector<128x20xf32>
    %cst_3 = arith.constant 0.000000e+00 : f32
    %12 = vector.shape_cast %7 : vector<128x1xi1> to vector<128x1xi1>
    %13 = vector.broadcast %12 : vector<128x1xi1> to vector<128x12xi1>
    %14 = vector.broadcast %cst_3 : f32 to vector<128x12xf32>
    %15 = arith.select %13, %1, %14 : vector<128x12xi1>, vector<128x12xf32>
    %c0_4 = arith.constant 0 : index
    %c0_5 = arith.constant 0 : index
    %16 = vector.load %arg3[%c0_4, %c0_5] : memref<20x32xf32, #tpu.memory_space<vmem>>, vector<20x32xf32>
    %cst_6 = arith.constant dense<0.000000e+00> : vector<128x32xf32>
    %17 = tpu.matmul %11, %16, %cst_6 {dimension_numbers = #tpu.dot_dimension_numbers<[1], [0], [0], [1], [0, 0, 1, 1], [], []>} : vector<128x20xf32>, vector<20x32xf32>, vector<128x32xf32> -> vector<128x32xf32>
    %c0_7 = arith.constant 0 : index
    %c0_8 = arith.constant 0 : index
    %18 = vector.load %arg4[%c0_7, %c0_8] : memref<12x32xf32, #tpu.memory_space<vmem>>, vector<12x32xf32>
    %cst_9 = arith.constant dense<0.000000e+00> : vector<128x32xf32>
    %19 = tpu.matmul %15, %18, %cst_9 {dimension_numbers = #tpu.dot_dimension_numbers<[1], [0], [0], [1], [0, 0, 1, 1], [], []>} : vector<128x12xf32>, vector<12x32xf32>, vector<128x32xf32> -> vector<128x32xf32>
    %20 = arith.addf %17, %19 : vector<128x32xf32>
    %c0_10 = arith.constant 0 : index
    %c0_11 = arith.constant 0 : index
    %21 = vector.load %arg5[%c0_10, %c0_11] : memref<1x32xf32, #tpu.memory_space<vmem>>, vector<1x32xf32>
    %22 = vector.broadcast %21 : vector<1x32xf32> to vector<128x32xf32>
    %23 = arith.addf %20, %22 : vector<128x32xf32>
    %c0_12 = arith.constant 0 : index
    %c0_13 = arith.constant 0 : index
    %24 = vector.load %arg6[%c0_12, %c0_13] : memref<1x32xf32, #tpu.memory_space<vmem>>, vector<1x32xf32>
    %c0_14 = arith.constant 0 : index
    %c0_15 = arith.constant 0 : index
    %25 = vector.load %arg7[%c0_14, %c0_15] : memref<1x32xf32, #tpu.memory_space<vmem>>, vector<1x32xf32>
    %cst_16 = arith.constant dense<0.000000e+00> : vector<128xf32>
    %26 = vector.multi_reduction <add>, %23, %cst_16 [1] : vector<128x32xf32> to vector<128xf32>
    %27 = vector.shape_cast %26 : vector<128xf32> to vector<128x1xf32>
    %cst_17 = arith.constant 3.200000e+01 : f32
    %28 = vector.broadcast %cst_17 : f32 to vector<128x1xf32>
    %29 = arith.divf %27, %28 : vector<128x1xf32>
    %30 = vector.broadcast %29 : vector<128x1xf32> to vector<128x32xf32>
    %31 = arith.subf %23, %30 : vector<128x32xf32>
    %32 = arith.mulf %31, %31 : vector<128x32xf32>
    %cst_18 = arith.constant dense<0.000000e+00> : vector<128xf32>
    %33 = vector.multi_reduction <add>, %32, %cst_18 [1] : vector<128x32xf32> to vector<128xf32>
    %34 = vector.shape_cast %33 : vector<128xf32> to vector<128x1xf32>
    %cst_19 = arith.constant 3.200000e+01 : f32
    %35 = vector.broadcast %cst_19 : f32 to vector<128x1xf32>
    %36 = arith.divf %34, %35 : vector<128x1xf32>
    %cst_20 = arith.constant 9.99999974E-6 : f32
    %37 = vector.broadcast %cst_20 : f32 to vector<128x1xf32>
    %38 = arith.addf %36, %37 : vector<128x1xf32>
    %39 = math.rsqrt %38 : vector<128x1xf32>
    %40 = vector.broadcast %39 : vector<128x1xf32> to vector<128x32xf32>
    %41 = arith.mulf %31, %40 : vector<128x32xf32>
    %42 = vector.broadcast %24 : vector<1x32xf32> to vector<128x32xf32>
    %43 = arith.mulf %41, %42 : vector<128x32xf32>
    %44 = vector.broadcast %25 : vector<1x32xf32> to vector<128x32xf32>
    %45 = arith.addf %43, %44 : vector<128x32xf32>
    %cst_21 = arith.constant 5.000000e-01 : f32
    %46 = vector.broadcast %cst_21 : f32 to vector<128x32xf32>
    %47 = arith.mulf %46, %45 : vector<128x32xf32>
    %cst_22 = arith.constant 2.000000e+00 : f32
    %48 = math.sqrt %cst_22 : f32
    %cst_23 = arith.constant 1.000000e+00 : f32
    %49 = arith.divf %cst_23, %48 : f32
    %50 = vector.broadcast %49 : f32 to vector<128x32xf32>
    %51 = arith.mulf %45, %50 : vector<128x32xf32>
    %52 = math.erf %51 : vector<128x32xf32>
    %cst_24 = arith.constant 1.000000e+00 : f32
    %53 = vector.broadcast %cst_24 : f32 to vector<128x32xf32>
    %54 = arith.addf %53, %52 : vector<128x32xf32>
    %55 = arith.mulf %47, %54 : vector<128x32xf32>
    %c0_25 = arith.constant 0 : index
    %c0_26 = arith.constant 0 : index
    %56 = vector.load %arg8[%c0_25, %c0_26] : memref<32x32xf32, #tpu.memory_space<vmem>>, vector<32x32xf32>
    %cst_27 = arith.constant dense<0.000000e+00> : vector<128x32xf32>
    %57 = tpu.matmul %55, %56, %cst_27 {dimension_numbers = #tpu.dot_dimension_numbers<[1], [0], [0], [1], [0, 0, 1, 1], [], []>} : vector<128x32xf32>, vector<32x32xf32>, vector<128x32xf32> -> vector<128x32xf32>
    %c0_28 = arith.constant 0 : index
    %c0_29 = arith.constant 0 : index
    %58 = vector.load %arg9[%c0_28, %c0_29] : memref<1x32xf32, #tpu.memory_space<vmem>>, vector<1x32xf32>
    %59 = vector.broadcast %58 : vector<1x32xf32> to vector<128x32xf32>
    %60 = arith.addf %57, %59 : vector<128x32xf32>
    %c0_30 = arith.constant 0 : index
    %c0_31 = arith.constant 0 : index
    %61 = vector.load %arg10[%c0_30, %c0_31] : memref<1x32xf32, #tpu.memory_space<vmem>>, vector<1x32xf32>
    %c0_32 = arith.constant 0 : index
    %c0_33 = arith.constant 0 : index
    %62 = vector.load %arg11[%c0_32, %c0_33] : memref<1x32xf32, #tpu.memory_space<vmem>>, vector<1x32xf32>
    %cst_34 = arith.constant dense<0.000000e+00> : vector<128xf32>
    %63 = vector.multi_reduction <add>, %60, %cst_34 [1] : vector<128x32xf32> to vector<128xf32>
    %64 = vector.shape_cast %63 : vector<128xf32> to vector<128x1xf32>
    %cst_35 = arith.constant 3.200000e+01 : f32
    %65 = vector.broadcast %cst_35 : f32 to vector<128x1xf32>
    %66 = arith.divf %64, %65 : vector<128x1xf32>
    %67 = vector.broadcast %66 : vector<128x1xf32> to vector<128x32xf32>
    %68 = arith.subf %60, %67 : vector<128x32xf32>
    %69 = arith.mulf %68, %68 : vector<128x32xf32>
    %cst_36 = arith.constant dense<0.000000e+00> : vector<128xf32>
    %70 = vector.multi_reduction <add>, %69, %cst_36 [1] : vector<128x32xf32> to vector<128xf32>
    %71 = vector.shape_cast %70 : vector<128xf32> to vector<128x1xf32>
    %cst_37 = arith.constant 3.200000e+01 : f32
    %72 = vector.broadcast %cst_37 : f32 to vector<128x1xf32>
    %73 = arith.divf %71, %72 : vector<128x1xf32>
    %cst_38 = arith.constant 9.99999974E-6 : f32
    %74 = vector.broadcast %cst_38 : f32 to vector<128x1xf32>
    %75 = arith.addf %73, %74 : vector<128x1xf32>
    %76 = math.rsqrt %75 : vector<128x1xf32>
    %77 = vector.broadcast %76 : vector<128x1xf32> to vector<128x32xf32>
    %78 = arith.mulf %68, %77 : vector<128x32xf32>
    %79 = vector.broadcast %61 : vector<1x32xf32> to vector<128x32xf32>
    %80 = arith.mulf %78, %79 : vector<128x32xf32>
    %81 = vector.broadcast %62 : vector<1x32xf32> to vector<128x32xf32>
    %82 = arith.addf %80, %81 : vector<128x32xf32>
    %cst_39 = arith.constant 5.000000e-01 : f32
    %83 = vector.broadcast %cst_39 : f32 to vector<128x32xf32>
    %84 = arith.mulf %83, %82 : vector<128x32xf32>
    %cst_40 = arith.constant 2.000000e+00 : f32
    %85 = math.sqrt %cst_40 : f32
    %cst_41 = arith.constant 1.000000e+00 : f32
    %86 = arith.divf %cst_41, %85 : f32
    %87 = vector.broadcast %86 : f32 to vector<128x32xf32>
    %88 = arith.mulf %82, %87 : vector<128x32xf32>
    %89 = math.erf %88 : vector<128x32xf32>
    %cst_42 = arith.constant 1.000000e+00 : f32
    %90 = vector.broadcast %cst_42 : f32 to vector<128x32xf32>
    %91 = arith.addf %90, %89 : vector<128x32xf32>
    %92 = arith.mulf %84, %91 : vector<128x32xf32>
    %c0_43 = arith.constant 0 : index
    %c0_44 = arith.constant 0 : index
    %93 = vector.load %arg12[%c0_43, %c0_44] : memref<1x32xf32, #tpu.memory_space<vmem>>, vector<1x32xf32>
    %cst_45 = arith.constant dense<0.000000e+00> : vector<1x128xf32>
    %94 = tpu.matmul %93, %92, %cst_45 {dimension_numbers = #tpu.dot_dimension_numbers<[1], [1], [0], [0], [0, 0, 1, 0], [], []>} : vector<1x32xf32>, vector<128x32xf32>, vector<1x128xf32> -> vector<1x128xf32>
    %c0_46 = arith.constant 0 : index
    %c0_47 = arith.constant 0 : index
    %95 = vector.load %arg13[%c0_46, %c0_47] : memref<1x1xf32, #tpu.memory_space<vmem>>, vector<1x1xf32>
    %96 = vector.broadcast %95 : vector<1x1xf32> to vector<1x128xf32>
    %97 = arith.addf %94, %96 : vector<1x128xf32>
    %98 = vector.shape_cast %97 : vector<1x128xf32> to vector<1x1x128xf32>
    %c0_48 = arith.constant 0 : index
    %c0_49 = arith.constant 0 : index
    %c0_50 = arith.constant 0 : index
    %99 = vector.load %arg14[%c0_48, %c0_49, %c0_50] : memref<1x1x128xf32, #tpu.memory_space<vmem>>, vector<1x1x128xf32>
    tpu.vector_store %arg14[%c0_48, %c0_49, %c0_50], %98 {strides = array<i32>} : memref<1x1x128xf32, #tpu.memory_space<vmem>>, vector<1x1x128xf32>,
    return
  }
  func.func @transform_0(%arg0: i32) -> (i32, i32) {
    %c0_i32 = arith.constant 0 : i32
    %c0_i32_0 = arith.constant 0 : i32
    return %arg0, %c0_i32 : i32, i32
  }
  func.func @transform_1(%arg0: i32) -> (i32, i32) {
    %c0_i32 = arith.constant 0 : i32
    %c0_i32_0 = arith.constant 0 : i32
    return %arg0, %c0_i32 : i32, i32
  }
  func.func @transform_2(%arg0: i32) -> (i32, i32) {
    %c0_i32 = arith.constant 0 : i32
    %c0_i32_0 = arith.constant 0 : i32
    %c0_i32_1 = arith.constant 0 : i32
    return %c0_i32, %c0_i32_0 : i32, i32
  }
  func.func @transform_3(%arg0: i32) -> (i32, i32) {
    %c0_i32 = arith.constant 0 : i32
    %c0_i32_0 = arith.constant 0 : i32
    %c0_i32_1 = arith.constant 0 : i32
    return %c0_i32, %c0_i32_0 : i32, i32
  }
  func.func @transform_4(%arg0: i32) -> (i32, i32) {
    %c0_i32 = arith.constant 0 : i32
    %c0_i32_0 = arith.constant 0 : i32
    %c0_i32_1 = arith.constant 0 : i32
    return %c0_i32, %c0_i32_0 : i32, i32
  }
  func.func @transform_5(%arg0: i32) -> (i32, i32) {
    %c0_i32 = arith.constant 0 : i32
    %c0_i32_0 = arith.constant 0 : i32
    %c0_i32_1 = arith.constant 0 : i32
    return %c0_i32, %c0_i32_0 : i32, i32
  }
  func.func @transform_6(%arg0: i32) -> (i32, i32) {
    %c0_i32 = arith.constant 0 : i32
    %c0_i32_0 = arith.constant 0 : i32
    %c0_i32_1 = arith.constant 0 : i32
    return %c0_i32, %c0_i32_0 : i32, i32
  }
  func.func @transform_7(%arg0: i32) -> (i32, i32) {
    %c0_i32 = arith.constant 0 : i32
    %c0_i32_0 = arith.constant 0 : i32
    %c0_i32_1 = arith.constant 0 : i32
    return %c0_i32, %c0_i32_0 : i32, i32
  }
  func.func @transform_8(%arg0: i32) -> (i32, i32) {
    %c0_i32 = arith.constant 0 : i32
    %c0_i32_0 = arith.constant 0 : i32
    %c0_i32_1 = arith.constant 0 : i32
    return %c0_i32, %c0_i32_0 : i32, i32
  }
  func.func @transform_9(%arg0: i32) -> (i32, i32) {
    %c0_i32 = arith.constant 0 : i32
    %c0_i32_0 = arith.constant 0 : i32
    %c0_i32_1 = arith.constant 0 : i32
    return %c0_i32, %c0_i32_0 : i32, i32
  }
  func.func @transform_10(%arg0: i32) -> (i32, i32) {
    %c0_i32 = arith.constant 0 : i32
    %c0_i32_0 = arith.constant 0 : i32
    %c0_i32_1 = arith.constant 0 : i32
    return %c0_i32, %c0_i32_0 : i32, i32
  }
  func.func @transform_11(%arg0: i32) -> (i32, i32) {
    %c0_i32 = arith.constant 0 : i32
    %c0_i32_0 = arith.constant 0 : i32
    %c0_i32_1 = arith.constant 0 : i32
    return %c0_i32, %c0_i32_0 : i32, i32
  }
  func.func @transform_12(%arg0: i32) -> (i32, i32) {
    %c0_i32 = arith.constant 0 : i32
    %c0_i32_0 = arith.constant 0 : i32
    %c0_i32_1 = arith.constant 0 : i32
    return %c0_i32, %c0_i32_0 : i32, i32
  }
  func.func @transform_13(%arg0: i32) -> (i32, i32, i32) {
    %c0_i32 = arith.constant 0 : i32
    %c0_i32_0 = arith.constant 0 : i32
    %c0_i32_1 = arith.constant 0 : i32
    return %arg0, %c0_i32, %c0_i32_0 : i32, i32, i32
  }
}

</mosaic_0001>

<bundles_post_ra>
// kernel: tpu_custom_call.1
= control target key start
LH: loop header
LB: loop body
LE: loop exit
PB: predicated region body
PF: predicated region fallthrough
CT: control target
= control target key end

     0   :  { %s2951_s0 = inlined_call_operand.hbm [shape: f32[8,20], index: 0, kind: input, shape index: {}]   ;;  %s2952_s1 = inlined_call_operand.hbm [shape: f32[8,12], index: 1, kind: input, shape index: {}]   ;;  %s2953_s2 = inlined_call_operand.hbm [shape: f32[20,32], index: 2, kind: input, shape index: {}]   ;;  %s2954_s3 = inlined_call_operand.hbm [shape: f32[12,32], index: 3, kind: input, shape index: {}]   ;;  %s2955_s4 = inlined_call_operand.vmem [shape: f32[1,32], index: 4, kind: input, shape index: {}]   ;;  %s2956_s5 = inlined_call_operand.vmem [shape: f32[1,32], index: 5, kind: input, shape index: {}]   ;;  %s2957_s6 = inlined_call_operand.vmem [shape: f32[1,32], index: 6, kind: input, shape index: {}]   ;;  %s2958_s7 = inlined_call_operand.hbm [shape: f32[32,32], index: 7, kind: input, shape index: {}]   ;;  %s2959_s8 = inlined_call_operand.vmem [shape: f32[1,32], index: 8, kind: input, shape index: {}]   ;;  %s2960_s9 = inlined_call_operand.vmem [shape: f32[1,32], index: 9, kind: input, shape index: {}]   ;;  %s2961_s10 = inlined_call_operand.vmem [shape: f32[1,32], index: 10, kind: input, shape index: {}]   ;;  %s2962_s11 = inlined_call_operand.vmem [shape: f32[1,32], index: 11, kind: input, shape index: {}]   ;;  %s2963_s12 = inlined_call_operand.<no memory space> [shape: f32[1,1], index: 12, kind: input, shape index: {}]   ;;  %s2964_s13 = inlined_call_operand.hbm [shape: f32[1,1,128], index: 13, kind: output, shape index: {}]  }
   0x1   :  { %v18_v0 = vstv %s2963_s12 }
   0x2   :  { %19 = vst [vmem:[#allocation2] sm:$0x1] %v18_v0 }
   0x3   :  { %20 = vsyncpa [#allocation4], 0 }
   0x4   :  { %21 = vsyncpa [#allocation7], 0 }
   0x5   :  { %22 = vsyncpa [#allocation10], 0 }
   0x6   :  { %23 = vsyncpa [#allocation5], 0 }
   0x7   :  { %28 = vsyncadd [#allocation4], 1920  ;;  %s2219_s27 = smov [#allocation3]  }
   0x8   :  { %s29_s28 = sshll.u32 %s2219_s27, 4  ;;  %s30_s28 = int_to_ptr.vmem [resolvable:$true] %s29_s28 }
   0x9   :  { %s2099_s29 = scalar_lea.vmem %s30_s28, 128  ;;  %s2103_s30 = scalar_lea.vmem %s30_s28, 2048 }
   0xa   :  { %p2100_p0 = scmp.ne.s32.totalorder %s30_s28, %s2099_s29  ;;  %p2104_p1 = scmp.lt.s32.totalorder %s30_s28, %s30_s28 }
   0xb   :  { %p2105_p2 = scmp.lt.s32.totalorder %s2103_s30, %s2099_s29 }
   0xd   :  { %p2106_p3 = por %p2105_p2, %p2104_p1 }
   0xf   :  { %p2107_p4 = pnand %p2106_p3, %p2100_p0 }
  0x11   :  { %2110 = shalt.err (!%p2107_p4)
}
  0x12   :  { %s2220_s14 = smov 128   ;;  %s2221_s15 = smov 8  }
  0x13   :  { %35 = dma.hbm_to_vmem [thread:$0]  %s2951_s0, 128, %s30_s28, [#allocation4], %s2220_s14, %s2220_s14, %s2221_s15  }
  0x14   :  { %40 = vsyncadd [#allocation7], 1920  ;;  %s2222_s17 = smov [#allocation6]   ;;  %s2223_s19 = smov [#allocation9]  }
  0x15   :  { %s41_s18 = sshll.u32 %s2222_s17, 4  ;;  %s65_s20 = sshll.u32 %s2223_s19, 4  ;;  %s42_s18 = int_to_ptr.vmem [resolvable:$true] %s41_s18  ;;  %s66_s20 = int_to_ptr.vmem [resolvable:$true] %s65_s20 }
  0x16   :  { %s2119_s21 = scalar_lea.vmem %s42_s18, 128  ;;  %s2123_s22 = scalar_lea.vmem %s42_s18, 2048 }
  0x17   :  { %p2120_p5 = scmp.ne.s32.totalorder %s42_s18, %s2119_s21  ;;  %p2124_p6 = scmp.lt.s32.totalorder %s42_s18, %s42_s18 }
  0x18   :  { %p2125_p7 = scmp.lt.s32.totalorder %s2123_s22, %s2119_s21 }
  0x1a   :  { %p2126_p8 = por %p2125_p7, %p2124_p6 }
  0x1c   :  { %p2127_p9 = pnand %p2126_p8, %p2120_p5 }
  0x1e   :  { %2130 = shalt.err (!%p2127_p9)
}
  0x1f   :  { %47 = dma.hbm_to_vmem [thread:$0]  %s2952_s1, 128, %s42_s18, [#allocation7], %s2220_s14, %s2220_s14, %s2221_s15  }
  0x20   :  { %s2139_s24 = scalar_lea.vmem %s66_s20, 256  ;;  %p2144_p11 = scmp.lt.s32.totalorder %s66_s20, %s66_s20 }
  0x21   :  { %p2140_p10 = scmp.ne.s32.totalorder %s66_s20, %s2139_s24  ;;  %p2145_p12 = scmp.lt.s32.totalorder %s2139_s24, %s2139_s24 }
  0x23   :  { %p2146_p13 = por %p2145_p12, %p2144_p11 }
  0x25   :  { %p2147_p0 = pnand %p2146_p13, %p2140_p10 }
  0x27   :  { %2150 = shalt.err (!%p2147_p0)
}
  0x28   :  { %71 = dma.hbm_to_vmem [thread:$0]  %s2954_s3, 256, %s66_s20, [#allocation10], %s2220_s14, %s2220_s14, %s2221_s15  }
  0x29   :  { %s2224_s27 = smov [#allocation8]   ;;  %s2225_s29 = smov [#allocation11]  }
  0x2a   :  { %s53_s28 = sshll.u32 %s2224_s27, 4  ;;  %s83_s30 = sshll.u32 %s2225_s29, 4  ;;  %s54_s28 = int_to_ptr.vmem [resolvable:$true] %s53_s28  ;;  %s84_s30 = int_to_ptr.vmem [resolvable:$true] %s83_s30 }
  0x2b   :  { %s2159_s1 = scalar_lea.vmem %s54_s28, 384  ;;  %p2164_p2 = scmp.lt.s32.totalorder %s54_s28, %s54_s28 }
  0x2c   :  { %p2160_p1 = scmp.ne.s32.totalorder %s54_s28, %s2159_s1  ;;  %p2165_p3 = scmp.lt.s32.totalorder %s2159_s1, %s2159_s1 }
  0x2e   :  { %p2166_p4 = por %p2165_p3, %p2164_p2 }
  0x30   :  { %p2167_p5 = pnand %p2166_p4, %p2160_p1 }
  0x32   :  { %2170 = shalt.err (!%p2167_p5)
}
  0x33   :  { %59 = dma.hbm_to_vmem [thread:$0]  %s2953_s2, 384, %s54_s28, [#allocation7], %s2220_s14, %s2220_s14, %s2221_s15  }
  0x34   :  { %s2179_s3 = scalar_lea.vmem %s84_s30, 512  ;;  %p2184_p7 = scmp.lt.s32.totalorder %s84_s30, %s84_s30 }
  0x35   :  { %p2180_p6 = scmp.ne.s32.totalorder %s84_s30, %s2179_s3  ;;  %p2185_p8 = scmp.lt.s32.totalorder %s2179_s3, %s2179_s3 }
  0x37   :  { %p2186_p9 = por %p2185_p8, %p2184_p7 }
  0x39   :  { %p2187_p10 = pnand %p2186_p9, %p2180_p6 }
  0x3b   :  { %2190 = shalt.err (!%p2187_p10)
}
  0x3c   :  { %89 = dma.hbm_to_vmem [thread:$0]  %s2958_s7, 512, %s84_s30, [#allocation10], %s2220_s14, %s2220_s14, %s2221_s15  }
  0x3d   :  { %2211 = dma.done.wait [#allocation4], 2048  }
  0x3e   :  { %2212 = vsyncadd [#allocation4], 4294965248 }
  0x3f   :  { %2213 = dma.done.wait [#allocation7], 2432  }
  0x40   :  { %2214 = vsyncadd [#allocation7], 4294964864 }
  0x41   :  { %2215 = dma.done.wait [#allocation10], 768  }
  0x42   :  { %2216 = vsyncadd [#allocation10], 4294966528  ;;  %vm316_vm0 = vcmask 1043456   ;;  %v266_v1 = vld [vmem:[#allocation9 + $0x8] sm:$0xf]  ;;  %v265_v3 = vld [vmem:[#allocation9] sm:$0xff] }
  0x43   :  { %v264_v2 = vld [vmem:[#allocation8 + $0x10] sm:$0xf]  ;;  %1826 = vmatprep.subr.msk.mxu0 %vm316_vm0, %v266_v1  ;;  %v263_v4 = vld [vmem:[#allocation8 + $0x8] sm:$0xff]  ;;  %v131_v5 = vld [vmem:[#allocation6] sm:$0xff]  ;;  %vm267_vm1 = vcmask 97280   ;;  %vm465_vm2 = vcmask 162816  }
  0x44   :  { %1854 = vmatprep.subr.msk.mxu1 %vm316_vm0, %v264_v2  ;;  %1827 = vmatpush3.msk.msra.mxu0 %vm316_vm0, %v266_v1  ;;  %v262_v6 = vld [vmem:[#allocation8] sm:$0xff]  ;;  %v2226_v8 = vmov 0.0   ;;  %v2367_v18 = vld [vmem:[%s2955_s4] ss:$0 sm:$0xff]  ;;  %vm687_vm3 = vcmask 261120   ;;  %vm2227_vm4 = vmmov 0  }
  0x45   :  { %1855 = vmatpush3.msk.msra.mxu1 %vm316_vm0, %v264_v2  ;;  %1828 = vmatprep.subr.mxu0 %v265_v3  ;;  %v115_v7 = vld [vmem:[#allocation3] sm:$0xff]  ;;  %s2229_s23 = smov [#allocation12]  }
  0x46   :  { %1856 = vmatprep.subr.mxu1 %v263_v4  ;;  %1829 = vmatpush3.msra.mxu0 %v265_v3  ;;  %s1698_s0 = sshll.u32 %s2229_s23, 4  ;;  %s1699_s0 = int_to_ptr.vmem [resolvable:$true] %s1698_s0 }
  0x47   :  { %1830 = vmatprep.mubr.msk.f32.mxu0 %vm267_vm1, %v131_v5  ;;  %1857 = vmatpush3.msra.mxu1 %v263_v4  ;;  %s2191_s24 = scalar_lea.vmem %s1699_s0, 16  ;;  %s2195_s25 = scalar_lea.vmem %s1699_s0, 32 }
  0x48   :  { %1831 = vmatmul.mubr.f32.vlgmr.msra.gmra.mxu0 %v2226_v8  ;;  %1858 = vmatprep.subr.mxu1 %v262_v6  ;;  %p2192_p11 = scmp.ne.s32.totalorder %s1699_s0, %s2191_s24  ;;  %p2196_p12 = scmp.lt.s32.totalorder %s1699_s0, %s1699_s0 }
  0x49   :  { %1860 = vmatprep.mubr.msk.f32.mxu1 %vm465_vm2, %v115_v7  ;;  %1859 = vmatpush3.msra.mxu1 %v262_v6  ;;  %p2197_p13 = scmp.lt.s32.totalorder %s2195_s25, %s2191_s24 }
  0x4a   :  { %1833 = vmatprep.mubr.f32.mxu0 %v2226_v8  ;;  %1861 = vmatmul.mubr.f32.vlgmr.msra.gmra.mxu1 %v2226_v8 }
  0x4b   :  { %1916 = vmatprep.subr.mxu1 %v2226_v8  ;;  %1863 = vmatprep.mubr.f32.mxu1 %v2226_v8  ;;  %p2198_p0 = por %p2197_p13, %p2196_p12 }
  0x4c   :  { %1834 = vmatmul.mubr.f32.gmra.mxu0 %v2226_v8 }
  0x4d   :  { %1836 = vmatprep.mubr.f32.mxu0 %v2226_v8  ;;  %p2199_p1 = pnand %p2198_p0, %p2192_p11 }
  0x4e   :  { %1864 = vmatmul.mubr.f32.gmra.mxu1 %v2226_v8 }
  0x4f   :  { %1866 = vmatprep.mubr.f32.mxu1 %v2226_v8 }
  0x50   :  { %1837 = vmatmul.mubr.f32.gmra.mxu0 %v2226_v8 }
  0x51   :  { %1839 = vmatprep.mubr.f32.mxu0 %v2226_v8 }
  0x52   :  { %1867 = vmatmul.mubr.f32.gmra.mxu1 %v2226_v8 }
  0x53   :  { %1869 = vmatprep.mubr.f32.mxu1 %v2226_v8 }
  0x54   :  { %1840 = vmatmul.mubr.f32.gmra.mxu0 %v2226_v8 }
  0x55   :  { %1842 = vmatprep.mubr.f32.mxu0 %v2226_v8 }
  0x56   :  { %1870 = vmatmul.mubr.f32.gmra.mxu1 %v2226_v8 }
  0x57   :  { %1872 = vmatprep.mubr.f32.mxu1 %v2226_v8 }
  0x58   :  { %1843 = vmatmul.mubr.f32.gmra.mxu0 %v2226_v8 }
  0x59   :  { %1845 = vmatprep.mubr.f32.mxu0 %v2226_v8 }
  0x5a   :  { %1873 = vmatmul.mubr.f32.gmra.mxu1 %v2226_v8 }
  0x5b   :  { %1875 = vmatprep.mubr.f32.mxu1 %v2226_v8 }
  0x5c   :  { %1846 = vmatmul.mubr.f32.gmra.mxu0 %v2226_v8 }
  0x5d   :  { %1848 = vmatprep.mubr.f32.mxu0 %v2226_v8 }
  0x5e   :  { %1876 = vmatmul.mubr.f32.gmra.mxu1 %v2226_v8 }
  0x5f   :  { %1878 = vmatprep.mubr.f32.mxu1 %v2226_v8 }
  0x60   :  { %1849 = vmatmul.mubr.f32.gmra.mxu0 %v2226_v8 }
  0x61   :  { %1851 = vmatprep.mubr.f32.mxu0 %v2226_v8 }
  0x62   :  { %1879 = vmatmul.mubr.f32.gmra.mxu1 %v2226_v8 }
  0x63   :  { %1881 = vmatprep.mubr.f32.mxu1 %v2226_v8 }
  0x64   :  { %1852 = vmatmul.mubr.f32.gmra.mxu0 %v2226_v8 }
  0x66   :  { %1882 = vmatmul.mubr.f32.gmra.mxu1 %v2226_v8 }
  0x67   :  { %1948 = vmatprep.mubr.msk.f32.mxu1 %vm2227_vm4, %v2226_v8 }
 0x108   :  { %v1832_v9 = vpop.f32.mrf.mxu0 }
 0x10a   :  { %v386_v10 = vpop.f32.mrf.mxu0  ;;  %v1862_v11 = vpop.f32.mrf.mxu1 }
 0x10b   :  { %v589_v14 = vadd.f32 %v1862_v11, %v1832_v9 }
 0x10c   :  { %v1835_v12 = vpop.f32.mrf.mxu0  ;;  %v583_v13 = vpop.f32.mrf.mxu1 }
 0x10d   :  { %v584_v15 = vadd.f32 %v583_v13, %v386_v10  ;;  %v2375_v26 = vadd.f32 %v2367_v18, %v589_v14 }
 0x10e   :  { %v396_v16 = vpop.f32.mrf.mxu0  ;;  %v1865_v17 = vpop.f32.mrf.mxu1 }
 0x10f   :  { %v2370_v20 = vadd.f32 %v2367_v18, %v584_v15  ;;  %v599_v22 = vadd.f32 %v1865_v17, %v1835_v12  ;;  %v691_v34 = vsel %vm687_vm3, %v2375_v26, 0.0 }
 0x110   :  { %v1838_v19 = vpop.f32.mrf.mxu0  ;;  %v593_v21 = vpop.f32.mrf.mxu1 }
 0x111   :  { %v594_v23 = vadd.f32 %v593_v21, %v396_v16  ;;  %v688_v24 = vsel %vm687_vm3, %v2370_v20, 0.0  ;;  %v2385_v36 = vadd.f32 %v2367_v18, %v599_v22 }
 0x112   :  { %v406_v25 = vpop.f32.mrf.mxu0  ;;  %v1868_v27 = vpop.f32.mrf.mxu1  ;;  %689 = vadd.xlane.f32.xlu0 %v688_v24 }
 0x113   :  { %v2378_v29 = vadd.f32 %v2367_v18, %v594_v23  ;;  %v609_v30 = vadd.f32 %v1868_v27, %v1838_v19  ;;  %v697_v44 = vsel %vm687_vm3, %v2385_v36, 0.0 }
 0x114   :  { %v1841_v28 = vpop.f32.mrf.mxu0  ;;  %v603_v31 = vpop.f32.mrf.mxu1 }
 0x115   :  { %v604_v32 = vadd.f32 %v603_v31, %v406_v25  ;;  %v694_v33 = vsel %vm687_vm3, %v2378_v29, 0.0  ;;  %v2391_v41 = vadd.f32 %v2367_v18, %v609_v30 }
 0x116   :  { %v416_v35 = vpop.f32.mrf.mxu0  ;;  %v1871_v37 = vpop.f32.mrf.mxu1  ;;  %695 = vadd.xlane.f32.xlu1 %v694_v33  ;;  %692 = vadd.xlane.f32.xlu0 %v691_v34 }
 0x117   :  { %v2388_v39 = vadd.f32 %v2367_v18, %v604_v32  ;;  %v619_v42 = vadd.f32 %v1871_v37, %v1841_v28  ;;  %v703_v51 = vsel %vm687_vm3, %v2391_v41, 0.0 }
 0x118   :  { %v1844_v38 = vpop.f32.mrf.mxu0  ;;  %v613_v40 = vpop.f32.mrf.mxu1 }
 0x119   :  { %v614_v43 = vadd.f32 %v613_v40, %v416_v35  ;;  %v700_v45 = vsel %vm687_vm3, %v2388_v39, 0.0  ;;  %v2405_v56 = vadd.f32 %v2367_v18, %v619_v42 }
 0x11a   :  { %v426_v46 = vpop.f32.mrf.mxu0  ;;  %v1874_v47 = vpop.f32.mrf.mxu1  ;;  %698 = vadd.xlane.f32.xlu1 %v697_v44  ;;  %701 = vadd.xlane.f32.xlu0 %v700_v45 }
 0x11b   :  { %v2398_v49 = vadd.f32 %v2367_v18, %v614_v43  ;;  %v629_v52 = vadd.f32 %v1874_v47, %v1844_v38  ;;  %v709_v63 = vsel %vm687_vm3, %v2405_v56, 0.0 }
 0x11c   :  { %v1847_v48 = vpop.f32.mrf.mxu0  ;;  %v623_v50 = vpop.f32.mrf.mxu1 }
 0x11d   :  { %v624_v53 = vadd.f32 %v623_v50, %v426_v46  ;;  %v706_v54 = vsel %vm687_vm3, %v2398_v49, 0.0  ;;  %v2415_v2 = vadd.f32 %v2367_v18, %v629_v52 }
 0x11e   :  { %v436_v55 = vpop.f32.mrf.mxu0  ;;  %v1877_v57 = vpop.f32.mrf.mxu1  ;;  %704 = vadd.xlane.f32.xlu1 %v703_v51  ;;  %707 = vadd.xlane.f32.xlu0 %v706_v54 }
 0x11f   :  { %v2408_v59 = vadd.f32 %v2367_v18, %v624_v53  ;;  %v639_v60 = vadd.f32 %v1877_v57, %v1847_v48  ;;  %v715_v11 = vsel %vm687_vm3, %v2415_v2, 0.0 }
 0x120   :  { %v1850_v58 = vpop.f32.mrf.mxu0  ;;  %v633_v61 = vpop.f32.mrf.mxu1 }
 0x121   :  { %v634_v62 = vadd.f32 %v633_v61, %v436_v55  ;;  %v712_v0 = vsel %vm687_vm3, %v2408_v59, 0.0  ;;  %v2421_v7 = vadd.f32 %v2367_v18, %v639_v60 }
 0x122   :  { %v446_v1 = vpop.f32.mrf.mxu0  ;;  %v1880_v3 = vpop.f32.mrf.mxu1  ;;  %710 = vadd.xlane.f32.xlu1 %v709_v63  ;;  %713 = vadd.xlane.f32.xlu0 %v712_v0 }
 0x123   :  { %v2418_v5 = vadd.f32 %v2367_v18, %v634_v62  ;;  %v649_v9 = vadd.f32 %v1880_v3, %v1850_v58  ;;  %v721_v17 = vsel %vm687_vm3, %v2421_v7, 0.0 }
 0x124   :  { %v1853_v4 = vpop.f32.mrf.mxu0  ;;  %v643_v6 = vpop.f32.mrf.mxu1 }
 0x125   :  { %v644_v10 = vadd.f32 %v643_v6, %v446_v1  ;;  %v718_v12 = vsel %vm687_vm3, %v2418_v5, 0.0  ;;  %v2435_v23 = vadd.f32 %v2367_v18, %v649_v9 }
 0x126   :  { %v1883_v13 = vpop.f32.mrf.mxu1  ;;  %716 = vadd.xlane.f32.xlu1 %v715_v11  ;;  %719 = vadd.xlane.f32.xlu0 %v718_v12  ;;  %v456_v14 = vpop.f32.mrf.mxu0 }
 0x127   :  { %v2428_v15 = vadd.f32 %v2367_v18, %v644_v10  ;;  %v659_v19 = vadd.f32 %v1883_v13, %v1853_v4  ;;  %v727_v25 = vsel %vm687_vm3, %v2435_v23, 0.0 }
 0x128   :  { %v653_v16 = vpop.f32.mrf.mxu1 }
 0x129   :  { %v654_v21 = vadd.f32 %v653_v16, %v456_v14  ;;  %v724_v22 = vsel %vm687_vm3, %v2428_v15, 0.0  ;;  %v2445_v28 = vadd.f32 %v2367_v18, %v659_v19 }
 0x12a   :  { %722 = vadd.xlane.f32.xlu1 %v721_v17  ;;  %725 = vadd.xlane.f32.xlu0 %v724_v22 }
 0x12b   :  { %v2438_v24 = vadd.f32 %v2367_v18, %v654_v21  ;;  %v733_v30 = vsel %vm687_vm3, %v2445_v28, 0.0 }
 0x12d   :  { %v730_v27 = vsel %vm687_vm3, %v2438_v24, 0.0 }
 0x12e   :  { %728 = vadd.xlane.f32.xlu1 %v727_v25  ;;  %731 = vadd.xlane.f32.xlu0 %v730_v27 }
 0x132   :  { %734 = vadd.xlane.f32.xlu1 %v733_v30 }
 0x19b   :  { %v690_v31 = vpop.xlane.xlu0 %689 }
 0x19c   :  { %v737_v32 = vmul.f32 0.03125, %v690_v31 }
 0x19e   :  { %v2450_v33 = vsub.f32 %v2370_v20, %v737_v32 }
 0x19f   :  { %v696_v34 = vpop.xlane.xlu1 %695  ;;  %v693_v35 = vpop.xlane.xlu0 %692 }
 0x1a0   :  { %v739_v37 = vmul.f32 0.03125, %v696_v34  ;;  %v738_v38 = vmul.f32 0.03125, %v693_v35  ;;  %v769_v40 = vmul.f32 %v2450_v33, %v2450_v33 }
 0x1a2   :  { %v2455_v18 = vsub.f32 %v2378_v29, %v739_v37  ;;  %v2458_v42 = vsub.f32 %v2375_v26, %v738_v38  ;;  %v785_v43 = vsel %vm687_vm3, %v769_v40, 0.0 }
 0x1a3   :  { %v699_v44 = vpop.xlane.xlu1 %698  ;;  %786 = vadd.xlane.f32.xlu0 %v785_v43  ;;  %v702_v45 = vpop.xlane.xlu0 %701 }
 0x1a4   :  { %v740_v20 = vmul.f32 0.03125, %v699_v44  ;;  %v741_v46 = vmul.f32 0.03125, %v702_v45  ;;  %v771_v47 = vmul.f32 %v2455_v18, %v2455_v18  ;;  %v770_v48 = vmul.f32 %v2458_v42, %v2458_v42 }
 0x1a6   :  { %v2466_v50 = vsub.f32 %v2385_v36, %v740_v20  ;;  %v2469_v29 = vsub.f32 %v2388_v39, %v741_v46  ;;  %v791_v26 = vsel %vm687_vm3, %v771_v47, 0.0  ;;  %v788_v51 = vsel %vm687_vm3, %v770_v48, 0.0 }
 0x1a7   :  { %v705_v52 = vpop.xlane.xlu1 %704  ;;  %792 = vadd.xlane.f32.xlu0 %v791_v26  ;;  %789 = vadd.xlane.f32.xlu1 %v788_v51  ;;  %v708_v53 = vpop.xlane.xlu0 %707 }
 0x1a8   :  { %v742_v54 = vmul.f32 0.03125, %v705_v52  ;;  %v743_v55 = vmul.f32 0.03125, %v708_v53  ;;  %v772_v57 = vmul.f32 %v2466_v50, %v2466_v50  ;;  %v773_v36 = vmul.f32 %v2469_v29, %v2469_v29 }
 0x1aa   :  { %v2478_v58 = vsub.f32 %v2391_v41, %v742_v54  ;;  %v2481_v39 = vsub.f32 %v2398_v49, %v743_v55  ;;  %v794_v60 = vsel %vm687_vm3, %v772_v57, 0.0  ;;  %v797_v61 = vsel %vm687_vm3, %v773_v36, 0.0  ;;  %v1024_v54 = vld [vmem:[#allocation11 + $0x18] sm:$0xff]  ;;  %v1023_v55 = vld [vmem:[#allocation11 + $0x10] sm:$0xff]  ;;  %v1022_v57 = vld [vmem:[#allocation11 + $0x8] sm:$0xff] }
 0x1ab   :  { %v711_v62 = vpop.xlane.xlu1 %710  ;;  %795 = vadd.xlane.f32.xlu1 %v794_v60  ;;  %798 = vadd.xlane.f32.xlu0 %v797_v61  ;;  %v714_v63 = vpop.xlane.xlu0 %713 }
 0x1ac   :  { %v744_v0 = vmul.f32 0.03125, %v711_v62  ;;  %v745_v1 = vmul.f32 0.03125, %v714_v63  ;;  %v774_v3 = vmul.f32 %v2478_v58, %v2478_v58  ;;  %v775_v41 = vmul.f32 %v2481_v39, %v2481_v39  ;;  %1884 = vmatprep.subr.mxu0 %v1024_v54 }
 0x1ad   :  { %1885 = vmatpush3.msra.mxu0 %v1024_v54 }
 0x1ae   :  { %v2490_v4 = vsub.f32 %v2405_v56, %v744_v0  ;;  %v2493_v49 = vsub.f32 %v2408_v59, %v745_v1  ;;  %v800_v6 = vsel %vm687_vm3, %v774_v3, 0.0  ;;  %v803_v9 = vsel %vm687_vm3, %v775_v41, 0.0  ;;  %1886 = vmatprep.subr.mxu0 %v1023_v55 }
 0x1af   :  { %v717_v10 = vpop.xlane.xlu1 %716  ;;  %801 = vadd.xlane.f32.xlu1 %v800_v6  ;;  %804 = vadd.xlane.f32.xlu0 %v803_v9  ;;  %v720_v11 = vpop.xlane.xlu0 %719 }
 0x1b0   :  { %v746_v12 = vmul.f32 0.03125, %v717_v10  ;;  %v747_v13 = vmul.f32 0.03125, %v720_v11  ;;  %v776_v14 = vmul.f32 %v2490_v4, %v2490_v4  ;;  %v777_v56 = vmul.f32 %v2493_v49, %v2493_v49  ;;  %1887 = vmatpush3.msra.mxu0 %v1023_v55 }
 0x1b1   :  { %1888 = vmatprep.subr.mxu0 %v1022_v57 }
 0x1b2   :  { %v2502_v16 = vsub.f32 %v2415_v2, %v746_v12  ;;  %v2505_v59 = vsub.f32 %v2418_v5, %v747_v13  ;;  %v806_v17 = vsel %vm687_vm3, %v776_v14, 0.0  ;;  %v809_v19 = vsel %vm687_vm3, %v777_v56, 0.0  ;;  %1889 = vmatpush3.msra.mxu0 %v1022_v57 }
 0x1b3   :  { %v723_v21 = vpop.xlane.xlu1 %722  ;;  %807 = vadd.xlane.f32.xlu1 %v806_v17  ;;  %810 = vadd.xlane.f32.xlu0 %v809_v19  ;;  %v726_v22 = vpop.xlane.xlu0 %725 }
 0x1b4   :  { %v748_v25 = vmul.f32 0.03125, %v723_v21  ;;  %v749_v27 = vmul.f32 0.03125, %v726_v22  ;;  %v778_v30 = vmul.f32 %v2502_v16, %v2502_v16  ;;  %v779_v2 = vmul.f32 %v2505_v59, %v2505_v59 }
 0x1b6   :  { %v2514_v31 = vsub.f32 %v2421_v7, %v748_v25  ;;  %v2517_v5 = vsub.f32 %v2428_v15, %v749_v27  ;;  %v812_v32 = vsel %vm687_vm3, %v778_v30, 0.0  ;;  %v815_v34 = vsel %vm687_vm3, %v779_v2, 0.0 }
 0x1b7   :  { %v729_v35 = vpop.xlane.xlu1 %728  ;;  %813 = vadd.xlane.f32.xlu1 %v812_v32  ;;  %816 = vadd.xlane.f32.xlu0 %v815_v34  ;;  %v732_v37 = vpop.xlane.xlu0 %731  ;;  %v2548_v34 = vld [vmem:[%s2956_s5] ss:$0 sm:$0xff] }
 0x1b8   :  { %v750_v38 = vmul.f32 0.03125, %v729_v35  ;;  %v751_v40 = vmul.f32 0.03125, %v732_v37  ;;  %v780_v43 = vmul.f32 %v2514_v31, %v2514_v31  ;;  %v781_v7 = vmul.f32 %v2517_v5, %v2517_v5 }
 0x1ba   :  { %v2526_v44 = vsub.f32 %v2435_v23, %v750_v38  ;;  %v2529_v15 = vsub.f32 %v2438_v24, %v751_v40  ;;  %v818_v45 = vsel %vm687_vm3, %v780_v43, 0.0  ;;  %v821_v20 = vsel %vm687_vm3, %v781_v7, 0.0  ;;  %v2554_v40 = vld [vmem:[%s2957_s6] ss:$0 sm:$0xff] }
 0x1bb   :  { %v735_v46 = vpop.xlane.xlu1 %734  ;;  %819 = vadd.xlane.f32.xlu1 %v818_v45  ;;  %822 = vadd.xlane.f32.xlu0 %v821_v20 }
 0x1bc   :  { %v752_v47 = vmul.f32 0.03125, %v735_v46  ;;  %v782_v48 = vmul.f32 %v2526_v44, %v2526_v44  ;;  %v783_v26 = vmul.f32 %v2529_v15, %v2529_v15 }
 0x1be   :  { %v2538_v23 = vsub.f32 %v2445_v28, %v752_v47  ;;  %v824_v24 = vsel %vm687_vm3, %v782_v48, 0.0  ;;  %v827_v51 = vsel %vm687_vm3, %v783_v26, 0.0  ;;  %v1021_v28 = vld [vmem:[#allocation11] sm:$0xff] }
 0x1bf   :  { %825 = vadd.xlane.f32.xlu1 %v824_v24  ;;  %828 = vadd.xlane.f32.xlu0 %v827_v51 }
 0x1c0   :  { %v784_v52 = vmul.f32 %v2538_v23, %v2538_v23  ;;  %1890 = vmatprep.subr.mxu0 %v1021_v28 }
 0x1c1   :  { %1891 = vmatpush3.msra.mxu0 %v1021_v28 }
 0x1c2   :  { %v830_v53 = vsel %vm687_vm3, %v784_v52, 0.0 }
 0x1c3   :  { %831 = vadd.xlane.f32.xlu1 %v830_v53 }
 0x22c   :  { %v787_v36 = vpop.xlane.xlu0 %786 }
 0x22d   :  { %v833_v60 = vmul.f32 0.03125, %v787_v36 }
 0x22f   :  { %v849_v61 = vadd.f32 1e-05, %v833_v60 }
 0x230   :  { %v790_v62 = vpop.xlane.xlu1 %789  ;;  %v793_v63 = vpop.xlane.xlu0 %792 }
 0x231   :  { %1963 = vrsqrt.f32 %v849_v61  ;;  %v834_v0 = vmul.f32 0.03125, %v790_v62  ;;  %v835_v1 = vmul.f32 0.03125, %v793_v63 }
 0x233   :  { %v850_v3 = vadd.f32 1e-05, %v834_v0  ;;  %v851_v41 = vadd.f32 1e-05, %v835_v1 }
 0x234   :  { %v796_v6 = vpop.xlane.xlu1 %795  ;;  %v799_v9 = vpop.xlane.xlu0 %798 }
 0x235   :  { %1965 = vrsqrt.f32 %v850_v3  ;;  %v836_v10 = vmul.f32 0.03125, %v796_v6  ;;  %v837_v11 = vmul.f32 0.03125, %v799_v9 }
 0x236   :  { %1967 = vrsqrt.f32 %v851_v41 }
 0x237   :  { %v852_v12 = vadd.f32 1e-05, %v836_v10  ;;  %v853_v13 = vadd.f32 1e-05, %v837_v11 }
 0x238   :  { %v802_v14 = vpop.xlane.xlu1 %801  ;;  %v805_v56 = vpop.xlane.xlu0 %804 }
 0x239   :  { %1969 = vrsqrt.f32 %v852_v12  ;;  %v838_v17 = vmul.f32 0.03125, %v802_v14  ;;  %v839_v19 = vmul.f32 0.03125, %v805_v56 }
 0x23a   :  { %1971 = vrsqrt.f32 %v853_v13 }
 0x23b   :  { %v854_v21 = vadd.f32 1e-05, %v838_v17  ;;  %v855_v22 = vadd.f32 1e-05, %v839_v19 }
 0x23c   :  { %v808_v25 = vpop.xlane.xlu1 %807  ;;  %v811_v27 = vpop.xlane.xlu0 %810 }
 0x23d   :  { %1973 = vrsqrt.f32 %v854_v21  ;;  %v840_v30 = vmul.f32 0.03125, %v808_v25  ;;  %v841_v2 = vmul.f32 0.03125, %v811_v27 }
 0x23e   :  { %v1964_v32 = vpop.eup %1963  ;;  %1975 = vrsqrt.f32 %v855_v22 }
 0x23f   :  { %v856_v35 = vadd.f32 1e-05, %v840_v30  ;;  %v857_v37 = vadd.f32 1e-05, %v841_v2  ;;  %v881_v38 = vmul.f32 %v1964_v32, %v2450_v33 }
 0x240   :  { %v814_v43 = vpop.xlane.xlu1 %813  ;;  %v817_v7 = vpop.xlane.xlu0 %816 }
 0x241   :  { %1977 = vrsqrt.f32 %v856_v35  ;;  %v842_v45 = vmul.f32 0.03125, %v814_v43  ;;  %v843_v20 = vmul.f32 0.03125, %v817_v7  ;;  %v903_v46 = vmul.f32 %v2548_v34, %v881_v38 }
 0x242   :  { %v1966_v47 = vpop.eup %1965  ;;  %1979 = vrsqrt.f32 %v857_v37 }
 0x243   :  { %v1968_v48 = vpop.eup %1967  ;;  %v882_v26 = vmul.f32 %v1966_v47, %v2458_v42  ;;  %v858_v24 = vadd.f32 1e-05, %v842_v45  ;;  %v859_v51 = vadd.f32 1e-05, %v843_v20  ;;  %v2559_v33 = vadd.f32 %v2554_v40, %v903_v46 }
 0x244   :  { %v820_v52 = vpop.xlane.xlu1 %819  ;;  %v823_v53 = vpop.xlane.xlu0 %822  ;;  %v883_v54 = vmul.f32 %v1968_v48, %v2455_v18 }
 0x245   :  { %v904_v55 = vmul.f32 %v2548_v34, %v882_v26  ;;  %1981 = vrsqrt.f32 %v858_v24  ;;  %v844_v57 = vmul.f32 0.03125, %v820_v52  ;;  %v845_v28 = vmul.f32 0.03125, %v823_v53 }
 0x246   :  { %v1970_v36 = vpop.eup %1969  ;;  %1983 = vrsqrt.f32 %v859_v51  ;;  %v957_v60 = vmul.f32 0.70710677, %v2559_v33  ;;  %v905_v42 = vmul.f32 %v2548_v34, %v883_v54 }
 0x247   :  { %v1972_v61 = vpop.eup %1971  ;;  %v2566_v62 = vadd.f32 %v2554_v40, %v904_v55  ;;  %v860_v63 = vadd.f32 1e-05, %v844_v57  ;;  %v861_v0 = vadd.f32 1e-05, %v845_v28  ;;  %v884_v1 = vmul.f32 %v1970_v36, %v2466_v50 }
 0x248   :  { %v826_v18 = vpop.xlane.xlu1 %825  ;;  %v829_v3 = vpop.xlane.xlu0 %828  ;;  %1985 = verf.f32 %v957_v60  ;;  %v2570_v41 = vadd.f32 %v2554_v40, %v905_v42  ;;  %v885_v6 = vmul.f32 %v1972_v61, %v2469_v29  ;;  %v941_v28 = vmul.f32 0.5, %v2559_v33 }
 0x249   :  { %v958_v9 = vmul.f32 0.70710677, %v2566_v62  ;;  %1987 = vrsqrt.f32 %v860_v63  ;;  %v846_v10 = vmul.f32 0.03125, %v826_v18  ;;  %v847_v11 = vmul.f32 0.03125, %v829_v3 }
 0x24a   :  { %v1974_v12 = vpop.eup %1973  ;;  %1989 = vrsqrt.f32 %v861_v0  ;;  %v959_v13 = vmul.f32 0.70710677, %v2570_v41  ;;  %v906_v17 = vmul.f32 %v2548_v34, %v884_v1  ;;  %v907_v21 = vmul.f32 %v2548_v34, %v885_v6 }
 0x24b   :  { %v1976_v14 = vpop.eup %1975  ;;  %1991 = verf.f32 %v958_v9  ;;  %v862_v50 = vadd.f32 1e-05, %v846_v10  ;;  %v863_v56 = vadd.f32 1e-05, %v847_v11  ;;  %v886_v29 = vmul.f32 %v1974_v12, %v2478_v58 }
 0x24c   :  { %v832_v19 = vpop.xlane.xlu1 %831  ;;  %1993 = verf.f32 %v959_v13  ;;  %v887_v22 = vmul.f32 %v1976_v14, %v2481_v39  ;;  %v2580_v27 = vadd.f32 %v2554_v40, %v906_v17  ;;  %v2583_v2 = vadd.f32 %v2554_v40, %v907_v21 }
 0x24d   :  { %1995 = vrsqrt.f32 %v862_v50  ;;  %v848_v25 = vmul.f32 0.03125, %v832_v19  ;;  %v908_v32 = vmul.f32 %v2548_v34, %v886_v29  ;;  %v942_v6 = vmul.f32 0.5, %v2566_v62 }
 0x24e   :  { %v1978_v30 = vpop.eup %1977  ;;  %1997 = vrsqrt.f32 %v863_v56  ;;  %v909_v35 = vmul.f32 %v2548_v34, %v887_v22  ;;  %v960_v58 = vmul.f32 0.70710677, %v2580_v27  ;;  %v961_v43 = vmul.f32 0.70710677, %v2583_v2 }
 0x24f   :  { %v1980_v37 = vpop.eup %1979  ;;  %v864_v38 = vadd.f32 1e-05, %v848_v25  ;;  %v888_v39 = vmul.f32 %v1978_v30, %v2490_v4  ;;  %v2591_v7 = vadd.f32 %v2554_v40, %v908_v32 }
 0x250   :  { %v2594_v45 = vadd.f32 %v2554_v40, %v909_v35  ;;  %v889_v46 = vmul.f32 %v1980_v37, %v2493_v49  ;;  %v944_v37 = vmul.f32 0.5, %v2580_v27 }
 0x251   :  { %1999 = vrsqrt.f32 %v864_v38  ;;  %v910_v20 = vmul.f32 %v2548_v34, %v888_v39  ;;  %v962_v48 = vmul.f32 0.70710677, %v2591_v7 }
 0x252   :  { %v1982_v47 = vpop.eup %1981  ;;  %2001 = verf.f32 %v960_v58  ;;  %v963_v4 = vmul.f32 0.70710677, %v2594_v45  ;;  %v911_v51 = vmul.f32 %v2548_v34, %v889_v46  ;;  %v947_v27 = vmul.f32 0.5, %v2594_v45 }
 0x253   :  { %v1984_v26 = vpop.eup %1983  ;;  %2003 = verf.f32 %v961_v43  ;;  %v2601_v24 = vadd.f32 %v2554_v40, %v910_v20  ;;  %v890_v52 = vmul.f32 %v1982_v47, %v2502_v16  ;;  %v945_v20 = vmul.f32 0.5, %v2583_v2 }
 0x254   :  { %2005 = verf.f32 %v962_v48  ;;  %v891_v53 = vmul.f32 %v1984_v26, %v2505_v59  ;;  %v2608_v55 = vadd.f32 %v2554_v40, %v911_v51 }
 0x255   :  { %v1986_v54 = vpop.eup %1985  ;;  %2007 = verf.f32 %v963_v4  ;;  %v964_v49 = vmul.f32 0.70710677, %v2601_v24  ;;  %v912_v60 = vmul.f32 %v2548_v34, %v890_v52  ;;  %v946_v4 = vmul.f32 0.5, %v2591_v7 }
 0x256   :  { %v1988_v57 = vpop.eup %1987  ;;  %v989_v36 = vadd.f32 1.0, %v1986_v54  ;;  %v913_v42 = vmul.f32 %v2548_v34, %v891_v53  ;;  %v965_v16 = vmul.f32 0.70710677, %v2608_v55  ;;  %v949_v45 = vmul.f32 0.5, %v2608_v55 }
 0x257   :  { %v1990_v61 = vpop.eup %1989  ;;  %2009 = verf.f32 %v964_v49  ;;  %v892_v59 = vmul.f32 %v1988_v57, %v2514_v31  ;;  %v2616_v1 = vadd.f32 %v2554_v40, %v912_v60  ;;  %v943_v31 = vmul.f32 0.5, %v2570_v41 }
 0x258   :  { %v1992_v63 = vpop.eup %1991  ;;  %v1005_v0 = vmul.f32 %v989_v36, %v941_v28  ;;  %v2619_v18 = vadd.f32 %v2554_v40, %v913_v42  ;;  %v893_v33 = vmul.f32 %v1990_v61, %v2517_v5  ;;  %2011 = verf.f32 %v965_v16 }
 0x259   :  { %v1994_v3 = vpop.eup %1993  ;;  %v990_v9 = vadd.f32 1.0, %v1992_v63  ;;  %v914_v10 = vmul.f32 %v2548_v34, %v892_v59  ;;  %v966_v13 = vmul.f32 0.70710677, %v2616_v1  ;;  %v948_v36 = vmul.f32 0.5, %v2601_v24 }
 0x25a   :  { %v1996_v11 = vpop.eup %1995  ;;  %1892 = vmatprep.mubr.msk.f32.mxu0 %vm687_vm3, %v1005_v0  ;;  %v991_v12 = vadd.f32 1.0, %v1994_v3  ;;  %v967_v56 = vmul.f32 0.70710677, %v2619_v18  ;;  %v915_v62 = vmul.f32 %v2548_v34, %v893_v33  ;;  %v950_v63 = vmul.f32 0.5, %v2616_v1 }
 0x25b   :  { %v1998_v14 = vpop.eup %1997  ;;  %v1006_v50 = vmul.f32 %v990_v9, %v942_v6  ;;  %v2629_v5 = vadd.f32 %v2554_v40, %v914_v10  ;;  %2013 = verf.f32 %v966_v13  ;;  %v894_v19 = vmul.f32 %v1996_v11, %v2526_v44 }
 0x25c   :  { %v1007_v17 = vmul.f32 %v991_v12, %v943_v31  ;;  %v895_v21 = vmul.f32 %v1998_v14, %v2529_v15  ;;  %2015 = verf.f32 %v967_v56  ;;  %v937_v29 = vadd.f32 %v2554_v40, %v915_v62 }
 0x25d   :  { %1893 = vmatmul.mubr.msk.f32.vlgmr.msra.gmra.mxu0 %vm687_vm3, %v1006_v50  ;;  %v968_v41 = vmul.f32 0.70710677, %v2629_v5  ;;  %v916_v25 = vmul.f32 %v2548_v34, %v894_v19  ;;  %v951_v33 = vmul.f32 0.5, %v2619_v18  ;;  %v952_v11 = vmul.f32 0.5, %v2629_v5 }
 0x25e   :  { %v2000_v22 = vpop.eup %1999  ;;  %1895 = vmatprep.mubr.msk.f32.mxu0 %vm687_vm3, %v1007_v17  ;;  %v917_v30 = vmul.f32 %v2548_v34, %v895_v21  ;;  %v969_v35 = vmul.f32 0.70710677, %v937_v29  ;;  %v953_v31 = vmul.f32 0.5, %v937_v29 }
 0x25f   :  { %v2002_v32 = vpop.eup %2001  ;;  %2017 = verf.f32 %v968_v41  ;;  %v896_v44 = vmul.f32 %v2000_v22, %v2538_v23  ;;  %v938_v58 = vadd.f32 %v2554_v40, %v916_v25 }
 0x260   :  { %v2004_v15 = vpop.eup %2003  ;;  %v992_v38 = vadd.f32 1.0, %v2002_v32  ;;  %v939_v39 = vadd.f32 %v2554_v40, %v917_v30  ;;  %2019 = verf.f32 %v969_v35 }
 0x261   :  { %v2006_v43 = vpop.eup %2005  ;;  %v993_v46 = vadd.f32 1.0, %v2004_v15  ;;  %v918_v47 = vmul.f32 %v2548_v34, %v896_v44  ;;  %v970_v51 = vmul.f32 0.70710677, %v938_v58  ;;  %v954_v50 = vmul.f32 0.5, %v938_v58 }
 0x262   :  { %v2008_v48 = vpop.eup %2007  ;;  %v1008_v26 = vmul.f32 %v992_v38, %v944_v37  ;;  %v994_v23 = vadd.f32 1.0, %v2006_v43  ;;  %v971_v54 = vmul.f32 0.70710677, %v939_v39  ;;  %v955_v62 = vmul.f32 0.5, %v939_v39 }
 0x263   :  { %v1009_v52 = vmul.f32 %v993_v46, %v945_v20  ;;  %v995_v53 = vadd.f32 1.0, %v2008_v48  ;;  %2021 = verf.f32 %v970_v51  ;;  %v940_v2 = vadd.f32 %v2554_v40, %v918_v47  ;;  %v1716_v48 = vld [vmem:[%s2959_s8] ss:$0 sm:$0xff] }
 0x264   :  { %v2010_v49 = vpop.eup %2009  ;;  %1896 = vmatmul.mubr.msk.f32.gmra.mxu0 %vm687_vm3, %v1008_v26  ;;  %v1010_v57 = vmul.f32 %v994_v23, %v946_v4  ;;  %2023 = verf.f32 %v971_v54 }
 0x265   :  { %1898 = vmatprep.mubr.msk.f32.mxu0 %vm687_vm3, %v1009_v52  ;;  %v1011_v34 = vmul.f32 %v995_v53, %v947_v27  ;;  %v996_v28 = vadd.f32 1.0, %v2010_v49  ;;  %v2012_v7 = vpop.eup %2011  ;;  %v972_v60 = vmul.f32 0.70710677, %v940_v2  ;;  %v956_v41 = vmul.f32 0.5, %v940_v2 }
 0x266   :  { %v997_v42 = vadd.f32 1.0, %v2012_v7 }
 0x267   :  { %v1012_v61 = vmul.f32 %v996_v28, %v948_v36  ;;  %2025 = verf.f32 %v972_v60 }
 0x268   :  { %1899 = vmatmul.mubr.msk.f32.gmra.mxu0 %vm687_vm3, %v1010_v57  ;;  %v2014_v16 = vpop.eup %2013  ;;  %v1013_v40 = vmul.f32 %v997_v42, %v949_v45 }
 0x269   :  { %1901 = vmatprep.mubr.msk.f32.mxu0 %vm687_vm3, %v1011_v34  ;;  %v2016_v59 = vpop.eup %2015  ;;  %v998_v0 = vadd.f32 1.0, %v2014_v16 }
 0x26a   :  { %v999_v3 = vadd.f32 1.0, %v2016_v59 }
 0x26b   :  { %v1014_v55 = vmul.f32 %v998_v0, %v950_v63 }
 0x26c   :  { %v2018_v24 = vpop.eup %2017  ;;  %1902 = vmatmul.mubr.msk.f32.gmra.mxu0 %vm687_vm3, %v1012_v61  ;;  %v1015_v6 = vmul.f32 %v999_v3, %v951_v33 }
 0x26d   :  { %1904 = vmatprep.mubr.msk.f32.mxu0 %vm687_vm3, %v1013_v40  ;;  %v1000_v9 = vadd.f32 1.0, %v2018_v24  ;;  %v2020_v10 = vpop.eup %2019 }
 0x26e   :  { %v1001_v12 = vadd.f32 1.0, %v2020_v10 }
 0x26f   :  { %v1016_v1 = vmul.f32 %v1000_v9, %v952_v11 }
 0x270   :  { %1905 = vmatmul.mubr.msk.f32.gmra.mxu0 %vm687_vm3, %v1014_v55  ;;  %v2022_v13 = vpop.eup %2021  ;;  %v1017_v18 = vmul.f32 %v1001_v12, %v953_v31 }
 0x271   :  { %1907 = vmatprep.mubr.msk.f32.mxu0 %vm687_vm3, %v1015_v6  ;;  %v2024_v14 = vpop.eup %2023  ;;  %v1002_v56 = vadd.f32 1.0, %v2022_v13 }
 0x272   :  { %v1003_v17 = vadd.f32 1.0, %v2024_v14 }
 0x273   :  { %v1018_v19 = vmul.f32 %v1002_v56, %v954_v50 }
 0x274   :  { %1908 = vmatmul.mubr.msk.f32.gmra.mxu0 %vm687_vm3, %v1016_v1  ;;  %v2026_v21 = vpop.eup %2025  ;;  %v1019_v5 = vmul.f32 %v1003_v17, %v955_v62 }
 0x275   :  { %1910 = vmatprep.mubr.msk.f32.mxu0 %vm687_vm3, %v1017_v18  ;;  %v1004_v29 = vadd.f32 1.0, %v2026_v21 }
 0x277   :  { %v1020_v22 = vmul.f32 %v1004_v29, %v956_v41 }
 0x278   :  { %1911 = vmatmul.mubr.msk.f32.gmra.mxu0 %vm687_vm3, %v1018_v19 }
 0x279   :  { %1913 = vmatprep.mubr.msk.f32.mxu0 %vm687_vm3, %v1019_v5 }
 0x27c   :  { %1914 = vmatmul.mubr.msk.f32.gmra.mxu0 %vm687_vm3, %v1020_v22 }
 0x31d   :  { %v1894_v25 = vpop.f32.mrf.mxu0 }
 0x31e   :  { %v2707_v6 = vadd.f32 %v1894_v25, %v1716_v48 }
 0x31f   :  { %v1146_v30 = vpop.f32.mrf.mxu0 }
 0x320   :  { %v2711_v10 = vadd.f32 %v1716_v48, %v1146_v30  ;;  %v1230_v31 = vsel %vm687_vm3, %v2707_v6, 0.0 }
 0x322   :  { %v1227_v12 = vsel %vm687_vm3, %v2711_v10, 0.0 }
 0x324   :  { %v1897_v32 = vpop.f32.mrf.mxu0 }
 0x325   :  { %v2699_v33 = vadd.f32 %v1897_v32, %v1716_v48 }
 0x326   :  { %v1156_v35 = vpop.f32.mrf.mxu0 }
 0x327   :  { %v2703_v24 = vadd.f32 %v1716_v48, %v1156_v35  ;;  %v1236_v9 = vsel %vm687_vm3, %v2699_v33, 0.0 }
 0x328   :  { %v1900_v44 = vpop.f32.mrf.mxu0 }
 0x329   :  { %v2691_v40 = vadd.f32 %v1900_v44, %v1716_v48  ;;  %v1233_v11 = vsel %vm687_vm3, %v2703_v24, 0.0 }
 0x32a   :  { %v1166_v15 = vpop.f32.mrf.mxu0 }
 0x32b   :  { %v2695_v63 = vadd.f32 %v1716_v48, %v1166_v15  ;;  %v1242_v3 = vsel %vm687_vm3, %v2691_v40, 0.0 }
 0x32c   :  { %v1903_v37 = vpop.f32.mrf.mxu0 }
 0x32d   :  { %v2683_v45 = vadd.f32 %v1903_v37, %v1716_v48  ;;  %v1239_v55 = vsel %vm687_vm3, %v2695_v63, 0.0 }
 0x32e   :  { %v1176_v38 = vpop.f32.mrf.mxu0 }
 0x32f   :  { %v2687_v61 = vadd.f32 %v1716_v48, %v1176_v38  ;;  %v1248_v59 = vsel %vm687_vm3, %v2683_v45, 0.0 }
 0x330   :  { %v1906_v58 = vpop.f32.mrf.mxu0 }
 0x331   :  { %v2676_v28 = vadd.f32 %v1906_v58, %v1716_v48  ;;  %v1245_v0 = vsel %vm687_vm3, %v2687_v61, 0.0 }
 0x332   :  { %v1186_v39 = vpop.f32.mrf.mxu0 }
 0x333   :  { %v2679_v36 = vadd.f32 %v1716_v48, %v1186_v39  ;;  %v1254_v42 = vsel %vm687_vm3, %v2676_v28, 0.0 }
 0x334   :  { %v1909_v43 = vpop.f32.mrf.mxu0 }
 0x335   :  { %v1202_v49 = vadd.f32 %v1909_v43, %v1716_v48  ;;  %v1251_v16 = vsel %vm687_vm3, %v2679_v36, 0.0 }
 0x336   :  { %v1196_v20 = vpop.f32.mrf.mxu0 }
 0x337   :  { %v2673_v2 = vadd.f32 %v1716_v48, %v1196_v20  ;;  %v1260_v7 = vsel %vm687_vm3, %v1202_v49, 0.0 }
 0x338   :  { %v1912_v46 = vpop.f32.mrf.mxu0 }
 0x339   :  { %v1212_v51 = vadd.f32 %v1912_v46, %v1716_v48  ;;  %v1257_v60 = vsel %vm687_vm3, %v2673_v2, 0.0 }
 0x33a   :  { %v1206_v47 = vpop.f32.mrf.mxu0 }
 0x33b   :  { %v1207_v53 = vadd.f32 %v1716_v48, %v1206_v47  ;;  %v1266_v57 = vsel %vm687_vm3, %v1212_v51, 0.0 }
 0x33c   :  { %v1915_v26 = vpop.f32.mrf.mxu0 }
 0x33d   :  { %v1222_v4 = vadd.f32 %v1915_v26, %v1716_v48  ;;  %v1263_v34 = vsel %vm687_vm3, %v1207_v53, 0.0 }
 0x33e   :  { %v1216_v23 = vpop.f32.mrf.mxu0 }
 0x33f   :  { %v1217_v52 = vadd.f32 %v1716_v48, %v1216_v23  ;;  %v1272_v27 = vsel %vm687_vm3, %v1222_v4, 0.0 }
 0x340   :  { %1273 = vadd.xlane.f32.xlu0 %v1272_v27 }
 0x341   :  { %v1269_v54 = vsel %vm687_vm3, %v1217_v52, 0.0 }
 0x342   :  { %1270 = vadd.xlane.f32.xlu1 %v1269_v54 }
 0x344   :  { %1267 = vadd.xlane.f32.xlu0 %v1266_v57 }
 0x346   :  { %1264 = vadd.xlane.f32.xlu1 %v1263_v34 }
 0x348   :  { %1261 = vadd.xlane.f32.xlu0 %v1260_v7 }
 0x34a   :  { %1258 = vadd.xlane.f32.xlu1 %v1257_v60 }
 0x34c   :  { %1255 = vadd.xlane.f32.xlu0 %v1254_v42 }
 0x34e   :  { %1252 = vadd.xlane.f32.xlu1 %v1251_v16 }
 0x350   :  { %1249 = vadd.xlane.f32.xlu0 %v1248_v59 }
 0x352   :  { %1246 = vadd.xlane.f32.xlu1 %v1245_v0 }
 0x354   :  { %1243 = vadd.xlane.f32.xlu0 %v1242_v3 }
 0x356   :  { %1240 = vadd.xlane.f32.xlu1 %v1239_v55 }
 0x358   :  { %1237 = vadd.xlane.f32.xlu0 %v1236_v9 }
 0x35a   :  { %1234 = vadd.xlane.f32.xlu1 %v1233_v11 }
 0x35c   :  { %1231 = vadd.xlane.f32.xlu0 %v1230_v31 }
 0x35e   :  { %1228 = vadd.xlane.f32.xlu1 %v1227_v12 }
 0x3c9   :  { %v1274_v1 = vpop.xlane.xlu0 %1273 }
 0x3ca   :  { %v1290_v13 = vmul.f32 0.03125, %v1274_v1 }
 0x3cb   :  { %v1271_v18 = vpop.xlane.xlu1 %1270 }
 0x3cc   :  { %v2719_v14 = vsub.f32 %v1222_v4, %v1290_v13  ;;  %v1289_v50 = vmul.f32 0.03125, %v1271_v18 }
 0x3cd   :  { %v1268_v56 = vpop.xlane.xlu0 %1267 }
 0x3ce   :  { %v2721_v62 = vsub.f32 %v1217_v52, %v1289_v50  ;;  %v1288_v17 = vmul.f32 0.03125, %v1268_v56  ;;  %v1322_v19 = vmul.f32 %v2719_v14, %v2719_v14 }
 0x3cf   :  { %v1265_v21 = vpop.xlane.xlu1 %1264 }
 0x3d0   :  { %v2725_v5 = vsub.f32 %v1212_v51, %v1288_v17  ;;  %v1287_v41 = vmul.f32 0.03125, %v1265_v21  ;;  %v1368_v29 = vsel %vm687_vm3, %v1322_v19, 0.0  ;;  %v1321_v22 = vmul.f32 %v2721_v62, %v2721_v62 }
 0x3d1   :  { %1369 = vadd.xlane.f32.xlu0 %v1368_v29  ;;  %v1262_v25 = vpop.xlane.xlu0 %1261 }
 0x3d2   :  { %v2730_v30 = vsub.f32 %v1207_v53, %v1287_v41  ;;  %v1286_v32 = vmul.f32 0.03125, %v1262_v25  ;;  %v1365_v35 = vsel %vm687_vm3, %v1321_v22, 0.0  ;;  %v1320_v44 = vmul.f32 %v2725_v5, %v2725_v5 }
 0x3d3   :  { %1366 = vadd.xlane.f32.xlu1 %v1365_v35  ;;  %v1259_v15 = vpop.xlane.xlu1 %1258 }
 0x3d4   :  { %v2735_v37 = vsub.f32 %v1202_v49, %v1286_v32  ;;  %v1285_v38 = vmul.f32 0.03125, %v1259_v15  ;;  %v1362_v58 = vsel %vm687_vm3, %v1320_v44, 0.0  ;;  %v1319_v39 = vmul.f32 %v2730_v30, %v2730_v30 }
 0x3d5   :  { %1363 = vadd.xlane.f32.xlu0 %v1362_v58  ;;  %v1256_v43 = vpop.xlane.xlu0 %1255 }
 0x3d6   :  { %v2741_v20 = vsub.f32 %v2673_v2, %v1285_v38  ;;  %v1284_v46 = vmul.f32 0.03125, %v1256_v43  ;;  %v1359_v47 = vsel %vm687_vm3, %v1319_v39, 0.0  ;;  %v1318_v48 = vmul.f32 %v2735_v37, %v2735_v37 }
 0x3d7   :  { %1360 = vadd.xlane.f32.xlu1 %v1359_v47  ;;  %v1253_v26 = vpop.xlane.xlu1 %1252  ;;  %v2228_v39 = vmov 0  }
 0x3d8   :  { %v2747_v4 = vsub.f32 %v2676_v28, %v1284_v46  ;;  %v1283_v23 = vmul.f32 0.03125, %v1253_v26  ;;  %v1356_v51 = vsel %vm687_vm3, %v1318_v48, 0.0  ;;  %v1317_v52 = vmul.f32 %v2741_v20, %v2741_v20  ;;  %1962 = vset.pattern.permute.xlu0 %v2228_v39 }
 0x3d9   :  { %1357 = vadd.xlane.f32.xlu0 %v1356_v51  ;;  %v1250_v27 = vpop.xlane.xlu0 %1249 }
 0x3da   :  { %v2753_v53 = vsub.f32 %v2679_v36, %v1283_v23  ;;  %v1282_v54 = vmul.f32 0.03125, %v1250_v27  ;;  %v1353_v49 = vsel %vm687_vm3, %v1317_v52, 0.0  ;;  %v1316_v57 = vmul.f32 %v2747_v4, %v2747_v4 }
 0x3db   :  { %1354 = vadd.xlane.f32.xlu1 %v1353_v49  ;;  %v1247_v2 = vpop.xlane.xlu1 %1246 }
 0x3dc   :  { %v2759_v34 = vsub.f32 %v2683_v45, %v1282_v54  ;;  %v1281_v28 = vmul.f32 0.03125, %v1247_v2  ;;  %v1350_v7 = vsel %vm687_vm3, %v1316_v57, 0.0  ;;  %v1315_v60 = vmul.f32 %v2753_v53, %v2753_v53 }
 0x3dd   :  { %1351 = vadd.xlane.f32.xlu0 %v1350_v7  ;;  %v1244_v36 = vpop.xlane.xlu0 %1243 }
 0x3de   :  { %v2765_v42 = vsub.f32 %v2687_v61, %v1281_v28  ;;  %v1280_v16 = vmul.f32 0.03125, %v1244_v36  ;;  %v1347_v59 = vsel %vm687_vm3, %v1315_v60, 0.0  ;;  %v1314_v0 = vmul.f32 %v2759_v34, %v2759_v34 }
 0x3df   :  { %1348 = vadd.xlane.f32.xlu1 %v1347_v59  ;;  %v1241_v45 = vpop.xlane.xlu1 %1240 }
 0x3e0   :  { %v2771_v3 = vsub.f32 %v2691_v40, %v1280_v16  ;;  %v1279_v55 = vmul.f32 0.03125, %v1241_v45  ;;  %v1344_v9 = vsel %vm687_vm3, %v1314_v0, 0.0  ;;  %v1313_v11 = vmul.f32 %v2765_v42, %v2765_v42 }
 0x3e1   :  { %1345 = vadd.xlane.f32.xlu0 %v1344_v9  ;;  %v1238_v61 = vpop.xlane.xlu0 %1237 }
 0x3e2   :  { %v2777_v31 = vsub.f32 %v2695_v63, %v1279_v55  ;;  %v1278_v12 = vmul.f32 0.03125, %v1238_v61  ;;  %v1341_v1 = vsel %vm687_vm3, %v1313_v11, 0.0  ;;  %v1312_v13 = vmul.f32 %v2771_v3, %v2771_v3 }
 0x3e3   :  { %1342 = vadd.xlane.f32.xlu1 %v1341_v1  ;;  %v1235_v40 = vpop.xlane.xlu1 %1234 }
 0x3e4   :  { %v2783_v18 = vsub.f32 %v2699_v33, %v1278_v12  ;;  %v1277_v50 = vmul.f32 0.03125, %v1235_v40  ;;  %v1338_v56 = vsel %vm687_vm3, %v1312_v13, 0.0  ;;  %v1311_v17 = vmul.f32 %v2777_v31, %v2777_v31  ;;  %v2814_v13 = vld [vmem:[%s2960_s9] ss:$0 sm:$0xff] }
 0x3e5   :  { %1339 = vadd.xlane.f32.xlu0 %v1338_v56  ;;  %v1232_v63 = vpop.xlane.xlu0 %1231 }
 0x3e6   :  { %v2789_v19 = vsub.f32 %v2703_v24, %v1277_v50  ;;  %v1276_v21 = vmul.f32 0.03125, %v1232_v63  ;;  %v1335_v41 = vsel %vm687_vm3, %v1311_v17, 0.0  ;;  %v1310_v29 = vmul.f32 %v2783_v18, %v2783_v18 }
 0x3e7   :  { %1336 = vadd.xlane.f32.xlu1 %v1335_v41  ;;  %v1229_v33 = vpop.xlane.xlu1 %1228 }
 0x3e8   :  { %v2795_v22 = vsub.f32 %v2707_v6, %v1276_v21  ;;  %v1275_v25 = vmul.f32 0.03125, %v1229_v33  ;;  %v1332_v32 = vsel %vm687_vm3, %v1310_v29, 0.0  ;;  %v1309_v35 = vmul.f32 %v2789_v19, %v2789_v19  ;;  %v2822_v33 = vld [vmem:[%s2961_s10] ss:$0 sm:$0xff] }
 0x3e9   :  { %1333 = vadd.xlane.f32.xlu0 %v1332_v32 }
 0x3ea   :  { %v2801_v24 = vsub.f32 %v2711_v10, %v1275_v25  ;;  %v1329_v44 = vsel %vm687_vm3, %v1309_v35, 0.0  ;;  %v1308_v15 = vmul.f32 %v2795_v22, %v2795_v22  ;;  %v1560_v10 = vld [vmem:[#allocation2] sm:$0x1] }
 0x3eb   :  { %1330 = vadd.xlane.f32.xlu1 %v1329_v44 }
 0x3ec   :  { %v1326_v38 = vsel %vm687_vm3, %v1308_v15, 0.0  ;;  %v1307_v6 = vmul.f32 %v2801_v24, %v2801_v24 }
 0x3ed   :  { %1327 = vadd.xlane.f32.xlu0 %v1326_v38 }
 0x3ee   :  { %v1323_v58 = vsel %vm687_vm3, %v1307_v6, 0.0 }
 0x3ef   :  { %1324 = vadd.xlane.f32.xlu1 %v1323_v58 }
 0x403   :  { %1563 = vperm.xlu0 %1962, %v1560_v10  }
 0x45a   :  { %v1370_v43 = vpop.xlane.xlu0 %1369 }
 0x45b   :  { %v1386_v46 = vmul.f32 0.03125, %v1370_v43 }
 0x45c   :  { %v1367_v47 = vpop.xlane.xlu1 %1366 }
 0x45d   :  { %v1402_v48 = vadd.f32 1e-05, %v1386_v46  ;;  %v1385_v26 = vmul.f32 0.03125, %v1367_v47 }
 0x45e   :  { %v1364_v23 = vpop.xlane.xlu0 %1363 }
 0x45f   :  { %2027 = vrsqrt.f32 %v1402_v48  ;;  %v1401_v51 = vadd.f32 1e-05, %v1385_v26  ;;  %v1384_v52 = vmul.f32 0.03125, %v1364_v23 }
 0x460   :  { %v1361_v27 = vpop.xlane.xlu1 %1360 }
 0x461   :  { %2029 = vrsqrt.f32 %v1401_v51  ;;  %v1400_v54 = vadd.f32 1e-05, %v1384_v52  ;;  %v1383_v49 = vmul.f32 0.03125, %v1361_v27 }
 0x462   :  { %v1358_v57 = vpop.xlane.xlu0 %1357 }
 0x463   :  { %2031 = vrsqrt.f32 %v1400_v54  ;;  %v1399_v2 = vadd.f32 1e-05, %v1383_v49  ;;  %v1382_v28 = vmul.f32 0.03125, %v1358_v57 }
 0x464   :  { %v1355_v7 = vpop.xlane.xlu1 %1354 }
 0x465   :  { %2033 = vrsqrt.f32 %v1399_v2  ;;  %v1398_v60 = vadd.f32 1e-05, %v1382_v28  ;;  %v1381_v36 = vmul.f32 0.03125, %v1355_v7 }
 0x466   :  { %v1352_v16 = vpop.xlane.xlu0 %1351 }
 0x467   :  { %2035 = vrsqrt.f32 %v1398_v60  ;;  %v1397_v59 = vadd.f32 1e-05, %v1381_v36  ;;  %v1380_v0 = vmul.f32 0.03125, %v1352_v16 }
 0x468   :  { %v1349_v45 = vpop.xlane.xlu1 %1348 }
 0x469   :  { %2037 = vrsqrt.f32 %v1397_v59  ;;  %v1396_v55 = vadd.f32 1e-05, %v1380_v0  ;;  %v1379_v9 = vmul.f32 0.03125, %v1349_v45 }
 0x46a   :  { %v1346_v11 = vpop.xlane.xlu0 %1345 }
 0x46b   :  { %2039 = vrsqrt.f32 %v1396_v55  ;;  %v1395_v61 = vadd.f32 1e-05, %v1379_v9  ;;  %v1378_v12 = vmul.f32 0.03125, %v1346_v11 }
 0x46c   :  { %v2028_v1 = vpop.eup %2027  ;;  %v1343_v40 = vpop.xlane.xlu1 %1342 }
 0x46d   :  { %v1434_v50 = vmul.f32 %v2028_v1, %v2719_v14  ;;  %v1394_v56 = vadd.f32 1e-05, %v1378_v12  ;;  %v1377_v17 = vmul.f32 0.03125, %v1343_v40  ;;  %2041 = vrsqrt.f32 %v1395_v61 }
 0x46e   :  { %v2030_v63 = vpop.eup %2029  ;;  %v1340_v21 = vpop.xlane.xlu0 %1339 }
 0x46f   :  { %v1456_v41 = vmul.f32 %v2814_v13, %v1434_v50  ;;  %v1433_v29 = vmul.f32 %v2030_v63, %v2721_v62  ;;  %v1393_v32 = vadd.f32 1e-05, %v1377_v17  ;;  %2043 = vrsqrt.f32 %v1394_v56 }
 0x470   :  { %v2032_v25 = vpop.eup %2031  ;;  %v1376_v44 = vmul.f32 0.03125, %v1340_v21  ;;  %v1337_v38 = vpop.xlane.xlu1 %1336 }
 0x471   :  { %v1455_v35 = vmul.f32 %v2814_v13, %v1433_v29  ;;  %v1432_v14 = vmul.f32 %v2032_v25, %v2725_v5  ;;  %v1478_v6 = vadd.f32 %v2822_v33, %v1456_v41  ;;  %2045 = vrsqrt.f32 %v1393_v32 }
 0x472   :  { %v2034_v15 = vpop.eup %2033  ;;  %v1392_v47 = vadd.f32 1e-05, %v1376_v44  ;;  %v1375_v48 = vmul.f32 0.03125, %v1337_v38  ;;  %v1334_v23 = vpop.xlane.xlu0 %1333 }
 0x473   :  { %v1431_v58 = vmul.f32 %v2034_v15, %v2730_v30  ;;  %v1454_v10 = vmul.f32 %v2814_v13, %v1432_v14  ;;  %v1510_v39 = vmul.f32 0.70710677, %v1478_v6  ;;  %v2830_v43 = vadd.f32 %v2822_v33, %v1455_v35 }
 0x474   :  { %v2036_v62 = vpop.eup %2035  ;;  %v1391_v57 = vadd.f32 1e-05, %v1375_v48  ;;  %v1374_v2 = vmul.f32 0.03125, %v1334_v23  ;;  %v1331_v7 = vpop.xlane.xlu1 %1330  ;;  %v1494_v25 = vmul.f32 0.5, %v1478_v6 }
 0x475   :  { %v1453_v46 = vmul.f32 %v2814_v13, %v1431_v58  ;;  %v1430_v5 = vmul.f32 %v2036_v62, %v2735_v37  ;;  %2047 = verf.f32 %v1510_v39  ;;  %v1509_v51 = vmul.f32 0.70710677, %v2830_v43 }
 0x476   :  { %v2038_v26 = vpop.eup %2037  ;;  %v2838_v54 = vadd.f32 %v2822_v33, %v1454_v10  ;;  %v1390_v0 = vadd.f32 1e-05, %v1374_v2  ;;  %v1328_v45 = vpop.xlane.xlu0 %1327  ;;  %v1493_v6 = vmul.f32 0.5, %v2830_v43 }
 0x477   :  { %v1429_v30 = vmul.f32 %v2038_v26, %v2741_v20  ;;  %v1452_v27 = vmul.f32 %v2814_v13, %v1430_v5  ;;  %2049 = verf.f32 %v1509_v51  ;;  %v2841_v49 = vadd.f32 %v2822_v33, %v1453_v46 }
 0x478   :  { %v2040_v52 = vpop.eup %2039  ;;  %2051 = vrsqrt.f32 %v1392_v47  ;;  %v1508_v20 = vmul.f32 0.70710677, %v2838_v54  ;;  %v1372_v12 = vmul.f32 0.03125, %v1328_v45  ;;  %v1325_v56 = vpop.xlane.xlu1 %1324  ;;  %v1492_v43 = vmul.f32 0.5, %v2838_v54 }
 0x479   :  { %v1428_v37 = vmul.f32 %v2040_v52, %v2747_v4  ;;  %v1451_v28 = vmul.f32 %v2814_v13, %v1429_v30  ;;  %v1507_v36 = vmul.f32 0.70710677, %v2841_v49  ;;  %v2848_v16 = vadd.f32 %v2822_v33, %v1452_v27 }
 0x47a   :  { %v2042_v60 = vpop.eup %2041  ;;  %2053 = verf.f32 %v1508_v20  ;;  %v1373_v4 = vmul.f32 0.03125, %v1331_v7  ;;  %v1388_v41 = vadd.f32 1e-05, %v1372_v12  ;;  %v1371_v29 = vmul.f32 0.03125, %v1325_v56 }
 0x47b   :  { %v1450_v59 = vmul.f32 %v2814_v13, %v1428_v37  ;;  %2055 = vrsqrt.f32 %v1391_v57  ;;  %v1427_v9 = vmul.f32 %v2042_v60, %v2753_v53  ;;  %v1506_v11 = vmul.f32 0.70710677, %v2848_v16 }
 0x47c   :  { %v2044_v55 = vpop.eup %2043  ;;  %2057 = verf.f32 %v1507_v36  ;;  %v2854_v61 = vadd.f32 %v2822_v33, %v1451_v28  ;;  %v1389_v50 = vadd.f32 1e-05, %v1373_v4  ;;  %v1387_v46 = vadd.f32 1e-05, %v1371_v29 }
 0x47d   :  { %v1426_v40 = vmul.f32 %v2044_v55, %v2759_v34  ;;  %2059 = vrsqrt.f32 %v1390_v0  ;;  %v2858_v17 = vadd.f32 %v2822_v33, %v1450_v59  ;;  %v1449_v63 = vmul.f32 %v2814_v13, %v1427_v9 }
 0x47e   :  { %v2046_v1 = vpop.eup %2045  ;;  %2061 = verf.f32 %v1506_v11  ;;  %v1505_v53 = vmul.f32 0.70710677, %v2854_v61  ;;  %v1491_v54 = vmul.f32 0.5, %v2841_v49  ;;  %v1490_v49 = vmul.f32 0.5, %v2848_v16 }
 0x47f   :  { %v1448_v14 = vmul.f32 %v2814_v13, %v1426_v40  ;;  %v1425_v34 = vmul.f32 %v2046_v1, %v2765_v42  ;;  %2063 = vrsqrt.f32 %v1389_v50  ;;  %v1504_v44 = vmul.f32 0.70710677, %v2858_v17 }
 0x480   :  { %2065 = verf.f32 %v1505_v53  ;;  %v2866_v62 = vadd.f32 %v2822_v33, %v1449_v63  ;;  %v1489_v16 = vmul.f32 0.5, %v2854_v61 }
 0x481   :  { %2067 = vrsqrt.f32 %v1388_v41  ;;  %v1447_v39 = vmul.f32 %v2814_v13, %v1425_v34  ;;  %v2874_v5 = vadd.f32 %v2822_v33, %v1448_v14 }
 0x482   :  { %v2048_v21 = vpop.eup %2047  ;;  %2069 = verf.f32 %v1504_v44  ;;  %v1503_v23 = vmul.f32 0.70710677, %v2866_v62 }
 0x483   :  { %v1542_v32 = vadd.f32 1.0, %v2048_v21  ;;  %2071 = vrsqrt.f32 %v1387_v46  ;;  %v2883_v52 = vadd.f32 %v2822_v33, %v1447_v39  ;;  %v1486_v39 = vmul.f32 0.5, %v2874_v5 }
 0x484   :  { %v2050_v35 = vpop.eup %2049  ;;  %2073 = verf.f32 %v1503_v23 }
 0x485   :  { %v2052_v15 = vpop.eup %2051  ;;  %v1558_v38 = vmul.f32 %v1542_v32, %v1494_v25  ;;  %v1541_v58 = vadd.f32 1.0, %v2050_v35  ;;  %v1501_v59 = vmul.f32 0.70710677, %v2883_v52  ;;  %v1488_v25 = vmul.f32 0.5, %v2858_v17 }
 0x486   :  { %v1424_v42 = vmul.f32 %v2052_v15, %v2771_v3  ;;  %v1502_v3 = vmul.f32 0.70710677, %v2874_v5  ;;  %v1487_v15 = vmul.f32 0.5, %v2866_v62 }
 0x487   :  { %1917 = vmatpush3.xpose.msk.msra.mxu1 %vm687_vm3, %v1558_v38  ;;  %v2054_v10 = vpop.eup %2053  ;;  %v1557_v48 = vmul.f32 %v1541_v58, %v1493_v6 }
 0x488   :  { %1918 = vmatprep.subr.mxu1 %v2226_v8  ;;  %v2056_v47 = vpop.eup %2055  ;;  %v1540_v26 = vadd.f32 1.0, %v2054_v10  ;;  %v1446_v37 = vmul.f32 %v2814_v13, %v1424_v42  ;;  %2075 = verf.f32 %v1502_v3 }
 0x489   :  { %v2058_v51 = vpop.eup %2057  ;;  %v1423_v30 = vmul.f32 %v2056_v47, %v2777_v31  ;;  %2077 = verf.f32 %v1501_v59 }
 0x48a   :  { %v2060_v27 = vpop.eup %2059  ;;  %v1556_v57 = vmul.f32 %v1540_v26, %v1492_v43  ;;  %v1539_v2 = vadd.f32 1.0, %v2058_v51  ;;  %v2893_v0 = vadd.f32 %v2822_v33, %v1446_v37 }
 0x48b   :  { %1919 = vmatpush3.xpose.msk.msra.mxu1 %vm687_vm3, %v1557_v48  ;;  %v2062_v28 = vpop.eup %2061  ;;  %v1445_v31 = vmul.f32 %v2814_v13, %v1423_v30  ;;  %v1422_v7 = vmul.f32 %v2060_v27, %v2783_v18  ;;  %v1485_v48 = vmul.f32 0.5, %v2883_v52 }
 0x48c   :  { %1920 = vmatprep.subr.mxu1 %v2226_v8  ;;  %v2064_v20 = vpop.eup %2063  ;;  %v1555_v60 = vmul.f32 %v1539_v2, %v1491_v54  ;;  %v1538_v36 = vadd.f32 1.0, %v2062_v28  ;;  %v1500_v1 = vmul.f32 0.70710677, %v2893_v0  ;;  %v1484_v43 = vmul.f32 0.5, %v2893_v0 }
 0x48d   :  { %v2066_v4 = vpop.eup %2065  ;;  %v1444_v55 = vmul.f32 %v2814_v13, %v1422_v7  ;;  %v1421_v18 = vmul.f32 %v2064_v20, %v2789_v19  ;;  %v2901_v9 = vadd.f32 %v2822_v33, %v1445_v31 }
 0x48e   :  { %v2068_v45 = vpop.eup %2067  ;;  %v1554_v11 = vmul.f32 %v1538_v36, %v1490_v49  ;;  %v1537_v12 = vadd.f32 1.0, %v2066_v4  ;;  %2079 = verf.f32 %v1500_v1 }
 0x48f   :  { %1921 = vmatpush3.xpose.msk.msra.mxu1 %vm687_vm3, %v1556_v57  ;;  %v2070_v40 = vpop.eup %2069  ;;  %v1443_v50 = vmul.f32 %v2814_v13, %v1421_v18  ;;  %v1420_v56 = vmul.f32 %v2068_v45, %v2795_v22  ;;  %v1499_v19 = vmul.f32 0.70710677, %v2901_v9  ;;  %v1466_v41 = vadd.f32 %v2822_v33, %v1444_v55  ;;  %v1559_v55 = vld [vmem:[%s2962_s11] sm:$0x1] }
 0x490   :  { %1922 = vmatprep.subr.mxu1 %v2226_v8  ;;  %v2072_v63 = vpop.eup %2071  ;;  %v1553_v53 = vmul.f32 %v1537_v12, %v1489_v16  ;;  %v1536_v21 = vadd.f32 1.0, %v2070_v40  ;;  %v1483_v52 = vmul.f32 0.5, %v2901_v9  ;;  %v1566_v18 = vlaneseq  ;;  %v1564_v12 = vpop.permute.xlu0 %1563 }
 0x491   :  { %v2074_v29 = vpop.eup %2073  ;;  %v1442_v61 = vmul.f32 %v2814_v13, %v1420_v56  ;;  %v1419_v32 = vmul.f32 %v2072_v63, %v2801_v24  ;;  %2081 = verf.f32 %v1499_v19  ;;  %v1498_v34 = vmul.f32 0.70710677, %v1466_v41 }
 0x492   :  { %v1552_v35 = vmul.f32 %v1536_v21, %v1488_v25  ;;  %v1535_v14 = vadd.f32 1.0, %v2074_v29  ;;  %v1465_v44 = vadd.f32 %v2822_v33, %v1443_v50  ;;  %v1482_v2 = vmul.f32 0.5, %v1466_v41 }
 0x493   :  { %1923 = vmatpush3.xpose.msk.msra.mxu1 %vm687_vm3, %v1555_v60  ;;  %v1441_v38 = vmul.f32 %v2814_v13, %v1419_v32  ;;  %v1464_v17 = vadd.f32 %v2822_v33, %v1442_v61  ;;  %2083 = verf.f32 %v1498_v34  ;;  %v1567_v9 = vshrl.u32 %v1566_v18, 7 }
 0x494   :  { %1924 = vmatprep.subr.mxu1 %v2226_v8  ;;  %v1551_v24 = vmul.f32 %v1535_v14, %v1487_v15  ;;  %v1497_v6 = vmul.f32 0.70710677, %v1465_v44  ;;  %v1481_v7 = vmul.f32 0.5, %v1465_v44 }
 0x495   :  { %v2076_v22 = vpop.eup %2075  ;;  %v1496_v42 = vmul.f32 0.70710677, %v1464_v17  ;;  %v1463_v13 = vadd.f32 %v2822_v33, %v1441_v38  ;;  %v1480_v59 = vmul.f32 0.5, %v1464_v17 }
 0x496   :  { %v1534_v58 = vadd.f32 1.0, %v2076_v22  ;;  %v2078_v10 = vpop.eup %2077  ;;  %2085 = verf.f32 %v1497_v6 }
 0x497   :  { %1925 = vmatpush3.xpose.msk.msra.mxu1 %vm687_vm3, %v1554_v11  ;;  %v1533_v62 = vadd.f32 1.0, %v2078_v10  ;;  %2087 = verf.f32 %v1496_v42  ;;  %v1495_v5 = vmul.f32 0.70710677, %v1463_v13  ;;  %v1479_v49 = vmul.f32 0.5, %v1463_v13 }
 0x498   :  { %1926 = vmatprep.subr.mxu1 %v2226_v8  ;;  %v1550_v46 = vmul.f32 %v1534_v58, %v1486_v39  ;;  %v1568_v11 = vsub.s32 0, %v1567_v9 }
 0x499   :  { %v1549_v23 = vmul.f32 %v1533_v62, %v1485_v48  ;;  %2089 = verf.f32 %v1495_v5 }
 0x49a   :  { %v1569_v1 = vrot.slane %v1564_v12, %v1568_v11 }
 0x49b   :  { %1927 = vmatpush3.xpose.msk.msra.mxu1 %vm687_vm3, %v1553_v53  ;;  %v2080_v47 = vpop.eup %2079 }
 0x49c   :  { %1928 = vmatprep.subr.mxu1 %v2226_v8  ;;  %v1532_v51 = vadd.f32 1.0, %v2080_v47 }
 0x49e   :  { %v2082_v26 = vpop.eup %2081  ;;  %v1548_v30 = vmul.f32 %v1532_v51, %v1484_v43 }
 0x49f   :  { %1929 = vmatpush3.xpose.msk.msra.mxu1 %vm687_vm3, %v1552_v35  ;;  %v1531_v33 = vadd.f32 1.0, %v2082_v26 }
 0x4a0   :  { %1930 = vmatprep.subr.mxu1 %v2226_v8  ;;  %v2084_v3 = vpop.eup %2083 }
 0x4a1   :  { %v1547_v27 = vmul.f32 %v1531_v33, %v1483_v52  ;;  %v1530_v37 = vadd.f32 1.0, %v2084_v3 }
 0x4a3   :  { %1931 = vmatpush3.xpose.msk.msra.mxu1 %vm687_vm3, %v1551_v24  ;;  %v2086_v57 = vpop.eup %2085  ;;  %v1546_v28 = vmul.f32 %v1530_v37, %v1482_v2 }
 0x4a4   :  { %1932 = vmatprep.subr.mxu1 %v2226_v8  ;;  %v1529_v54 = vadd.f32 1.0, %v2086_v57  ;;  %v2088_v31 = vpop.eup %2087 }
 0x4a5   :  { %v1528_v60 = vadd.f32 1.0, %v2088_v31 }
 0x4a6   :  { %v1545_v20 = vmul.f32 %v1529_v54, %v1481_v7  ;;  %v2090_v36 = vpop.eup %2089 }
 0x4a7   :  { %1933 = vmatpush3.xpose.msk.msra.mxu1 %vm687_vm3, %v1550_v46  ;;  %v1544_v0 = vmul.f32 %v1528_v60, %v1480_v59  ;;  %v1527_v4 = vadd.f32 1.0, %v2090_v36 }
 0x4a8   :  { %1934 = vmatprep.subr.mxu1 %v2226_v8 }
 0x4a9   :  { %v1543_v45 = vmul.f32 %v1527_v4, %v1479_v49 }
 0x4ab   :  { %1935 = vmatpush3.xpose.msk.msra.mxu1 %vm687_vm3, %v1549_v23 }
 0x4ac   :  { %1936 = vmatprep.subr.mxu1 %v2226_v8 }
 0x4af   :  { %1937 = vmatpush3.xpose.msk.msra.mxu1 %vm687_vm3, %v1548_v30 }
 0x4b0   :  { %1938 = vmatprep.subr.mxu1 %v2226_v8 }
 0x4b3   :  { %1939 = vmatpush3.xpose.msk.msra.mxu1 %vm687_vm3, %v1547_v27 }
 0x4b4   :  { %1940 = vmatprep.subr.mxu1 %v2226_v8 }
 0x4b7   :  { %1941 = vmatpush3.xpose.msk.msra.mxu1 %vm687_vm3, %v1546_v28 }
 0x4b8   :  { %1942 = vmatprep.subr.mxu1 %v2226_v8 }
 0x4bb   :  { %1943 = vmatpush3.xpose.msk.msra.mxu1 %vm687_vm3, %v1545_v20 }
 0x4bc   :  { %1944 = vmatprep.subr.mxu1 %v2226_v8 }
 0x4bf   :  { %1945 = vmatpush3.xpose.msk.msra.mxu1 %vm687_vm3, %v1544_v0 }
 0x4c0   :  { %1946 = vmatprep.subr.mxu1 %v2226_v8 }
 0x4c3   :  { %1947 = vmatpush3.xpose.msk.msra.mxu1 %vm687_vm3, %v1543_v45 }
 0x4c6   :  { %1949 = vmatmul.mubr.msk.f32.vlgmr.msra.gmra.mxu1 %vm687_vm3, %v1559_v55 }
 0x586   :  { %v1687_v40 = vpop.f32.mrf.mxu1 }
 0x587   :  { %v1688_v16 = vadd.f32 %v1687_v40, %v1569_v1 }
 0x588   :  { %v1950_v8 = vpop.f32.mrf.mxu1 }
 0x589   :  { %1691 = vst [vmem:[#allocation12] sm:$0x1] %v1688_v16 }
 0x58a   :  { %2202 = shalt.err (!%p2199_p1)
}
 0x58b   :  { %1701 = dma.vmem_to_hbm [thread:$0]  %s1699_s0, 16, %s2964_s13, [#allocation5]  }
 0x58c   :  { %2217 = dma.done.wait [#allocation5], 16  }
 0x58d   :  { %2218 = vsyncadd [#allocation5], 4294967280 }
 0x58e   :  { %1705 = vsyncpa [#allocation4], 1 }
 0x58f   :  { %1706 = vsyncpa [#allocation7], 1 }
 0x590   :  { %1707 = vsyncpa [#allocation10], 1 }
 0x591   :  { %1708 = vsyncpa [#allocation5], 1 }

// kernel: tpu_custom_call.1
= control target key start
LH: loop header
LB: loop body
LE: loop exit
PB: predicated region body
PF: predicated region fallthrough
CT: control target
= control target key end

     0   :  { %s2951_s0 = inlined_call_operand.hbm [shape: f32[8,20], index: 0, kind: input, shape index: {}]   ;;  %s2952_s1 = inlined_call_operand.hbm [shape: f32[8,12], index: 1, kind: input, shape index: {}]   ;;  %s2953_s2 = inlined_call_operand.hbm [shape: f32[20,32], index: 2, kind: input, shape index: {}]   ;;  %s2954_s3 = inlined_call_operand.hbm [shape: f32[12,32], index: 3, kind: input, shape index: {}]   ;;  %s2955_s4 = inlined_call_operand.vmem [shape: f32[1,32], index: 4, kind: input, shape index: {}]   ;;  %s2956_s5 = inlined_call_operand.vmem [shape: f32[1,32], index: 5, kind: input, shape index: {}]   ;;  %s2957_s6 = inlined_call_operand.vmem [shape: f32[1,32], index: 6, kind: input, shape index: {}]   ;;  %s2958_s7 = inlined_call_operand.hbm [shape: f32[32,32], index: 7, kind: input, shape index: {}]   ;;  %s2959_s8 = inlined_call_operand.vmem [shape: f32[1,32], index: 8, kind: input, shape index: {}]   ;;  %s2960_s9 = inlined_call_operand.vmem [shape: f32[1,32], index: 9, kind: input, shape index: {}]   ;;  %s2961_s10 = inlined_call_operand.vmem [shape: f32[1,32], index: 10, kind: input, shape index: {}]   ;;  %s2962_s11 = inlined_call_operand.vmem [shape: f32[1,32], index: 11, kind: input, shape index: {}]   ;;  %s2963_s12 = inlined_call_operand.<no memory space> [shape: f32[1,1], index: 12, kind: input, shape index: {}]   ;;  %s2964_s13 = inlined_call_operand.hbm [shape: f32[1,1,128], index: 13, kind: output, shape index: {}]  }
   0x1   :  { %v18_v0 = vstv %s2963_s12 }
   0x2   :  { %19 = vst [vmem:[#allocation2] sm:$0x1] %v18_v0 }
   0x3   :  { %20 = vsyncpa [#allocation4], 0 }
   0x4   :  { %21 = vsyncpa [#allocation7], 0 }
   0x5   :  { %22 = vsyncpa [#allocation10], 0 }
   0x6   :  { %23 = vsyncpa [#allocation5], 0 }
   0x7   :  { %28 = vsyncadd [#allocation4], 1920  ;;  %s2219_s27 = smov [#allocation3]  }
   0x8   :  { %s29_s28 = sshll.u32 %s2219_s27, 4  ;;  %s30_s28 = int_to_ptr.vmem [resolvable:$true] %s29_s28 }
   0x9   :  { %s2099_s29 = scalar_lea.vmem %s30_s28, 128  ;;  %s2103_s30 = scalar_lea.vmem %s30_s28, 2048 }
   0xa   :  { %p2100_p0 = scmp.ne.s32.totalorder %s30_s28, %s2099_s29  ;;  %p2104_p1 = scmp.lt.s32.totalorder %s30_s28, %s30_s28 }
   0xb   :  { %p2105_p2 = scmp.lt.s32.totalorder %s2103_s30, %s2099_s29 }
   0xd   :  { %p2106_p3 = por %p2105_p2, %p2104_p1 }
   0xf   :  { %p2107_p4 = pnand %p2106_p3, %p2100_p0 }
  0x11   :  { %2110 = shalt.err (!%p2107_p4)
}
  0x12   :  { %s2220_s14 = smov 128   ;;  %s2221_s15 = smov 8  }
  0x13   :  { %35 = dma.hbm_to_vmem [thread:$0]  %s2951_s0, 128, %s30_s28, [#allocation4], %s2220_s14, %s2220_s14, %s2221_s15  }
  0x14   :  { %40 = vsyncadd [#allocation7], 1920  ;;  %s2222_s17 = smov [#allocation6]   ;;  %s2223_s19 = smov [#allocation9]  }
  0x15   :  { %s41_s18 = sshll.u32 %s2222_s17, 4  ;;  %s65_s20 = sshll.u32 %s2223_s19, 4  ;;  %s42_s18 = int_to_ptr.vmem [resolvable:$true] %s41_s18  ;;  %s66_s20 = int_to_ptr.vmem [resolvable:$true] %s65_s20 }
  0x16   :  { %s2119_s21 = scalar_lea.vmem %s42_s18, 128  ;;  %s2123_s22 = scalar_lea.vmem %s42_s18, 2048 }
  0x17   :  { %p2120_p5 = scmp.ne.s32.totalorder %s42_s18, %s2119_s21  ;;  %p2124_p6 = scmp.lt.s32.totalorder %s42_s18, %s42_s18 }
  0x18   :  { %p2125_p7 = scmp.lt.s32.totalorder %s2123_s22, %s2119_s21 }
  0x1a   :  { %p2126_p8 = por %p2125_p7, %p2124_p6 }
  0x1c   :  { %p2127_p9 = pnand %p2126_p8, %p2120_p5 }
  0x1e   :  { %2130 = shalt.err (!%p2127_p9)
}
  0x1f   :  { %47 = dma.hbm_to_vmem [thread:$0]  %s2952_s1, 128, %s42_s18, [#allocation7], %s2220_s14, %s2220_s14, %s2221_s15  }
  0x20   :  { %s2139_s24 = scalar_lea.vmem %s66_s20, 256  ;;  %p2144_p11 = scmp.lt.s32.totalorder %s66_s20, %s66_s20 }
  0x21   :  { %p2140_p10 = scmp.ne.s32.totalorder %s66_s20, %s2139_s24  ;;  %p2145_p12 = scmp.lt.s32.totalorder %s2139_s24, %s2139_s24 }
  0x23   :  { %p2146_p13 = por %p2145_p12, %p2144_p11 }
  0x25   :  { %p2147_p0 = pnand %p2146_p13, %p2140_p10 }
  0x27   :  { %2150 = shalt.err (!%p2147_p0)
}
  0x28   :  { %71 = dma.hbm_to_vmem [thread:$0]  %s2954_s3, 256, %s66_s20, [#allocation10], %s2220_s14, %s2220_s14, %s2221_s15  }
  0x29   :  { %s2224_s27 = smov [#allocation8]   ;;  %s2225_s29 = smov [#allocation11]  }
  0x2a   :  { %s53_s28 = sshll.u32 %s2224_s27, 4  ;;  %s83_s30 = sshll.u32 %s2225_s29, 4  ;;  %s54_s28 = int_to_ptr.vmem [resolvable:$true] %s53_s28  ;;  %s84_s30 = int_to_ptr.vmem [resolvable:$true] %s83_s30 }
  0x2b   :  { %s2159_s1 = scalar_lea.vmem %s54_s28, 384  ;;  %p2164_p2 = scmp.lt.s32.totalorder %s54_s28, %s54_s28 }
  0x2c   :  { %p2160_p1 = scmp.ne.s32.totalorder %s54_s28, %s2159_s1  ;;  %p2165_p3 = scmp.lt.s32.totalorder %s2159_s1, %s2159_s1 }
  0x2e   :  { %p2166_p4 = por %p2165_p3, %p2164_p2 }
  0x30   :  { %p2167_p5 = pnand %p2166_p4, %p2160_p1 }
  0x32   :  { %2170 = shalt.err (!%p2167_p5)
}
  0x33   :  { %59 = dma.hbm_to_vmem [thread:$0]  %s2953_s2, 384, %s54_s28, [#allocation7], %s2220_s14, %s2220_s14, %s2221_s15  }
  0x34   :  { %s2179_s3 = scalar_lea.vmem %s84_s30, 512  ;;  %p2184_p7 = scmp.lt.s32.totalorder %s84_s30, %s84_s30 }
  0x35   :  { %p2180_p6 = scmp.ne.s32.totalorder %s84_s30, %s2179_s3  ;;  %p2185_p8 = scmp.lt.s32.totalorder %s2179_s3, %s2179_s3 }
  0x37   :  { %p2186_p9 = por %p2185_p8, %p2184_p7 }
  0x39   :  { %p2187_p10 = pnand %p2186_p9, %p2180_p6 }
  0x3b   :  { %2190 = shalt.err (!%p2187_p10)
}
  0x3c   :  { %89 = dma.hbm_to_vmem [thread:$0]  %s2958_s7, 512, %s84_s30, [#allocation10], %s2220_s14, %s2220_s14, %s2221_s15  }
  0x3d   :  { %2211 = dma.done.wait [#allocation4], 2048  }
  0x3e   :  { %2212 = vsyncadd [#allocation4], 4294965248 }
  0x3f   :  { %2213 = dma.done.wait [#allocation7], 2432  }
  0x40   :  { %2214 = vsyncadd [#allocation7], 4294964864 }
  0x41   :  { %2215 = dma.done.wait [#allocation10], 768  }
  0x42   :  { %2216 = vsyncadd [#allocation10], 4294966528  ;;  %vm316_vm0 = vcmask 1043456   ;;  %v266_v1 = vld [vmem:[#allocation9 + $0x8] sm:$0xf]  ;;  %v265_v3 = vld [vmem:[#allocation9] sm:$0xff] }
  0x43   :  { %v264_v2 = vld [vmem:[#allocation8 + $0x10] sm:$0xf]  ;;  %1826 = vmatprep.subr.msk.mxu0 %vm316_vm0, %v266_v1  ;;  %v263_v4 = vld [vmem:[#allocation8 + $0x8] sm:$0xff]  ;;  %v131_v5 = vld [vmem:[#allocation6] sm:$0xff]  ;;  %vm267_vm1 = vcmask 97280   ;;  %vm465_vm2 = vcmask 162816  }
  0x44   :  { %1854 = vmatprep.subr.msk.mxu1 %vm316_vm0, %v264_v2  ;;  %1827 = vmatpush3.msk.msra.mxu0 %vm316_vm0, %v266_v1  ;;  %v262_v6 = vld [vmem:[#allocation8] sm:$0xff]  ;;  %v2226_v8 = vmov 0.0   ;;  %v2367_v18 = vld [vmem:[%s2955_s4] ss:$0 sm:$0xff]  ;;  %vm687_vm3 = vcmask 261120   ;;  %vm2227_vm4 = vmmov 0  }
  0x45   :  { %1855 = vmatpush3.msk.msra.mxu1 %vm316_vm0, %v264_v2  ;;  %1828 = vmatprep.subr.mxu0 %v265_v3  ;;  %v115_v7 = vld [vmem:[#allocation3] sm:$0xff]  ;;  %s2229_s23 = smov [#allocation12]  }
  0x46   :  { %1856 = vmatprep.subr.mxu1 %v263_v4  ;;  %1829 = vmatpush3.msra.mxu0 %v265_v3  ;;  %s1698_s0 = sshll.u32 %s2229_s23, 4  ;;  %s1699_s0 = int_to_ptr.vmem [resolvable:$true] %s1698_s0 }
  0x47   :  { %1830 = vmatprep.mubr.msk.f32.mxu0 %vm267_vm1, %v131_v5  ;;  %1857 = vmatpush3.msra.mxu1 %v263_v4  ;;  %s2191_s24 = scalar_lea.vmem %s1699_s0, 16  ;;  %s2195_s25 = scalar_lea.vmem %s1699_s0, 32 }
  0x48   :  { %1831 = vmatmul.mubr.f32.vlgmr.msra.gmra.mxu0 %v2226_v8  ;;  %1858 = vmatprep.subr.mxu1 %v262_v6  ;;  %p2192_p11 = scmp.ne.s32.totalorder %s1699_s0, %s2191_s24  ;;  %p2196_p12 = scmp.lt.s32.totalorder %s1699_s0, %s1699_s0 }
  0x49   :  { %1860 = vmatprep.mubr.msk.f32.mxu1 %vm465_vm2, %v115_v7  ;;  %1859 = vmatpush3.msra.mxu1 %v262_v6  ;;  %p2197_p13 = scmp.lt.s32.totalorder %s2195_s25, %s2191_s24 }
  0x4a   :  { %1833 = vmatprep.mubr.f32.mxu0 %v2226_v8  ;;  %1861 = vmatmul.mubr.f32.vlgmr.msra.gmra.mxu1 %v2226_v8 }
  0x4b   :  { %1916 = vmatprep.subr.mxu1 %v2226_v8  ;;  %1863 = vmatprep.mubr.f32.mxu1 %v2226_v8  ;;  %p2198_p0 = por %p2197_p13, %p2196_p12 }
  0x4c   :  { %1834 = vmatmul.mubr.f32.gmra.mxu0 %v2226_v8 }
  0x4d   :  { %1836 = vmatprep.mubr.f32.mxu0 %v2226_v8  ;;  %p2199_p1 = pnand %p2198_p0, %p2192_p11 }
  0x4e   :  { %1864 = vmatmul.mubr.f32.gmra.mxu1 %v2226_v8 }
  0x4f   :  { %1866 = vmatprep.mubr.f32.mxu1 %v2226_v8 }
  0x50   :  { %1837 = vmatmul.mubr.f32.gmra.mxu0 %v2226_v8 }
  0x51   :  { %1839 = vmatprep.mubr.f32.mxu0 %v2226_v8 }
  0x52   :  { %1867 = vmatmul.mubr.f32.gmra.mxu1 %v2226_v8 }
  0x53   :  { %1869 = vmatprep.mubr.f32.mxu1 %v2226_v8 }
  0x54   :  { %1840 = vmatmul.mubr.f32.gmra.mxu0 %v2226_v8 }
  0x55   :  { %1842 = vmatprep.mubr.f32.mxu0 %v2226_v8 }
  0x56   :  { %1870 = vmatmul.mubr.f32.gmra.mxu1 %v2226_v8 }
  0x57   :  { %1872 = vmatprep.mubr.f32.mxu1 %v2226_v8 }
  0x58   :  { %1843 = vmatmul.mubr.f32.gmra.mxu0 %v2226_v8 }
  0x59   :  { %1845 = vmatprep.mubr.f32.mxu0 %v2226_v8 }
  0x5a   :  { %1873 = vmatmul.mubr.f32.gmra.mxu1 %v2226_v8 }
  0x5b   :  { %1875 = vmatprep.mubr.f32.mxu1 %v2226_v8 }
  0x5c   :  { %1846 = vmatmul.mubr.f32.gmra.mxu0 %v2226_v8 }
  0x5d   :  { %1848 = vmatprep.mubr.f32.mxu0 %v2226_v8 }
  0x5e   :  { %1876 = vmatmul.mubr.f32.gmra.mxu1 %v2226_v8 }
  0x5f   :  { %1878 = vmatprep.mubr.f32.mxu1 %v2226_v8 }
  0x60   :  { %1849 = vmatmul.mubr.f32.gmra.mxu0 %v2226_v8 }
  0x61   :  { %1851 = vmatprep.mubr.f32.mxu0 %v2226_v8 }
  0x62   :  { %1879 = vmatmul.mubr.f32.gmra.mxu1 %v2226_v8 }
  0x63   :  { %1881 = vmatprep.mubr.f32.mxu1 %v2226_v8 }
  0x64   :  { %1852 = vmatmul.mubr.f32.gmra.mxu0 %v2226_v8 }
  0x66   :  { %1882 = vmatmul.mubr.f32.gmra.mxu1 %v2226_v8 }
  0x67   :  { %1948 = vmatprep.mubr.msk.f32.mxu1 %vm2227_vm4, %v2226_v8 }
 0x108   :  { %v1832_v9 = vpop.f32.mrf.mxu0 }
 0x10a   :  { %v386_v10 = vpop.f32.mrf.mxu0  ;;  %v1862_v11 = vpop.f32.mrf.mxu1 }
 0x10b   :  { %v589_v14 = vadd.f32 %v1862_v11, %v1832_v9 }
 0x10c   :  { %v1835_v12 = vpop.f32.mrf.mxu0  ;;  %v583_v13 = vpop.f32.mrf.mxu1 }
 0x10d   :  { %v584_v15 = vadd.f32 %v583_v13, %v386_v10  ;;  %v2375_v26 = vadd.f32 %v2367_v18, %v589_v14 }
 0x10e   :  { %v396_v16 = vpop.f32.mrf.mxu0  ;;  %v1865_v17 = vpop.f32.mrf.mxu1 }
 0x10f   :  { %v2370_v20 = vadd.f32 %v2367_v18, %v584_v15  ;;  %v599_v22 = vadd.f32 %v1865_v17, %v1835_v12  ;;  %v691_v34 = vsel %vm687_vm3, %v2375_v26, 0.0 }
 0x110   :  { %v1838_v19 = vpop.f32.mrf.mxu0  ;;  %v593_v21 = vpop.f32.mrf.mxu1 }
 0x111   :  { %v594_v23 = vadd.f32 %v593_v21, %v396_v16  ;;  %v688_v24 = vsel %vm687_vm3, %v2370_v20, 0.0  ;;  %v2385_v36 = vadd.f32 %v2367_v18, %v599_v22 }
 0x112   :  { %v406_v25 = vpop.f32.mrf.mxu0  ;;  %v1868_v27 = vpop.f32.mrf.mxu1  ;;  %689 = vadd.xlane.f32.xlu0 %v688_v24 }
 0x113   :  { %v2378_v29 = vadd.f32 %v2367_v18, %v594_v23  ;;  %v609_v30 = vadd.f32 %v1868_v27, %v1838_v19  ;;  %v697_v44 = vsel %vm687_vm3, %v2385_v36, 0.0 }
 0x114   :  { %v1841_v28 = vpop.f32.mrf.mxu0  ;;  %v603_v31 = vpop.f32.mrf.mxu1 }
 0x115   :  { %v604_v32 = vadd.f32 %v603_v31, %v406_v25  ;;  %v694_v33 = vsel %vm687_vm3, %v2378_v29, 0.0  ;;  %v2391_v41 = vadd.f32 %v2367_v18, %v609_v30 }
 0x116   :  { %v416_v35 = vpop.f32.mrf.mxu0  ;;  %v1871_v37 = vpop.f32.mrf.mxu1  ;;  %695 = vadd.xlane.f32.xlu1 %v694_v33  ;;  %692 = vadd.xlane.f32.xlu0 %v691_v34 }
 0x117   :  { %v2388_v39 = vadd.f32 %v2367_v18, %v604_v32  ;;  %v619_v42 = vadd.f32 %v1871_v37, %v1841_v28  ;;  %v703_v51 = vsel %vm687_vm3, %v2391_v41, 0.0 }
 0x118   :  { %v1844_v38 = vpop.f32.mrf.mxu0  ;;  %v613_v40 = vpop.f32.mrf.mxu1 }
 0x119   :  { %v614_v43 = vadd.f32 %v613_v40, %v416_v35  ;;  %v700_v45 = vsel %vm687_vm3, %v2388_v39, 0.0  ;;  %v2405_v56 = vadd.f32 %v2367_v18, %v619_v42 }
 0x11a   :  { %v426_v46 = vpop.f32.mrf.mxu0  ;;  %v1874_v47 = vpop.f32.mrf.mxu1  ;;  %698 = vadd.xlane.f32.xlu1 %v697_v44  ;;  %701 = vadd.xlane.f32.xlu0 %v700_v45 }
 0x11b   :  { %v2398_v49 = vadd.f32 %v2367_v18, %v614_v43  ;;  %v629_v52 = vadd.f32 %v1874_v47, %v1844_v38  ;;  %v709_v63 = vsel %vm687_vm3, %v2405_v56, 0.0 }
 0x11c   :  { %v1847_v48 = vpop.f32.mrf.mxu0  ;;  %v623_v50 = vpop.f32.mrf.mxu1 }
 0x11d   :  { %v624_v53 = vadd.f32 %v623_v50, %v426_v46  ;;  %v706_v54 = vsel %vm687_vm3, %v2398_v49, 0.0  ;;  %v2415_v2 = vadd.f32 %v2367_v18, %v629_v52 }
 0x11e   :  { %v436_v55 = vpop.f32.mrf.mxu0  ;;  %v1877_v57 = vpop.f32.mrf.mxu1  ;;  %704 = vadd.xlane.f32.xlu1 %v703_v51  ;;  %707 = vadd.xlane.f32.xlu0 %v706_v54 }
 0x11f   :  { %v2408_v59 = vadd.f32 %v2367_v18, %v624_v53  ;;  %v639_v60 = vadd.f32 %v1877_v57, %v1847_v48  ;;  %v715_v11 = vsel %vm687_vm3, %v2415_v2, 0.0 }
 0x120   :  { %v1850_v58 = vpop.f32.mrf.mxu0  ;;  %v633_v61 = vpop.f32.mrf.mxu1 }
 0x121   :  { %v634_v62 = vadd.f32 %v633_v61, %v436_v55  ;;  %v712_v0 = vsel %vm687_vm3, %v2408_v59, 0.0  ;;  %v2421_v7 = vadd.f32 %v2367_v18, %v639_v60 }
 0x122   :  { %v446_v1 = vpop.f32.mrf.mxu0  ;;  %v1880_v3 = vpop.f32.mrf.mxu1  ;;  %710 = vadd.xlane.f32.xlu1 %v709_v63  ;;  %713 = vadd.xlane.f32.xlu0 %v712_v0 }
 0x123   :  { %v2418_v5 = vadd.f32 %v2367_v18, %v634_v62  ;;  %v649_v9 = vadd.f32 %v1880_v3, %v1850_v58  ;;  %v721_v17 = vsel %vm687_vm3, %v2421_v7, 0.0 }
 0x124   :  { %v1853_v4 = vpop.f32.mrf.mxu0  ;;  %v643_v6 = vpop.f32.mrf.mxu1 }
 0x125   :  { %v644_v10 = vadd.f32 %v643_v6, %v446_v1  ;;  %v718_v12 = vsel %vm687_vm3, %v2418_v5, 0.0  ;;  %v2435_v23 = vadd.f32 %v2367_v18, %v649_v9 }
 0x126   :  { %v1883_v13 = vpop.f32.mrf.mxu1  ;;  %716 = vadd.xlane.f32.xlu1 %v715_v11  ;;  %719 = vadd.xlane.f32.xlu0 %v718_v12  ;;  %v456_v14 = vpop.f32.mrf.mxu0 }
 0x127   :  { %v2428_v15 = vadd.f32 %v2367_v18, %v644_v10  ;;  %v659_v19 = vadd.f32 %v1883_v13, %v1853_v4  ;;  %v727_v25 = vsel %vm687_vm3, %v2435_v23, 0.0 }
 0x128   :  { %v653_v16 = vpop.f32.mrf.mxu1 }
 0x129   :  { %v654_v21 = vadd.f32 %v653_v16, %v456_v14  ;;  %v724_v22 = vsel %vm687_vm3, %v2428_v15, 0.0  ;;  %v2445_v28 = vadd.f32 %v2367_v18, %v659_v19 }
 0x12a   :  { %722 = vadd.xlane.f32.xlu1 %v721_v17  ;;  %725 = vadd.xlane.f32.xlu0 %v724_v22 }
 0x12b   :  { %v2438_v24 = vadd.f32 %v2367_v18, %v654_v21  ;;  %v733_v30 = vsel %vm687_vm3, %v2445_v28, 0.0 }
 0x12d   :  { %v730_v27 = vsel %vm687_vm3, %v2438_v24, 0.0 }
 0x12e   :  { %728 = vadd.xlane.f32.xlu1 %v727_v25  ;;  %731 = vadd.xlane.f32.xlu0 %v730_v27 }
 0x132   :  { %734 = vadd.xlane.f32.xlu1 %v733_v30 }
 0x19b   :  { %v690_v31 = vpop.xlane.xlu0 %689 }
 0x19c   :  { %v737_v32 = vmul.f32 0.03125, %v690_v31 }
 0x19e   :  { %v2450_v33 = vsub.f32 %v2370_v20, %v737_v32 }
 0x19f   :  { %v696_v34 = vpop.xlane.xlu1 %695  ;;  %v693_v35 = vpop.xlane.xlu0 %692 }
 0x1a0   :  { %v739_v37 = vmul.f32 0.03125, %v696_v34  ;;  %v738_v38 = vmul.f32 0.03125, %v693_v35  ;;  %v769_v40 = vmul.f32 %v2450_v33, %v2450_v33 }
 0x1a2   :  { %v2455_v18 = vsub.f32 %v2378_v29, %v739_v37  ;;  %v2458_v42 = vsub.f32 %v2375_v26, %v738_v38  ;;  %v785_v43 = vsel %vm687_vm3, %v769_v40, 0.0 }
 0x1a3   :  { %v699_v44 = vpop.xlane.xlu1 %698  ;;  %786 = vadd.xlane.f32.xlu0 %v785_v43  ;;  %v702_v45 = vpop.xlane.xlu0 %701 }
 0x1a4   :  { %v740_v20 = vmul.f32 0.03125, %v699_v44  ;;  %v741_v46 = vmul.f32 0.03125, %v702_v45  ;;  %v771_v47 = vmul.f32 %v2455_v18, %v2455_v18  ;;  %v770_v48 = vmul.f32 %v2458_v42, %v2458_v42 }
 0x1a6   :  { %v2466_v50 = vsub.f32 %v2385_v36, %v740_v20  ;;  %v2469_v29 = vsub.f32 %v2388_v39, %v741_v46  ;;  %v791_v26 = vsel %vm687_vm3, %v771_v47, 0.0  ;;  %v788_v51 = vsel %vm687_vm3, %v770_v48, 0.0 }
 0x1a7   :  { %v705_v52 = vpop.xlane.xlu1 %704  ;;  %792 = vadd.xlane.f32.xlu0 %v791_v26  ;;  %789 = vadd.xlane.f32.xlu1 %v788_v51  ;;  %v708_v53 = vpop.xlane.xlu0 %707 }
 0x1a8   :  { %v742_v54 = vmul.f32 0.03125, %v705_v52  ;;  %v743_v55 = vmul.f32 0.03125, %v708_v53  ;;  %v772_v57 = vmul.f32 %v2466_v50, %v2466_v50  ;;  %v773_v36 = vmul.f32 %v2469_v29, %v2469_v29 }
 0x1aa   :  { %v2478_v58 = vsub.f32 %v2391_v41, %v742_v54  ;;  %v2481_v39 = vsub.f32 %v2398_v49, %v743_v55  ;;  %v794_v60 = vsel %vm687_vm3, %v772_v57, 0.0  ;;  %v797_v61 = vsel %vm687_vm3, %v773_v36, 0.0  ;;  %v1024_v54 = vld [vmem:[#allocation11 + $0x18] sm:$0xff]  ;;  %v1023_v55 = vld [vmem:[#allocation11 + $0x10] sm:$0xff]  ;;  %v1022_v57 = vld [vmem:[#allocation11 + $0x8] sm:$0xff] }
 0x1ab   :  { %v711_v62 = vpop.xlane.xlu1 %710  ;;  %795 = vadd.xlane.f32.xlu1 %v794_v60  ;;  %798 = vadd.xlane.f32.xlu0 %v797_v61  ;;  %v714_v63 = vpop.xlane.xlu0 %713 }
 0x1ac   :  { %v744_v0 = vmul.f32 0.03125, %v711_v62  ;;  %v745_v1 = vmul.f32 0.03125, %v714_v63  ;;  %v774_v3 = vmul.f32 %v2478_v58, %v2478_v58  ;;  %v775_v41 = vmul.f32 %v2481_v39, %v2481_v39  ;;  %1884 = vmatprep.subr.mxu0 %v1024_v54 }
 0x1ad   :  { %1885 = vmatpush3.msra.mxu0 %v1024_v54 }
 0x1ae   :  { %v2490_v4 = vsub.f32 %v2405_v56, %v744_v0  ;;  %v2493_v49 = vsub.f32 %v2408_v59, %v745_v1  ;;  %v800_v6 = vsel %vm687_vm3, %v774_v3, 0.0  ;;  %v803_v9 = vsel %vm687_vm3, %v775_v41, 0.0  ;;  %1886 = vmatprep.subr.mxu0 %v1023_v55 }
 0x1af   :  { %v717_v10 = vpop.xlane.xlu1 %716  ;;  %801 = vadd.xlane.f32.xlu1 %v800_v6  ;;  %804 = vadd.xlane.f32.xlu0 %v803_v9  ;;  %v720_v11 = vpop.xlane.xlu0 %719 }
 0x1b0   :  { %v746_v12 = vmul.f32 0.03125, %v717_v10  ;;  %v747_v13 = vmul.f32 0.03125, %v720_v11  ;;  %v776_v14 = vmul.f32 %v2490_v4, %v2490_v4  ;;  %v777_v56 = vmul.f32 %v2493_v49, %v2493_v49  ;;  %1887 = vmatpush3.msra.mxu0 %v1023_v55 }
 0x1b1   :  { %1888 = vmatprep.subr.mxu0 %v1022_v57 }
 0x1b2   :  { %v2502_v16 = vsub.f32 %v2415_v2, %v746_v12  ;;  %v2505_v59 = vsub.f32 %v2418_v5, %v747_v13  ;;  %v806_v17 = vsel %vm687_vm3, %v776_v14, 0.0  ;;  %v809_v19 = vsel %vm687_vm3, %v777_v56, 0.0  ;;  %1889 = vmatpush3.msra.mxu0 %v1022_v57 }
 0x1b3   :  { %v723_v21 = vpop.xlane.xlu1 %722  ;;  %807 = vadd.xlane.f32.xlu1 %v806_v17  ;;  %810 = vadd.xlane.f32.xlu0 %v809_v19  ;;  %v726_v22 = vpop.xlane.xlu0 %725 }
 0x1b4   :  { %v748_v25 = vmul.f32 0.03125, %v723_v21  ;;  %v749_v27 = vmul.f32 0.03125, %v726_v22  ;;  %v778_v30 = vmul.f32 %v2502_v16, %v2502_v16  ;;  %v779_v2 = vmul.f32 %v2505_v59, %v2505_v59 }
 0x1b6   :  { %v2514_v31 = vsub.f32 %v2421_v7, %v748_v25  ;;  %v2517_v5 = vsub.f32 %v2428_v15, %v749_v27  ;;  %v812_v32 = vsel %vm687_vm3, %v778_v30, 0.0  ;;  %v815_v34 = vsel %vm687_vm3, %v779_v2, 0.0 }
 0x1b7   :  { %v729_v35 = vpop.xlane.xlu1 %728  ;;  %813 = vadd.xlane.f32.xlu1 %v812_v32  ;;  %816 = vadd.xlane.f32.xlu0 %v815_v34  ;;  %v732_v37 = vpop.xlane.xlu0 %731  ;;  %v2548_v34 = vld [vmem:[%s2956_s5] ss:$0 sm:$0xff] }
 0x1b8   :  { %v750_v38 = vmul.f32 0.03125, %v729_v35  ;;  %v751_v40 = vmul.f32 0.03125, %v732_v37  ;;  %v780_v43 = vmul.f32 %v2514_v31, %v2514_v31  ;;  %v781_v7 = vmul.f32 %v2517_v5, %v2517_v5 }
 0x1ba   :  { %v2526_v44 = vsub.f32 %v2435_v23, %v750_v38  ;;  %v2529_v15 = vsub.f32 %v2438_v24, %v751_v40  ;;  %v818_v45 = vsel %vm687_vm3, %v780_v43, 0.0  ;;  %v821_v20 = vsel %vm687_vm3, %v781_v7, 0.0  ;;  %v2554_v40 = vld [vmem:[%s2957_s6] ss:$0 sm:$0xff] }
 0x1bb   :  { %v735_v46 = vpop.xlane.xlu1 %734  ;;  %819 = vadd.xlane.f32.xlu1 %v818_v45  ;;  %822 = vadd.xlane.f32.xlu0 %v821_v20 }
 0x1bc   :  { %v752_v47 = vmul.f32 0.03125, %v735_v46  ;;  %v782_v48 = vmul.f32 %v2526_v44, %v2526_v44  ;;  %v783_v26 = vmul.f32 %v2529_v15, %v2529_v15 }
 0x1be   :  { %v2538_v23 = vsub.f32 %v2445_v28, %v752_v47  ;;  %v824_v24 = vsel %vm687_vm3, %v782_v48, 0.0  ;;  %v827_v51 = vsel %vm687_vm3, %v783_v26, 0.0  ;;  %v1021_v28 = vld [vmem:[#allocation11] sm:$0xff] }
 0x1bf   :  { %825 = vadd.xlane.f32.xlu1 %v824_v24  ;;  %828 = vadd.xlane.f32.xlu0 %v827_v51 }
 0x1c0   :  { %v784_v52 = vmul.f32 %v2538_v23, %v2538_v23  ;;  %1890 = vmatprep.subr.mxu0 %v1021_v28 }
 0x1c1   :  { %1891 = vmatpush3.msra.mxu0 %v1021_v28 }
 0x1c2   :  { %v830_v53 = vsel %vm687_vm3, %v784_v52, 0.0 }
 0x1c3   :  { %831 = vadd.xlane.f32.xlu1 %v830_v53 }
 0x22c   :  { %v787_v36 = vpop.xlane.xlu0 %786 }
 0x22d   :  { %v833_v60 = vmul.f32 0.03125, %v787_v36 }
 0x22f   :  { %v849_v61 = vadd.f32 1e-05, %v833_v60 }
 0x230   :  { %v790_v62 = vpop.xlane.xlu1 %789  ;;  %v793_v63 = vpop.xlane.xlu0 %792 }
 0x231   :  { %1963 = vrsqrt.f32 %v849_v61  ;;  %v834_v0 = vmul.f32 0.03125, %v790_v62  ;;  %v835_v1 = vmul.f32 0.03125, %v793_v63 }
 0x233   :  { %v850_v3 = vadd.f32 1e-05, %v834_v0  ;;  %v851_v41 = vadd.f32 1e-05, %v835_v1 }
 0x234   :  { %v796_v6 = vpop.xlane.xlu1 %795  ;;  %v799_v9 = vpop.xlane.xlu0 %798 }
 0x235   :  { %1965 = vrsqrt.f32 %v850_v3  ;;  %v836_v10 = vmul.f32 0.03125, %v796_v6  ;;  %v837_v11 = vmul.f32 0.03125, %v799_v9 }
 0x236   :  { %1967 = vrsqrt.f32 %v851_v41 }
 0x237   :  { %v852_v12 = vadd.f32 1e-05, %v836_v10  ;;  %v853_v13 = vadd.f32 1e-05, %v837_v11 }
 0x238   :  { %v802_v14 = vpop.xlane.xlu1 %801  ;;  %v805_v56 = vpop.xlane.xlu0 %804 }
 0x239   :  { %1969 = vrsqrt.f32 %v852_v12  ;;  %v838_v17 = vmul.f32 0.03125, %v802_v14  ;;  %v839_v19 = vmul.f32 0.03125, %v805_v56 }
 0x23a   :  { %1971 = vrsqrt.f32 %v853_v13 }
 0x23b   :  { %v854_v21 = vadd.f32 1e-05, %v838_v17  ;;  %v855_v22 = vadd.f32 1e-05, %v839_v19 }
 0x23c   :  { %v808_v25 = vpop.xlane.xlu1 %807  ;;  %v811_v27 = vpop.xlane.xlu0 %810 }
 0x23d   :  { %1973 = vrsqrt.f32 %v854_v21  ;;  %v840_v30 = vmul.f32 0.03125, %v808_v25  ;;  %v841_v2 = vmul.f32 0.03125, %v811_v27 }
 0x23e   :  { %v1964_v32 = vpop.eup %1963  ;;  %1975 = vrsqrt.f32 %v855_v22 }
 0x23f   :  { %v856_v35 = vadd.f32 1e-05, %v840_v30  ;;  %v857_v37 = vadd.f32 1e-05, %v841_v2  ;;  %v881_v38 = vmul.f32 %v1964_v32, %v2450_v33 }
 0x240   :  { %v814_v43 = vpop.xlane.xlu1 %813  ;;  %v817_v7 = vpop.xlane.xlu0 %816 }
 0x241   :  { %1977 = vrsqrt.f32 %v856_v35  ;;  %v842_v45 = vmul.f32 0.03125, %v814_v43  ;;  %v843_v20 = vmul.f32 0.03125, %v817_v7  ;;  %v903_v46 = vmul.f32 %v2548_v34, %v881_v38 }
 0x242   :  { %v1966_v47 = vpop.eup %1965  ;;  %1979 = vrsqrt.f32 %v857_v37 }
 0x243   :  { %v1968_v48 = vpop.eup %1967  ;;  %v882_v26 = vmul.f32 %v1966_v47, %v2458_v42  ;;  %v858_v24 = vadd.f32 1e-05, %v842_v45  ;;  %v859_v51 = vadd.f32 1e-05, %v843_v20  ;;  %v2559_v33 = vadd.f32 %v2554_v40, %v903_v46 }
 0x244   :  { %v820_v52 = vpop.xlane.xlu1 %819  ;;  %v823_v53 = vpop.xlane.xlu0 %822  ;;  %v883_v54 = vmul.f32 %v1968_v48, %v2455_v18 }
 0x245   :  { %v904_v55 = vmul.f32 %v2548_v34, %v882_v26  ;;  %1981 = vrsqrt.f32 %v858_v24  ;;  %v844_v57 = vmul.f32 0.03125, %v820_v52  ;;  %v845_v28 = vmul.f32 0.03125, %v823_v53 }
 0x246   :  { %v1970_v36 = vpop.eup %1969  ;;  %1983 = vrsqrt.f32 %v859_v51  ;;  %v957_v60 = vmul.f32 0.70710677, %v2559_v33  ;;  %v905_v42 = vmul.f32 %v2548_v34, %v883_v54 }
 0x247   :  { %v1972_v61 = vpop.eup %1971  ;;  %v2566_v62 = vadd.f32 %v2554_v40, %v904_v55  ;;  %v860_v63 = vadd.f32 1e-05, %v844_v57  ;;  %v861_v0 = vadd.f32 1e-05, %v845_v28  ;;  %v884_v1 = vmul.f32 %v1970_v36, %v2466_v50 }
 0x248   :  { %v826_v18 = vpop.xlane.xlu1 %825  ;;  %v829_v3 = vpop.xlane.xlu0 %828  ;;  %1985 = verf.f32 %v957_v60  ;;  %v2570_v41 = vadd.f32 %v2554_v40, %v905_v42  ;;  %v885_v6 = vmul.f32 %v1972_v61, %v2469_v29  ;;  %v941_v28 = vmul.f32 0.5, %v2559_v33 }
 0x249   :  { %v958_v9 = vmul.f32 0.70710677, %v2566_v62  ;;  %1987 = vrsqrt.f32 %v860_v63  ;;  %v846_v10 = vmul.f32 0.03125, %v826_v18  ;;  %v847_v11 = vmul.f32 0.03125, %v829_v3 }
 0x24a   :  { %v1974_v12 = vpop.eup %1973  ;;  %1989 = vrsqrt.f32 %v861_v0  ;;  %v959_v13 = vmul.f32 0.70710677, %v2570_v41  ;;  %v906_v17 = vmul.f32 %v2548_v34, %v884_v1  ;;  %v907_v21 = vmul.f32 %v2548_v34, %v885_v6 }
 0x24b   :  { %v1976_v14 = vpop.eup %1975  ;;  %1991 = verf.f32 %v958_v9  ;;  %v862_v50 = vadd.f32 1e-05, %v846_v10  ;;  %v863_v56 = vadd.f32 1e-05, %v847_v11  ;;  %v886_v29 = vmul.f32 %v1974_v12, %v2478_v58 }
 0x24c   :  { %v832_v19 = vpop.xlane.xlu1 %831  ;;  %1993 = verf.f32 %v959_v13  ;;  %v887_v22 = vmul.f32 %v1976_v14, %v2481_v39  ;;  %v2580_v27 = vadd.f32 %v2554_v40, %v906_v17  ;;  %v2583_v2 = vadd.f32 %v2554_v40, %v907_v21 }
 0x24d   :  { %1995 = vrsqrt.f32 %v862_v50  ;;  %v848_v25 = vmul.f32 0.03125, %v832_v19  ;;  %v908_v32 = vmul.f32 %v2548_v34, %v886_v29  ;;  %v942_v6 = vmul.f32 0.5, %v2566_v62 }
 0x24e   :  { %v1978_v30 = vpop.eup %1977  ;;  %1997 = vrsqrt.f32 %v863_v56  ;;  %v909_v35 = vmul.f32 %v2548_v34, %v887_v22  ;;  %v960_v58 = vmul.f32 0.70710677, %v2580_v27  ;;  %v961_v43 = vmul.f32 0.70710677, %v2583_v2 }
 0x24f   :  { %v1980_v37 = vpop.eup %1979  ;;  %v864_v38 = vadd.f32 1e-05, %v848_v25  ;;  %v888_v39 = vmul.f32 %v1978_v30, %v2490_v4  ;;  %v2591_v7 = vadd.f32 %v2554_v40, %v908_v32 }
 0x250   :  { %v2594_v45 = vadd.f32 %v2554_v40, %v909_v35  ;;  %v889_v46 = vmul.f32 %v1980_v37, %v2493_v49  ;;  %v944_v37 = vmul.f32 0.5, %v2580_v27 }
 0x251   :  { %1999 = vrsqrt.f32 %v864_v38  ;;  %v910_v20 = vmul.f32 %v2548_v34, %v888_v39  ;;  %v962_v48 = vmul.f32 0.70710677, %v2591_v7 }
 0x252   :  { %v1982_v47 = vpop.eup %1981  ;;  %2001 = verf.f32 %v960_v58  ;;  %v963_v4 = vmul.f32 0.70710677, %v2594_v45  ;;  %v911_v51 = vmul.f32 %v2548_v34, %v889_v46  ;;  %v947_v27 = vmul.f32 0.5, %v2594_v45 }
 0x253   :  { %v1984_v26 = vpop.eup %1983  ;;  %2003 = verf.f32 %v961_v43  ;;  %v2601_v24 = vadd.f32 %v2554_v40, %v910_v20  ;;  %v890_v52 = vmul.f32 %v1982_v47, %v2502_v16  ;;  %v945_v20 = vmul.f32 0.5, %v2583_v2 }
 0x254   :  { %2005 = verf.f32 %v962_v48  ;;  %v891_v53 = vmul.f32 %v1984_v26, %v2505_v59  ;;  %v2608_v55 = vadd.f32 %v2554_v40, %v911_v51 }
 0x255   :  { %v1986_v54 = vpop.eup %1985  ;;  %2007 = verf.f32 %v963_v4  ;;  %v964_v49 = vmul.f32 0.70710677, %v2601_v24  ;;  %v912_v60 = vmul.f32 %v2548_v34, %v890_v52  ;;  %v946_v4 = vmul.f32 0.5, %v2591_v7 }
 0x256   :  { %v1988_v57 = vpop.eup %1987  ;;  %v989_v36 = vadd.f32 1.0, %v1986_v54  ;;  %v913_v42 = vmul.f32 %v2548_v34, %v891_v53  ;;  %v965_v16 = vmul.f32 0.70710677, %v2608_v55  ;;  %v949_v45 = vmul.f32 0.5, %v2608_v55 }
 0x257   :  { %v1990_v61 = vpop.eup %1989  ;;  %2009 = verf.f32 %v964_v49  ;;  %v892_v59 = vmul.f32 %v1988_v57, %v2514_v31  ;;  %v2616_v1 = vadd.f32 %v2554_v40, %v912_v60  ;;  %v943_v31 = vmul.f32 0.5, %v2570_v41 }
 0x258   :  { %v1992_v63 = vpop.eup %1991  ;;  %v1005_v0 = vmul.f32 %v989_v36, %v941_v28  ;;  %v2619_v18 = vadd.f32 %v2554_v40, %v913_v42  ;;  %v893_v33 = vmul.f32 %v1990_v61, %v2517_v5  ;;  %2011 = verf.f32 %v965_v16 }
 0x259   :  { %v1994_v3 = vpop.eup %1993  ;;  %v990_v9 = vadd.f32 1.0, %v1992_v63  ;;  %v914_v10 = vmul.f32 %v2548_v34, %v892_v59  ;;  %v966_v13 = vmul.f32 0.70710677, %v2616_v1  ;;  %v948_v36 = vmul.f32 0.5, %v2601_v24 }
 0x25a   :  { %v1996_v11 = vpop.eup %1995  ;;  %1892 = vmatprep.mubr.msk.f32.mxu0 %vm687_vm3, %v1005_v0  ;;  %v991_v12 = vadd.f32 1.0, %v1994_v3  ;;  %v967_v56 = vmul.f32 0.70710677, %v2619_v18  ;;  %v915_v62 = vmul.f32 %v2548_v34, %v893_v33  ;;  %v950_v63 = vmul.f32 0.5, %v2616_v1 }
 0x25b   :  { %v1998_v14 = vpop.eup %1997  ;;  %v1006_v50 = vmul.f32 %v990_v9, %v942_v6  ;;  %v2629_v5 = vadd.f32 %v2554_v40, %v914_v10  ;;  %2013 = verf.f32 %v966_v13  ;;  %v894_v19 = vmul.f32 %v1996_v11, %v2526_v44 }
 0x25c   :  { %v1007_v17 = vmul.f32 %v991_v12, %v943_v31  ;;  %v895_v21 = vmul.f32 %v1998_v14, %v2529_v15  ;;  %2015 = verf.f32 %v967_v56  ;;  %v937_v29 = vadd.f32 %v2554_v40, %v915_v62 }
 0x25d   :  { %1893 = vmatmul.mubr.msk.f32.vlgmr.msra.gmra.mxu0 %vm687_vm3, %v1006_v50  ;;  %v968_v41 = vmul.f32 0.70710677, %v2629_v5  ;;  %v916_v25 = vmul.f32 %v2548_v34, %v894_v19  ;;  %v951_v33 = vmul.f32 0.5, %v2619_v18  ;;  %v952_v11 = vmul.f32 0.5, %v2629_v5 }
 0x25e   :  { %v2000_v22 = vpop.eup %1999  ;;  %1895 = vmatprep.mubr.msk.f32.mxu0 %vm687_vm3, %v1007_v17  ;;  %v917_v30 = vmul.f32 %v2548_v34, %v895_v21  ;;  %v969_v35 = vmul.f32 0.70710677, %v937_v29  ;;  %v953_v31 = vmul.f32 0.5, %v937_v29 }
 0x25f   :  { %v2002_v32 = vpop.eup %2001  ;;  %2017 = verf.f32 %v968_v41  ;;  %v896_v44 = vmul.f32 %v2000_v22, %v2538_v23  ;;  %v938_v58 = vadd.f32 %v2554_v40, %v916_v25 }
 0x260   :  { %v2004_v15 = vpop.eup %2003  ;;  %v992_v38 = vadd.f32 1.0, %v2002_v32  ;;  %v939_v39 = vadd.f32 %v2554_v40, %v917_v30  ;;  %2019 = verf.f32 %v969_v35 }
 0x261   :  { %v2006_v43 = vpop.eup %2005  ;;  %v993_v46 = vadd.f32 1.0, %v2004_v15  ;;  %v918_v47 = vmul.f32 %v2548_v34, %v896_v44  ;;  %v970_v51 = vmul.f32 0.70710677, %v938_v58  ;;  %v954_v50 = vmul.f32 0.5, %v938_v58 }
 0x262   :  { %v2008_v48 = vpop.eup %2007  ;;  %v1008_v26 = vmul.f32 %v992_v38, %v944_v37  ;;  %v994_v23 = vadd.f32 1.0, %v2006_v43  ;;  %v971_v54 = vmul.f32 0.70710677, %v939_v39  ;;  %v955_v62 = vmul.f32 0.5, %v939_v39 }
 0x263   :  { %v1009_v52 = vmul.f32 %v993_v46, %v945_v20  ;;  %v995_v53 = vadd.f32 1.0, %v2008_v48  ;;  %2021 = verf.f32 %v970_v51  ;;  %v940_v2 = vadd.f32 %v2554_v40, %v918_v47  ;;  %v1716_v48 = vld [vmem:[%s2959_s8] ss:$0 sm:$0xff] }
 0x264   :  { %v2010_v49 = vpop.eup %2009  ;;  %1896 = vmatmul.mubr.msk.f32.gmra.mxu0 %vm687_vm3, %v1008_v26  ;;  %v1010_v57 = vmul.f32 %v994_v23, %v946_v4  ;;  %2023 = verf.f32 %v971_v54 }
 0x265   :  { %1898 = vmatprep.mubr.msk.f32.mxu0 %vm687_vm3, %v1009_v52  ;;  %v1011_v34 = vmul.f32 %v995_v53, %v947_v27  ;;  %v996_v28 = vadd.f32 1.0, %v2010_v49  ;;  %v2012_v7 = vpop.eup %2011  ;;  %v972_v60 = vmul.f32 0.70710677, %v940_v2  ;;  %v956_v41 = vmul.f32 0.5, %v940_v2 }
 0x266   :  { %v997_v42 = vadd.f32 1.0, %v2012_v7 }
 0x267   :  { %v1012_v61 = vmul.f32 %v996_v28, %v948_v36  ;;  %2025 = verf.f32 %v972_v60 }
 0x268   :  { %1899 = vmatmul.mubr.msk.f32.gmra.mxu0 %vm687_vm3, %v1010_v57  ;;  %v2014_v16 = vpop.eup %2013  ;;  %v1013_v40 = vmul.f32 %v997_v42, %v949_v45 }
 0x269   :  { %1901 = vmatprep.mubr.msk.f32.mxu0 %vm687_vm3, %v1011_v34  ;;  %v2016_v59 = vpop.eup %2015  ;;  %v998_v0 = vadd.f32 1.0, %v2014_v16 }
 0x26a   :  { %v999_v3 = vadd.f32 1.0, %v2016_v59 }
 0x26b   :  { %v1014_v55 = vmul.f32 %v998_v0, %v950_v63 }
 0x26c   :  { %v2018_v24 = vpop.eup %2017  ;;  %1902 = vmatmul.mubr.msk.f32.gmra.mxu0 %vm687_vm3, %v1012_v61  ;;  %v1015_v6 = vmul.f32 %v999_v3, %v951_v33 }
 0x26d   :  { %1904 = vmatprep.mubr.msk.f32.mxu0 %vm687_vm3, %v1013_v40  ;;  %v1000_v9 = vadd.f32 1.0, %v2018_v24  ;;  %v2020_v10 = vpop.eup %2019 }
 0x26e   :  { %v1001_v12 = vadd.f32 1.0, %v2020_v10 }
 0x26f   :  { %v1016_v1 = vmul.f32 %v1000_v9, %v952_v11 }
 0x270   :  { %1905 = vmatmul.mubr.msk.f32.gmra.mxu0 %vm687_vm3, %v1014_v55  ;;  %v2022_v13 = vpop.eup %2021  ;;  %v1017_v18 = vmul.f32 %v1001_v12, %v953_v31 }
 0x271   :  { %1907 = vmatprep.mubr.msk.f32.mxu0 %vm687_vm3, %v1015_v6  ;;  %v2024_v14 = vpop.eup %2023  ;;  %v1002_v56 = vadd.f32 1.0, %v2022_v13 }
 0x272   :  { %v1003_v17 = vadd.f32 1.0, %v2024_v14 }
 0x273   :  { %v1018_v19 = vmul.f32 %v1002_v56, %v954_v50 }
 0x274   :  { %1908 = vmatmul.mubr.msk.f32.gmra.mxu0 %vm687_vm3, %v1016_v1  ;;  %v2026_v21 = vpop.eup %2025  ;;  %v1019_v5 = vmul.f32 %v1003_v17, %v955_v62 }
 0x275   :  { %1910 = vmatprep.mubr.msk.f32.mxu0 %vm687_vm3, %v1017_v18  ;;  %v1004_v29 = vadd.f32 1.0, %v2026_v21 }
 0x277   :  { %v1020_v22 = vmul.f32 %v1004_v29, %v956_v41 }
 0x278   :  { %1911 = vmatmul.mubr.msk.f32.gmra.mxu0 %vm687_vm3, %v1018_v19 }
 0x279   :  { %1913 = vmatprep.mubr.msk.f32.mxu0 %vm687_vm3, %v1019_v5 }
 0x27c   :  { %1914 = vmatmul.mubr.msk.f32.gmra.mxu0 %vm687_vm3, %v1020_v22 }
 0x31d   :  { %v1894_v25 = vpop.f32.mrf.mxu0 }
 0x31e   :  { %v2707_v6 = vadd.f32 %v1894_v25, %v1716_v48 }
 0x31f   :  { %v1146_v30 = vpop.f32.mrf.mxu0 }
 0x320   :  { %v2711_v10 = vadd.f32 %v1716_v48, %v1146_v30  ;;  %v1230_v31 = vsel %vm687_vm3, %v2707_v6, 0.0 }
 0x322   :  { %v1227_v12 = vsel %vm687_vm3, %v2711_v10, 0.0 }
 0x324   :  { %v1897_v32 = vpop.f32.mrf.mxu0 }
 0x325   :  { %v2699_v33 = vadd.f32 %v1897_v32, %v1716_v48 }
 0x326   :  { %v1156_v35 = vpop.f32.mrf.mxu0 }
 0x327   :  { %v2703_v24 = vadd.f32 %v1716_v48, %v1156_v35  ;;  %v1236_v9 = vsel %vm687_vm3, %v2699_v33, 0.0 }
 0x328   :  { %v1900_v44 = vpop.f32.mrf.mxu0 }
 0x329   :  { %v2691_v40 = vadd.f32 %v1900_v44, %v1716_v48  ;;  %v1233_v11 = vsel %vm687_vm3, %v2703_v24, 0.0 }
 0x32a   :  { %v1166_v15 = vpop.f32.mrf.mxu0 }
 0x32b   :  { %v2695_v63 = vadd.f32 %v1716_v48, %v1166_v15  ;;  %v1242_v3 = vsel %vm687_vm3, %v2691_v40, 0.0 }
 0x32c   :  { %v1903_v37 = vpop.f32.mrf.mxu0 }
 0x32d   :  { %v2683_v45 = vadd.f32 %v1903_v37, %v1716_v48  ;;  %v1239_v55 = vsel %vm687_vm3, %v2695_v63, 0.0 }
 0x32e   :  { %v1176_v38 = vpop.f32.mrf.mxu0 }
 0x32f   :  { %v2687_v61 = vadd.f32 %v1716_v48, %v1176_v38  ;;  %v1248_v59 = vsel %vm687_vm3, %v2683_v45, 0.0 }
 0x330   :  { %v1906_v58 = vpop.f32.mrf.mxu0 }
 0x331   :  { %v2676_v28 = vadd.f32 %v1906_v58, %v1716_v48  ;;  %v1245_v0 = vsel %vm687_vm3, %v2687_v61, 0.0 }
 0x332   :  { %v1186_v39 = vpop.f32.mrf.mxu0 }
 0x333   :  { %v2679_v36 = vadd.f32 %v1716_v48, %v1186_v39  ;;  %v1254_v42 = vsel %vm687_vm3, %v2676_v28, 0.0 }
 0x334   :  { %v1909_v43 = vpop.f32.mrf.mxu0 }
 0x335   :  { %v1202_v49 = vadd.f32 %v1909_v43, %v1716_v48  ;;  %v1251_v16 = vsel %vm687_vm3, %v2679_v36, 0.0 }
 0x336   :  { %v1196_v20 = vpop.f32.mrf.mxu0 }
 0x337   :  { %v2673_v2 = vadd.f32 %v1716_v48, %v1196_v20  ;;  %v1260_v7 = vsel %vm687_vm3, %v1202_v49, 0.0 }
 0x338   :  { %v1912_v46 = vpop.f32.mrf.mxu0 }
 0x339   :  { %v1212_v51 = vadd.f32 %v1912_v46, %v1716_v48  ;;  %v1257_v60 = vsel %vm687_vm3, %v2673_v2, 0.0 }
 0x33a   :  { %v1206_v47 = vpop.f32.mrf.mxu0 }
 0x33b   :  { %v1207_v53 = vadd.f32 %v1716_v48, %v1206_v47  ;;  %v1266_v57 = vsel %vm687_vm3, %v1212_v51, 0.0 }
 0x33c   :  { %v1915_v26 = vpop.f32.mrf.mxu0 }
 0x33d   :  { %v1222_v4 = vadd.f32 %v1915_v26, %v1716_v48  ;;  %v1263_v34 = vsel %vm687_vm3, %v1207_v53, 0.0 }
 0x33e   :  { %v1216_v23 = vpop.f32.mrf.mxu0 }
 0x33f   :  { %v1217_v52 = vadd.f32 %v1716_v48, %v1216_v23  ;;  %v1272_v27 = vsel %vm687_vm3, %v1222_v4, 0.0 }
 0x340   :  { %1273 = vadd.xlane.f32.xlu0 %v1272_v27 }
 0x341   :  { %v1269_v54 = vsel %vm687_vm3, %v1217_v52, 0.0 }
 0x342   :  { %1270 = vadd.xlane.f32.xlu1 %v1269_v54 }
 0x344   :  { %1267 = vadd.xlane.f32.xlu0 %v1266_v57 }
 0x346   :  { %1264 = vadd.xlane.f32.xlu1 %v1263_v34 }
 0x348   :  { %1261 = vadd.xlane.f32.xlu0 %v1260_v7 }
 0x34a   :  { %1258 = vadd.xlane.f32.xlu1 %v1257_v60 }
 0x34c   :  { %1255 = vadd.xlane.f32.xlu0 %v1254_v42 }
 0x34e   :  { %1252 = vadd.xlane.f32.xlu1 %v1251_v16 }
 0x350   :  { %1249 = vadd.xlane.f32.xlu0 %v1248_v59 }
 0x352   :  { %1246 = vadd.xlane.f32.xlu1 %v1245_v0 }
 0x354   :  { %1243 = vadd.xlane.f32.xlu0 %v1242_v3 }
 0x356   :  { %1240 = vadd.xlane.f32.xlu1 %v1239_v55 }
 0x358   :  { %1237 = vadd.xlane.f32.xlu0 %v1236_v9 }
 0x35a   :  { %1234 = vadd.xlane.f32.xlu1 %v1233_v11 }
 0x35c   :  { %1231 = vadd.xlane.f32.xlu0 %v1230_v31 }
 0x35e   :  { %1228 = vadd.xlane.f32.xlu1 %v1227_v12 }
 0x3c9   :  { %v1274_v1 = vpop.xlane.xlu0 %1273 }
 0x3ca   :  { %v1290_v13 = vmul.f32 0.03125, %v1274_v1 }
 0x3cb   :  { %v1271_v18 = vpop.xlane.xlu1 %1270 }
 0x3cc   :  { %v2719_v14 = vsub.f32 %v1222_v4, %v1290_v13  ;;  %v1289_v50 = vmul.f32 0.03125, %v1271_v18 }
 0x3cd   :  { %v1268_v56 = vpop.xlane.xlu0 %1267 }
 0x3ce   :  { %v2721_v62 = vsub.f32 %v1217_v52, %v1289_v50  ;;  %v1288_v17 = vmul.f32 0.03125, %v1268_v56  ;;  %v1322_v19 = vmul.f32 %v2719_v14, %v2719_v14 }
 0x3cf   :  { %v1265_v21 = vpop.xlane.xlu1 %1264 }
 0x3d0   :  { %v2725_v5 = vsub.f32 %v1212_v51, %v1288_v17  ;;  %v1287_v41 = vmul.f32 0.03125, %v1265_v21  ;;  %v1368_v29 = vsel %vm687_vm3, %v1322_v19, 0.0  ;;  %v1321_v22 = vmul.f32 %v2721_v62, %v2721_v62 }
 0x3d1   :  { %1369 = vadd.xlane.f32.xlu0 %v1368_v29  ;;  %v1262_v25 = vpop.xlane.xlu0 %1261 }
 0x3d2   :  { %v2730_v30 = vsub.f32 %v1207_v53, %v1287_v41  ;;  %v1286_v32 = vmul.f32 0.03125, %v1262_v25  ;;  %v1365_v35 = vsel %vm687_vm3, %v1321_v22, 0.0  ;;  %v1320_v44 = vmul.f32 %v2725_v5, %v2725_v5 }
 0x3d3   :  { %1366 = vadd.xlane.f32.xlu1 %v1365_v35  ;;  %v1259_v15 = vpop.xlane.xlu1 %1258 }
 0x3d4   :  { %v2735_v37 = vsub.f32 %v1202_v49, %v1286_v32  ;;  %v1285_v38 = vmul.f32 0.03125, %v1259_v15  ;;  %v1362_v58 = vsel %vm687_vm3, %v1320_v44, 0.0  ;;  %v1319_v39 = vmul.f32 %v2730_v30, %v2730_v30 }
 0x3d5   :  { %1363 = vadd.xlane.f32.xlu0 %v1362_v58  ;;  %v1256_v43 = vpop.xlane.xlu0 %1255 }
 0x3d6   :  { %v2741_v20 = vsub.f32 %v2673_v2, %v1285_v38  ;;  %v1284_v46 = vmul.f32 0.03125, %v1256_v43  ;;  %v1359_v47 = vsel %vm687_vm3, %v1319_v39, 0.0  ;;  %v1318_v48 = vmul.f32 %v2735_v37, %v2735_v37 }
 0x3d7   :  { %1360 = vadd.xlane.f32.xlu1 %v1359_v47  ;;  %v1253_v26 = vpop.xlane.xlu1 %1252  ;;  %v2228_v39 = vmov 0  }
 0x3d8   :  { %v2747_v4 = vsub.f32 %v2676_v28, %v1284_v46  ;;  %v1283_v23 = vmul.f32 0.03125, %v1253_v26  ;;  %v1356_v51 = vsel %vm687_vm3, %v1318_v48, 0.0  ;;  %v1317_v52 = vmul.f32 %v2741_v20, %v2741_v20  ;;  %1962 = vset.pattern.permute.xlu0 %v2228_v39 }
 0x3d9   :  { %1357 = vadd.xlane.f32.xlu0 %v1356_v51  ;;  %v1250_v27 = vpop.xlane.xlu0 %1249 }
 0x3da   :  { %v2753_v53 = vsub.f32 %v2679_v36, %v1283_v23  ;;  %v1282_v54 = vmul.f32 0.03125, %v1250_v27  ;;  %v1353_v49 = vsel %vm687_vm3, %v1317_v52, 0.0  ;;  %v1316_v57 = vmul.f32 %v2747_v4, %v2747_v4 }
 0x3db   :  { %1354 = vadd.xlane.f32.xlu1 %v1353_v49  ;;  %v1247_v2 = vpop.xlane.xlu1 %1246 }
 0x3dc   :  { %v2759_v34 = vsub.f32 %v2683_v45, %v1282_v54  ;;  %v1281_v28 = vmul.f32 0.03125, %v1247_v2  ;;  %v1350_v7 = vsel %vm687_vm3, %v1316_v57, 0.0  ;;  %v1315_v60 = vmul.f32 %v2753_v53, %v2753_v53 }
 0x3dd   :  { %1351 = vadd.xlane.f32.xlu0 %v1350_v7  ;;  %v1244_v36 = vpop.xlane.xlu0 %1243 }
 0x3de   :  { %v2765_v42 = vsub.f32 %v2687_v61, %v1281_v28  ;;  %v1280_v16 = vmul.f32 0.03125, %v1244_v36  ;;  %v1347_v59 = vsel %vm687_vm3, %v1315_v60, 0.0  ;;  %v1314_v0 = vmul.f32 %v2759_v34, %v2759_v34 }
 0x3df   :  { %1348 = vadd.xlane.f32.xlu1 %v1347_v59  ;;  %v1241_v45 = vpop.xlane.xlu1 %1240 }
 0x3e0   :  { %v2771_v3 = vsub.f32 %v2691_v40, %v1280_v16  ;;  %v1279_v55 = vmul.f32 0.03125, %v1241_v45  ;;  %v1344_v9 = vsel %vm687_vm3, %v1314_v0, 0.0  ;;  %v1313_v11 = vmul.f32 %v2765_v42, %v2765_v42 }
 0x3e1   :  { %1345 = vadd.xlane.f32.xlu0 %v1344_v9  ;;  %v1238_v61 = vpop.xlane.xlu0 %1237 }
 0x3e2   :  { %v2777_v31 = vsub.f32 %v2695_v63, %v1279_v55  ;;  %v1278_v12 = vmul.f32 0.03125, %v1238_v61  ;;  %v1341_v1 = vsel %vm687_vm3, %v1313_v11, 0.0  ;;  %v1312_v13 = vmul.f32 %v2771_v3, %v2771_v3 }
 0x3e3   :  { %1342 = vadd.xlane.f32.xlu1 %v1341_v1  ;;  %v1235_v40 = vpop.xlane.xlu1 %1234 }
 0x3e4   :  { %v2783_v18 = vsub.f32 %v2699_v33, %v1278_v12  ;;  %v1277_v50 = vmul.f32 0.03125, %v1235_v40  ;;  %v1338_v56 = vsel %vm687_vm3, %v1312_v13, 0.0  ;;  %v1311_v17 = vmul.f32 %v2777_v31, %v2777_v31  ;;  %v2814_v13 = vld [vmem:[%s2960_s9] ss:$0 sm:$0xff] }
 0x3e5   :  { %1339 = vadd.xlane.f32.xlu0 %v1338_v56  ;;  %v1232_v63 = vpop.xlane.xlu0 %1231 }
 0x3e6   :  { %v2789_v19 = vsub.f32 %v2703_v24, %v1277_v50  ;;  %v1276_v21 = vmul.f32 0.03125, %v1232_v63  ;;  %v1335_v41 = vsel %vm687_vm3, %v1311_v17, 0.0  ;;  %v1310_v29 = vmul.f32 %v2783_v18, %v2783_v18 }
 0x3e7   :  { %1336 = vadd.xlane.f32.xlu1 %v1335_v41  ;;  %v1229_v33 = vpop.xlane.xlu1 %1228 }
 0x3e8   :  { %v2795_v22 = vsub.f32 %v2707_v6, %v1276_v21  ;;  %v1275_v25 = vmul.f32 0.03125, %v1229_v33  ;;  %v1332_v32 = vsel %vm687_vm3, %v1310_v29, 0.0  ;;  %v1309_v35 = vmul.f32 %v2789_v19, %v2789_v19  ;;  %v2822_v33 = vld [vmem:[%s2961_s10] ss:$0 sm:$0xff] }
 0x3e9   :  { %1333 = vadd.xlane.f32.xlu0 %v1332_v32 }
 0x3ea   :  { %v2801_v24 = vsub.f32 %v2711_v10, %v1275_v25  ;;  %v1329_v44 = vsel %vm687_vm3, %v1309_v35, 0.0  ;;  %v1308_v15 = vmul.f32 %v2795_v22, %v2795_v22  ;;  %v1560_v10 = vld [vmem:[#allocation2] sm:$0x1] }
 0x3eb   :  { %1330 = vadd.xlane.f32.xlu1 %v1329_v44 }
 0x3ec   :  { %v1326_v38 = vsel %vm687_vm3, %v1308_v15, 0.0  ;;  %v1307_v6 = vmul.f32 %v2801_v24, %v2801_v24 }
 0x3ed   :  { %1327 = vadd.xlane.f32.xlu0 %v1326_v38 }
 0x3ee   :  { %v1323_v58 = vsel %vm687_vm3, %v1307_v6, 0.0 }
 0x3ef   :  { %1324 = vadd.xlane.f32.xlu1 %v1323_v58 }
 0x403   :  { %1563 = vperm.xlu0 %1962, %v1560_v10  }
 0x45a   :  { %v1370_v43 = vpop.xlane.xlu0 %1369 }
 0x45b   :  { %v1386_v46 = vmul.f32 0.03125, %v1370_v43 }
 0x45c   :  { %v1367_v47 = vpop.xlane.xlu1 %1366 }
 0x45d   :  { %v1402_v48 = vadd.f32 1e-05, %v1386_v46  ;;  %v1385_v26 = vmul.f32 0.03125, %v1367_v47 }
 0x45e   :  { %v1364_v23 = vpop.xlane.xlu0 %1363 }
 0x45f   :  { %2027 = vrsqrt.f32 %v1402_v48  ;;  %v1401_v51 = vadd.f32 1e-05, %v1385_v26  ;;  %v1384_v52 = vmul.f32 0.03125, %v1364_v23 }
 0x460   :  { %v1361_v27 = vpop.xlane.xlu1 %1360 }
 0x461   :  { %2029 = vrsqrt.f32 %v1401_v51  ;;  %v1400_v54 = vadd.f32 1e-05, %v1384_v52  ;;  %v1383_v49 = vmul.f32 0.03125, %v1361_v27 }
 0x462   :  { %v1358_v57 = vpop.xlane.xlu0 %1357 }
 0x463   :  { %2031 = vrsqrt.f32 %v1400_v54  ;;  %v1399_v2 = vadd.f32 1e-05, %v1383_v49  ;;  %v1382_v28 = vmul.f32 0.03125, %v1358_v57 }
 0x464   :  { %v1355_v7 = vpop.xlane.xlu1 %1354 }
 0x465   :  { %2033 = vrsqrt.f32 %v1399_v2  ;;  %v1398_v60 = vadd.f32 1e-05, %v1382_v28  ;;  %v1381_v36 = vmul.f32 0.03125, %v1355_v7 }
 0x466   :  { %v1352_v16 = vpop.xlane.xlu0 %1351 }
 0x467   :  { %2035 = vrsqrt.f32 %v1398_v60  ;;  %v1397_v59 = vadd.f32 1e-05, %v1381_v36  ;;  %v1380_v0 = vmul.f32 0.03125, %v1352_v16 }
 0x468   :  { %v1349_v45 = vpop.xlane.xlu1 %1348 }
 0x469   :  { %2037 = vrsqrt.f32 %v1397_v59  ;;  %v1396_v55 = vadd.f32 1e-05, %v1380_v0  ;;  %v1379_v9 = vmul.f32 0.03125, %v1349_v45 }
 0x46a   :  { %v1346_v11 = vpop.xlane.xlu0 %1345 }
 0x46b   :  { %2039 = vrsqrt.f32 %v1396_v55  ;;  %v1395_v61 = vadd.f32 1e-05, %v1379_v9  ;;  %v1378_v12 = vmul.f32 0.03125, %v1346_v11 }
 0x46c   :  { %v2028_v1 = vpop.eup %2027  ;;  %v1343_v40 = vpop.xlane.xlu1 %1342 }
 0x46d   :  { %v1434_v50 = vmul.f32 %v2028_v1, %v2719_v14  ;;  %v1394_v56 = vadd.f32 1e-05, %v1378_v12  ;;  %v1377_v17 = vmul.f32 0.03125, %v1343_v40  ;;  %2041 = vrsqrt.f32 %v1395_v61 }
 0x46e   :  { %v2030_v63 = vpop.eup %2029  ;;  %v1340_v21 = vpop.xlane.xlu0 %1339 }
 0x46f   :  { %v1456_v41 = vmul.f32 %v2814_v13, %v1434_v50  ;;  %v1433_v29 = vmul.f32 %v2030_v63, %v2721_v62  ;;  %v1393_v32 = vadd.f32 1e-05, %v1377_v17  ;;  %2043 = vrsqrt.f32 %v1394_v56 }
 0x470   :  { %v2032_v25 = vpop.eup %2031  ;;  %v1376_v44 = vmul.f32 0.03125, %v1340_v21  ;;  %v1337_v38 = vpop.xlane.xlu1 %1336 }
 0x471   :  { %v1455_v35 = vmul.f32 %v2814_v13, %v1433_v29  ;;  %v1432_v14 = vmul.f32 %v2032_v25, %v2725_v5  ;;  %v1478_v6 = vadd.f32 %v2822_v33, %v1456_v41  ;;  %2045 = vrsqrt.f32 %v1393_v32 }
 0x472   :  { %v2034_v15 = vpop.eup %2033  ;;  %v1392_v47 = vadd.f32 1e-05, %v1376_v44  ;;  %v1375_v48 = vmul.f32 0.03125, %v1337_v38  ;;  %v1334_v23 = vpop.xlane.xlu0 %1333 }
 0x473   :  { %v1431_v58 = vmul.f32 %v2034_v15, %v2730_v30  ;;  %v1454_v10 = vmul.f32 %v2814_v13, %v1432_v14  ;;  %v1510_v39 = vmul.f32 0.70710677, %v1478_v6  ;;  %v2830_v43 = vadd.f32 %v2822_v33, %v1455_v35 }
 0x474   :  { %v2036_v62 = vpop.eup %2035  ;;  %v1391_v57 = vadd.f32 1e-05, %v1375_v48  ;;  %v1374_v2 = vmul.f32 0.03125, %v1334_v23  ;;  %v1331_v7 = vpop.xlane.xlu1 %1330  ;;  %v1494_v25 = vmul.f32 0.5, %v1478_v6 }
 0x475   :  { %v1453_v46 = vmul.f32 %v2814_v13, %v1431_v58  ;;  %v1430_v5 = vmul.f32 %v2036_v62, %v2735_v37  ;;  %2047 = verf.f32 %v1510_v39  ;;  %v1509_v51 = vmul.f32 0.70710677, %v2830_v43 }
 0x476   :  { %v2038_v26 = vpop.eup %2037  ;;  %v2838_v54 = vadd.f32 %v2822_v33, %v1454_v10  ;;  %v1390_v0 = vadd.f32 1e-05, %v1374_v2  ;;  %v1328_v45 = vpop.xlane.xlu0 %1327  ;;  %v1493_v6 = vmul.f32 0.5, %v2830_v43 }
 0x477   :  { %v1429_v30 = vmul.f32 %v2038_v26, %v2741_v20  ;;  %v1452_v27 = vmul.f32 %v2814_v13, %v1430_v5  ;;  %2049 = verf.f32 %v1509_v51  ;;  %v2841_v49 = vadd.f32 %v2822_v33, %v1453_v46 }
 0x478   :  { %v2040_v52 = vpop.eup %2039  ;;  %2051 = vrsqrt.f32 %v1392_v47  ;;  %v1508_v20 = vmul.f32 0.70710677, %v2838_v54  ;;  %v1372_v12 = vmul.f32 0.03125, %v1328_v45  ;;  %v1325_v56 = vpop.xlane.xlu1 %1324  ;;  %v1492_v43 = vmul.f32 0.5, %v2838_v54 }
 0x479   :  { %v1428_v37 = vmul.f32 %v2040_v52, %v2747_v4  ;;  %v1451_v28 = vmul.f32 %v2814_v13, %v1429_v30  ;;  %v1507_v36 = vmul.f32 0.70710677, %v2841_v49  ;;  %v2848_v16 = vadd.f32 %v2822_v33, %v1452_v27 }
 0x47a   :  { %v2042_v60 = vpop.eup %2041  ;;  %2053 = verf.f32 %v1508_v20  ;;  %v1373_v4 = vmul.f32 0.03125, %v1331_v7  ;;  %v1388_v41 = vadd.f32 1e-05, %v1372_v12  ;;  %v1371_v29 = vmul.f32 0.03125, %v1325_v56 }
 0x47b   :  { %v1450_v59 = vmul.f32 %v2814_v13, %v1428_v37  ;;  %2055 = vrsqrt.f32 %v1391_v57  ;;  %v1427_v9 = vmul.f32 %v2042_v60, %v2753_v53  ;;  %v1506_v11 = vmul.f32 0.70710677, %v2848_v16 }
 0x47c   :  { %v2044_v55 = vpop.eup %2043  ;;  %2057 = verf.f32 %v1507_v36  ;;  %v2854_v61 = vadd.f32 %v2822_v33, %v1451_v28  ;;  %v1389_v50 = vadd.f32 1e-05, %v1373_v4  ;;  %v1387_v46 = vadd.f32 1e-05, %v1371_v29 }
 0x47d   :  { %v1426_v40 = vmul.f32 %v2044_v55, %v2759_v34  ;;  %2059 = vrsqrt.f32 %v1390_v0  ;;  %v2858_v17 = vadd.f32 %v2822_v33, %v1450_v59  ;;  %v1449_v63 = vmul.f32 %v2814_v13, %v1427_v9 }
 0x47e   :  { %v2046_v1 = vpop.eup %2045  ;;  %2061 = verf.f32 %v1506_v11  ;;  %v1505_v53 = vmul.f32 0.70710677, %v2854_v61  ;;  %v1491_v54 = vmul.f32 0.5, %v2841_v49  ;;  %v1490_v49 = vmul.f32 0.5, %v2848_v16 }
 0x47f   :  { %v1448_v14 = vmul.f32 %v2814_v13, %v1426_v40  ;;  %v1425_v34 = vmul.f32 %v2046_v1, %v2765_v42  ;;  %2063 = vrsqrt.f32 %v1389_v50  ;;  %v1504_v44 = vmul.f32 0.70710677, %v2858_v17 }
 0x480   :  { %2065 = verf.f32 %v1505_v53  ;;  %v2866_v62 = vadd.f32 %v2822_v33, %v1449_v63  ;;  %v1489_v16 = vmul.f32 0.5, %v2854_v61 }
 0x481   :  { %2067 = vrsqrt.f32 %v1388_v41  ;;  %v1447_v39 = vmul.f32 %v2814_v13, %v1425_v34  ;;  %v2874_v5 = vadd.f32 %v2822_v33, %v1448_v14 }
 0x482   :  { %v2048_v21 = vpop.eup %2047  ;;  %2069 = verf.f32 %v1504_v44  ;;  %v1503_v23 = vmul.f32 0.70710677, %v2866_v62 }
 0x483   :  { %v1542_v32 = vadd.f32 1.0, %v2048_v21  ;;  %2071 = vrsqrt.f32 %v1387_v46  ;;  %v2883_v52 = vadd.f32 %v2822_v33, %v1447_v39  ;;  %v1486_v39 = vmul.f32 0.5, %v2874_v5 }
 0x484   :  { %v2050_v35 = vpop.eup %2049  ;;  %2073 = verf.f32 %v1503_v23 }
 0x485   :  { %v2052_v15 = vpop.eup %2051  ;;  %v1558_v38 = vmul.f32 %v1542_v32, %v1494_v25  ;;  %v1541_v58 = vadd.f32 1.0, %v2050_v35  ;;  %v1501_v59 = vmul.f32 0.70710677, %v2883_v52  ;;  %v1488_v25 = vmul.f32 0.5, %v2858_v17 }
 0x486   :  { %v1424_v42 = vmul.f32 %v2052_v15, %v2771_v3  ;;  %v1502_v3 = vmul.f32 0.70710677, %v2874_v5  ;;  %v1487_v15 = vmul.f32 0.5, %v2866_v62 }
 0x487   :  { %1917 = vmatpush3.xpose.msk.msra.mxu1 %vm687_vm3, %v1558_v38  ;;  %v2054_v10 = vpop.eup %2053  ;;  %v1557_v48 = vmul.f32 %v1541_v58, %v1493_v6 }
 0x488   :  { %1918 = vmatprep.subr.mxu1 %v2226_v8  ;;  %v2056_v47 = vpop.eup %2055  ;;  %v1540_v26 = vadd.f32 1.0, %v2054_v10  ;;  %v1446_v37 = vmul.f32 %v2814_v13, %v1424_v42  ;;  %2075 = verf.f32 %v1502_v3 }
 0x489   :  { %v2058_v51 = vpop.eup %2057  ;;  %v1423_v30 = vmul.f32 %v2056_v47, %v2777_v31  ;;  %2077 = verf.f32 %v1501_v59 }
 0x48a   :  { %v2060_v27 = vpop.eup %2059  ;;  %v1556_v57 = vmul.f32 %v1540_v26, %v1492_v43  ;;  %v1539_v2 = vadd.f32 1.0, %v2058_v51  ;;  %v2893_v0 = vadd.f32 %v2822_v33, %v1446_v37 }
 0x48b   :  { %1919 = vmatpush3.xpose.msk.msra.mxu1 %vm687_vm3, %v1557_v48  ;;  %v2062_v28 = vpop.eup %2061  ;;  %v1445_v31 = vmul.f32 %v2814_v13, %v1423_v30  ;;  %v1422_v7 = vmul.f32 %v2060_v27, %v2783_v18  ;;  %v1485_v48 = vmul.f32 0.5, %v2883_v52 }
 0x48c   :  { %1920 = vmatprep.subr.mxu1 %v2226_v8  ;;  %v2064_v20 = vpop.eup %2063  ;;  %v1555_v60 = vmul.f32 %v1539_v2, %v1491_v54  ;;  %v1538_v36 = vadd.f32 1.0, %v2062_v28  ;;  %v1500_v1 = vmul.f32 0.70710677, %v2893_v0  ;;  %v1484_v43 = vmul.f32 0.5, %v2893_v0 }
 0x48d   :  { %v2066_v4 = vpop.eup %2065  ;;  %v1444_v55 = vmul.f32 %v2814_v13, %v1422_v7  ;;  %v1421_v18 = vmul.f32 %v2064_v20, %v2789_v19  ;;  %v2901_v9 = vadd.f32 %v2822_v33, %v1445_v31 }
 0x48e   :  { %v2068_v45 = vpop.eup %2067  ;;  %v1554_v11 = vmul.f32 %v1538_v36, %v1490_v49  ;;  %v1537_v12 = vadd.f32 1.0, %v2066_v4  ;;  %2079 = verf.f32 %v1500_v1 }
 0x48f   :  { %1921 = vmatpush3.xpose.msk.msra.mxu1 %vm687_vm3, %v1556_v57  ;;  %v2070_v40 = vpop.eup %2069  ;;  %v1443_v50 = vmul.f32 %v2814_v13, %v1421_v18  ;;  %v1420_v56 = vmul.f32 %v2068_v45, %v2795_v22  ;;  %v1499_v19 = vmul.f32 0.70710677, %v2901_v9  ;;  %v1466_v41 = vadd.f32 %v2822_v33, %v1444_v55  ;;  %v1559_v55 = vld [vmem:[%s2962_s11] sm:$0x1] }
 0x490   :  { %1922 = vmatprep.subr.mxu1 %v2226_v8  ;;  %v2072_v63 = vpop.eup %2071  ;;  %v1553_v53 = vmul.f32 %v1537_v12, %v1489_v16  ;;  %v1536_v21 = vadd.f32 1.0, %v2070_v40  ;;  %v1483_v52 = vmul.f32 0.5, %v2901_v9  ;;  %v1566_v18 = vlaneseq  ;;  %v1564_v12 = vpop.permute.xlu0 %1563 }
 0x491   :  { %v2074_v29 = vpop.eup %2073  ;;  %v1442_v61 = vmul.f32 %v2814_v13, %v1420_v56  ;;  %v1419_v32 = vmul.f32 %v2072_v63, %v2801_v24  ;;  %2081 = verf.f32 %v1499_v19  ;;  %v1498_v34 = vmul.f32 0.70710677, %v1466_v41 }
 0x492   :  { %v1552_v35 = vmul.f32 %v1536_v21, %v1488_v25  ;;  %v1535_v14 = vadd.f32 1.0, %v2074_v29  ;;  %v1465_v44 = vadd.f32 %v2822_v33, %v1443_v50  ;;  %v1482_v2 = vmul.f32 0.5, %v1466_v41 }
 0x493   :  { %1923 = vmatpush3.xpose.msk.msra.mxu1 %vm687_vm3, %v1555_v60  ;;  %v1441_v38 = vmul.f32 %v2814_v13, %v1419_v32  ;;  %v1464_v17 = vadd.f32 %v2822_v33, %v1442_v61  ;;  %2083 = verf.f32 %v1498_v34  ;;  %v1567_v9 = vshrl.u32 %v1566_v18, 7 }
 0x494   :  { %1924 = vmatprep.subr.mxu1 %v2226_v8  ;;  %v1551_v24 = vmul.f32 %v1535_v14, %v1487_v15  ;;  %v1497_v6 = vmul.f32 0.70710677, %v1465_v44  ;;  %v1481_v7 = vmul.f32 0.5, %v1465_v44 }
 0x495   :  { %v2076_v22 = vpop.eup %2075  ;;  %v1496_v42 = vmul.f32 0.70710677, %v1464_v17  ;;  %v1463_v13 = vadd.f32 %v2822_v33, %v1441_v38  ;;  %v1480_v59 = vmul.f32 0.5, %v1464_v17 }
 0x496   :  { %v1534_v58 = vadd.f32 1.0, %v2076_v22  ;;  %v2078_v10 = vpop.eup %2077  ;;  %2085 = verf.f32 %v1497_v6 }
 0x497   :  { %1925 = vmatpush3.xpose.msk.msra.mxu1 %vm687_vm3, %v1554_v11  ;;  %v1533_v62 = vadd.f32 1.0, %v2078_v10  ;;  %2087 = verf.f32 %v1496_v42  ;;  %v1495_v5 = vmul.f32 0.70710677, %v1463_v13  ;;  %v1479_v49 = vmul.f32 0.5, %v1463_v13 }
 0x498   :  { %1926 = vmatprep.subr.mxu1 %v2226_v8  ;;  %v1550_v46 = vmul.f32 %v1534_v58, %v1486_v39  ;;  %v1568_v11 = vsub.s32 0, %v1567_v9 }
 0x499   :  { %v1549_v23 = vmul.f32 %v1533_v62, %v1485_v48  ;;  %2089 = verf.f32 %v1495_v5 }
 0x49a   :  { %v1569_v1 = vrot.slane %v1564_v12, %v1568_v11 }
 0x49b   :  { %1927 = vmatpush3.xpose.msk.msra.mxu1 %vm687_vm3, %v1553_v53  ;;  %v2080_v47 = vpop.eup %2079 }
 0x49c   :  { %1928 = vmatprep.subr.mxu1 %v2226_v8  ;;  %v1532_v51 = vadd.f32 1.0, %v2080_v47 }
 0x49e   :  { %v2082_v26 = vpop.eup %2081  ;;  %v1548_v30 = vmul.f32 %v1532_v51, %v1484_v43 }
 0x49f   :  { %1929 = vmatpush3.xpose.msk.msra.mxu1 %vm687_vm3, %v1552_v35  ;;  %v1531_v33 = vadd.f32 1.0, %v2082_v26 }
 0x4a0   :  { %1930 = vmatprep.subr.mxu1 %v2226_v8  ;;  %v2084_v3 = vpop.eup %2083 }
 0x4a1   :  { %v1547_v27 = vmul.f32 %v1531_v33, %v1483_v52  ;;  %v1530_v37 = vadd.f32 1.0, %v2084_v3 }
 0x4a3   :  { %1931 = vmatpush3.xpose.msk.msra.mxu1 %vm687_vm3, %v1551_v24  ;;  %v2086_v57 = vpop.eup %2085  ;;  %v1546_v28 = vmul.f32 %v1530_v37, %v1482_v2 }
 0x4a4   :  { %1932 = vmatprep.subr.mxu1 %v2226_v8  ;;  %v1529_v54 = vadd.f32 1.0, %v2086_v57  ;;  %v2088_v31 = vpop.eup %2087 }
 0x4a5   :  { %v1528_v60 = vadd.f32 1.0, %v2088_v31 }
 0x4a6   :  { %v1545_v20 = vmul.f32 %v1529_v54, %v1481_v7  ;;  %v2090_v36 = vpop.eup %2089 }
 0x4a7   :  { %1933 = vmatpush3.xpose.msk.msra.mxu1 %vm687_vm3, %v1550_v46  ;;  %v1544_v0 = vmul.f32 %v1528_v60, %v1480_v59  ;;  %v1527_v4 = vadd.f32 1.0, %v2090_v36 }
 0x4a8   :  { %1934 = vmatprep.subr.mxu1 %v2226_v8 }
 0x4a9   :  { %v1543_v45 = vmul.f32 %v1527_v4, %v1479_v49 }
 0x4ab   :  { %1935 = vmatpush3.xpose.msk.msra.mxu1 %vm687_vm3, %v1549_v23 }
 0x4ac   :  { %1936 = vmatprep.subr.mxu1 %v2226_v8 }
 0x4af   :  { %1937 = vmatpush3.xpose.msk.msra.mxu1 %vm687_vm3, %v1548_v30 }
 0x4b0   :  { %1938 = vmatprep.subr.mxu1 %v2226_v8 }
 0x4b3   :  { %1939 = vmatpush3.xpose.msk.msra.mxu1 %vm687_vm3, %v1547_v27 }
 0x4b4   :  { %1940 = vmatprep.subr.mxu1 %v2226_v8 }
 0x4b7   :  { %1941 = vmatpush3.xpose.msk.msra.mxu1 %vm687_vm3, %v1546_v28 }
 0x4b8   :  { %1942 = vmatprep.subr.mxu1 %v2226_v8 }
 0x4bb   :  { %1943 = vmatpush3.xpose.msk.msra.mxu1 %vm687_vm3, %v1545_v20 }
 0x4bc   :  { %1944 = vmatprep.subr.mxu1 %v2226_v8 }
 0x4bf   :  { %1945 = vmatpush3.xpose.msk.msra.mxu1 %vm687_vm3, %v1544_v0 }
 0x4c0   :  { %1946 = vmatprep.subr.mxu1 %v2226_v8 }
 0x4c3   :  { %1947 = vmatpush3.xpose.msk.msra.mxu1 %vm687_vm3, %v1543_v45 }
 0x4c6   :  { %1949 = vmatmul.mubr.msk.f32.vlgmr.msra.gmra.mxu1 %vm687_vm3, %v1559_v55 }
 0x586   :  { %v1687_v40 = vpop.f32.mrf.mxu1 }
 0x587   :  { %v1688_v16 = vadd.f32 %v1687_v40, %v1569_v1 }
 0x588   :  { %v1950_v8 = vpop.f32.mrf.mxu1 }
 0x589   :  { %1691 = vst [vmem:[#allocation12] sm:$0x1] %v1688_v16 }
 0x58a   :  { %2202 = shalt.err (!%p2199_p1)
}
 0x58b   :  { %1701 = dma.vmem_to_hbm [thread:$0]  %s1699_s0, 16, %s2964_s13, [#allocation5]  }
 0x58c   :  { %2217 = dma.done.wait [#allocation5], 16  }
 0x58d   :  { %2218 = vsyncadd [#allocation5], 4294967280 }
 0x58e   :  { %1705 = vsyncpa [#allocation4], 1 }
 0x58f   :  { %1706 = vsyncpa [#allocation7], 1 }
 0x590   :  { %1707 = vsyncpa [#allocation10], 1 }
 0x591   :  { %1708 = vsyncpa [#allocation5], 1 }

</bundles_post_ra>
